<compile_context>
chip_gen: v5e
topology: v5e:2x2
jax: 0.10.0
libtpu: 0.0.40
codegen_flags: <defaults>
</compile_context>

<pallas_src>
import functools
import math

import jax
import jax.numpy as jnp
from jax.experimental import pallas as pl
from jax.experimental.pallas import tpu as pltpu


def _round_up(x, m):
    return ((x + m - 1) // m) * m


# ----------------------------------------------------------------------------- fused kernel

def _tnt_fused_kernel(feat_ref, cand_ref,
                      wfeat_ref,      # [F, 8*HP]   feat part of (w1, ws) per head, 128-lane aligned chunks
                      wtail2_ref,     # [2, 6*HP]   2-row tails of (w1, ws) for prob, mean, motion
                      wtailsc_ref,    # [T, 2*HP]   T-row tails of (w1, ws) for score
                      w2_ref,         # [4, H, H]
                      whead_ref,      # [H+1, 4*HW] head weights + bias row, one 128-lane chunk per head
                      vec_ref,        # [4, 9, H]   per head: b1,g1,be1,b2,g2,be2,bs,gs,bes
                      out_ref,        # [1, M, OUTP] merged output: cols 0:T trajs, col T score
                      *, n_cand, m_sel, hidden, traj_dim, hp, hw, outp):
    H, T, M, N, HP, HW = hidden, traj_dim, m_sel, n_cand, hp, hw
    eps = 1e-5  # torch.nn.LayerNorm default

    def layer_norm(v, g, b):
        mu = jnp.mean(v, axis=-1, keepdims=True)
        var = jnp.mean(jnp.square(v - mu), axis=-1, keepdims=True)
        return (v - mu) * jax.lax.rsqrt(var + eps) * g + b

    feat = feat_ref[0]                           # [1, F]
    cand = cand_ref[0]                           # [N, 2]

    # One tiny matmul produces the per-row-constant contribution of the repeated `feat` columns
    # for every Linear that touched them (x @ W == feat @ W_feat + tail @ W_tail).
    feat_rows = jnp.dot(feat, wfeat_ref[...], preferred_element_type=jnp.float32)   # [1, 8*HP]

    def mlp_block(t_main, t_short, head):
        """Residual MLP block given the per-row tail partials of both branches."""
        v = vec_ref[head]                                               # [9, H]
        f_main = feat_rows[:, (2 * head) * HP:(2 * head) * HP + H]      # [1, H] (aligned slice)
        f_short = feat_rows[:, (2 * head + 1) * HP:(2 * head + 1) * HP + H]
        h1 = jnp.maximum(layer_norm(t_main + f_main + v[0:1], v[1:2], v[2:3]), 0.0)
        h2 = layer_norm(jnp.dot(h1, w2_ref[head], preferred_element_type=jnp.float32)
                        + v[3:4], v[4:5], v[5:6])
        sc = layer_norm(t_short + f_short + v[6:7], v[7:8], v[8:9])
        return jnp.maximum(h2 + sc, 0.0)

    def head_out(h, head, width):
        c0 = head * HW
        w = whead_ref[0:H, c0:c0 + width]                               # [H, width]
        b = whead_ref[H:H + 1, c0:c0 + width]                           # [1, width]
        return jnp.dot(h, w, preferred_element_type=jnp.float32) + b

    wt = wtail2_ref[...]                                                # [2, 6*HP]

    # ------------------------------------------------ TargetPred (prob + mean, tail = cand [N,2])
    # K=2 contraction -> VPU broadcast-FMA instead of an MXU push/pop round trip.
    pm = cand[:, 0:1] * wt[0:1, 0:4 * HP] + cand[:, 1:2] * wt[1:2, 0:4 * HP]      # [N, 4*HP]
    h_prob = mlp_block(pm[:, 0 * HP:0 * HP + H], pm[:, 1 * HP:1 * HP + H], 0)     # [N, H]
    h_mean = mlp_block(pm[:, 2 * HP:2 * HP + H], pm[:, 3 * HP:3 * HP + H], 1)     # [N, H]

    # prob logits only: softmax(dim=0) dropped -- monotone, so top-k ordering is unchanged.
    p_col = head_out(h_prob, 0, 1)                                      # [N, 1]
    offset = head_out(h_mean, 1, 2)                                     # [N, 2]

    # ------------------------------------------------ rank-based top-M selection (no serial loop)
    # rank[i] = #{j : p[j] > p[i]  or  (p[j] == p[i] and j < i)}  -> lowest index first on ties,
    # i.e. the same ordering as jax.lax.top_k.
    # TODO(synk): torch.topk tie ordering is unspecified; lowest-index-first is used here.
    jj = jax.lax.broadcasted_iota(jnp.int32, (N, N), 0)                 # "other" candidate j (sublane)
    ii = jax.lax.broadcasted_iota(jnp.int32, (N, N), 1)                 # ranked candidate i (lane)
    eye = (jj == ii).astype(jnp.float32)
    diag_p = eye * p_col                                                # [N,N], p[j] on the diagonal
    ones_nn = jnp.ones((N, N), jnp.float32)
    p_lane = jnp.dot(ones_nn, diag_p, preferred_element_type=jnp.float32)   # [N,N], column i == p[i]
    # Row-player value is read back from the SAME matrix (its diagonal), so the comparator stays a
    # strict total order even if the MXU broadcast perturbed p.
    p_self = jnp.sum(p_lane * eye, axis=-1, keepdims=True)              # [N,1], p_self[j] = p_lane[j,j]
    ahead = (p_self > p_lane) | ((p_self == p_lane) & (jj < ii))        # [N,N] bool
    rank = jnp.dot(jnp.ones((1, N), jnp.float32), ahead.astype(jnp.float32),
                   preferred_element_type=jnp.float32)                  # [1,N] exact small integers
    kk = jax.lax.broadcasted_iota(jnp.int32, (M, 1), 0).astype(jnp.float32)   # [M,1]
    sel = (rank == kk).astype(jnp.float32)                              # [M,N] one-hot rows

    # Gather-by-matmul: loc = (cand + offset)[idx_k] for the M selected rows.
    target_loc = jnp.dot(sel, cand + offset, preferred_element_type=jnp.float32)  # [M, 2]

    # ------------------------------------------------ MotionEstimation (tail = loc [M,2])
    wt_mot = wt[:, 4 * HP:6 * HP]                                       # [2, 2*HP]
    mo = target_loc[:, 0:1] * wt_mot[0:1, :] + target_loc[:, 1:2] * wt_mot[1:2, :]   # [M, 2*HP]
    h_mot = mlp_block(mo[:, 0:H], mo[:, HP:HP + H], 2)                  # [M, H]
    trajs = head_out(h_mot, 2, T)                                       # [M, T]

    # ------------------------------------------------ TrajScoreSelection + softmax over the M rows
    st = jnp.dot(trajs, wtailsc_ref[...], preferred_element_type=jnp.float32)     # [M, 2*HP]
    h_sc = mlp_block(st[:, 0:H], st[:, HP:HP + H], 3)                   # [M, H]
    s_logit = head_out(h_sc, 3, 1)                                      # [M, 1]
    s = s_logit - jnp.max(s_logit, axis=0, keepdims=True)
    e = jnp.exp(s)
    score = e / jnp.sum(e, axis=0, keepdims=True)                       # exact normalisation

    # ------------------------------------------------ single lane-dense output block per instance
    parts = [trajs, score]
    if outp > T + 1:
        parts.append(jnp.zeros((M, outp - T - 1), jnp.float32))
    out_ref[0] = jnp.concatenate(parts, axis=1)                         # [M, OUTP]


# ----------------------------------------------------------------------------- params

def _init_mlp_head(key, d_in, hidden, d_out):
    ks = jax.random.split(key, 8)

    def lin(k, fan_in, shape):
        bound = 1.0 / math.sqrt(fan_in)  # mimic torch.nn.Linear default init
        return jax.random.uniform(k, shape, jnp.float32, -bound, bound)

    return {
        "w1": lin(ks[0], d_in, (d_in, hidden)),
        "b1": lin(ks[1], d_in, (1, hidden)),
        "g1": jnp.ones((1, hidden), jnp.float32),
        "be1": jnp.zeros((1, hidden), jnp.float32),
        "w2": lin(ks[2], hidden, (hidden, hidden)),
        "b2": lin(ks[3], hidden, (1, hidden)),
        "g2": jnp.ones((1, hidden), jnp.float32),
        "be2": jnp.zeros((1, hidden), jnp.float32),
        "ws": lin(ks[4], d_in, (d_in, hidden)),
        "bs": lin(ks[5], d_in, (1, hidden)),
        "gs": jnp.ones((1, hidden), jnp.float32),
        "bes": jnp.zeros((1, hidden), jnp.float32),
        "wh": lin(ks[6], hidden, (hidden, d_out)),
        "bh": lin(ks[7], hidden, (1, d_out)),
    }


def init_tnt_params(key, feat_dim, hidden, horizon):
    k1, k2, k3, k4 = jax.random.split(key, 4)
    return {
        "prob":   _init_mlp_head(k1, feat_dim + 2, hidden, 1),
        "mean":   _init_mlp_head(k2, feat_dim + 2, hidden, 2),
        "motion": _init_mlp_head(k3, feat_dim + 2, hidden, horizon * 2),
        "score":  _init_mlp_head(k4, feat_dim + horizon * 2, hidden, 1),
    }


def pack_tnt_params(params, feat_dim):
    """Pack the 4x14 per-head tensors into 6 lane-aligned slabs consumed by the fused kernel."""
    f = feat_dim
    heads = ("prob", "mean", "motion", "score")
    hidden = params["prob"]["w2"].shape[-1]
    t = params["score"]["w1"].shape[0] - f          # 2 * horizon
    hp = _round_up(hidden, 128)
    hw = _round_up(max(t, 2), 128)

    def pad_cols(w, width):
        return jnp.pad(w, ((0, 0), (0, width - w.shape[1])))

    # feat part of (w1, ws) for every head; every chunk zero-padded to a 128-lane boundary
    wfeat = jnp.concatenate([pad_cols(params[h][k][:f], hp)
                             for h in heads for k in ("w1", "ws")], axis=1)          # [F, 8*HP]
    # 2-row tails (input = cand / loc) of prob, mean, motion (consumed by VPU FMAs)
    wtail2 = jnp.concatenate([pad_cols(params[h][k][f:], hp)
                              for h in ("prob", "mean", "motion") for k in ("w1", "ws")],
                             axis=1)                                                 # [2, 6*HP]
    # T-row tails (input = trajs) of score (consumed by an MXU dot)
    wtailsc = jnp.concatenate([pad_cols(params["score"]["w1"][f:], hp),
                               pad_cols(params["score"]["ws"][f:], hp)], axis=1)     # [T, 2*HP]
    w2 = jnp.stack([params[h]["w2"] for h in heads])                                 # [4, H, H]
    # head weights with the bias folded in as the last row; one 128-lane chunk per head
    whead = jnp.concatenate(
        [pad_cols(jnp.concatenate([params[h]["wh"], params[h]["bh"]], axis=0), hw)
         for h in heads], axis=1)                                                    # [H+1, 4*HW]
    vec_keys = ("b1", "g1", "be1", "b2", "g2", "be2", "bs", "gs", "bes")
    vec = jnp.stack([jnp.concatenate([params[h][k] for k in vec_keys], axis=0)
                     for h in heads])                                                # [4, 9, H]
    return {"wfeat": wfeat, "wtail2": wtail2, "wtailsc": wtailsc,
            "w2": w2, "whead": whead, "vec": vec}


# ----------------------------------------------------------------------------- forward

def tnt_forward(target_feat, target_candidate, packed, *, m):
    """target_feat: [B, F], target_candidate: [B, N, 2] -> (trajs [B, m, 2*horizon], score [B, m])."""
    b, f = target_feat.shape
    n = target_candidate.shape[1]
    wfeat, wtail2, wtailsc = packed["wfeat"], packed["wtail2"], packed["wtailsc"]
    w2, whead, vec = packed["w2"], packed["whead"], packed["vec"]
    hidden = w2.shape[-1]
    hp = wfeat.shape[1] // 8
    hw = whead.shape[1] // 4
    t = wtailsc.shape[0]
    outp = _round_up(t + 1, 128)

    kernel = functools.partial(_tnt_fused_kernel, n_cand=n, m_sel=m, hidden=hidden,
                               traj_dim=t, hp=hp, hw=hw, outp=outp)

    feat3 = target_feat.reshape(b, 1, f)

    # Per-instance blocks walk the batch grid axis; weight slabs use constant index_maps so they
    # are DMA'd once and stay resident in VMEM across the whole batch.
    const2 = lambda i: (0, 0)
    const3 = lambda i: (0, 0, 0)
    in_specs = [
        pl.BlockSpec((1, 1, f), lambda i: (i, 0, 0)),
        pl.BlockSpec((1, n, 2), lambda i: (i, 0, 0)),
        pl.BlockSpec(wfeat.shape, const2),
        pl.BlockSpec(wtail2.shape, const2),
        pl.BlockSpec(wtailsc.shape, const2),
        pl.BlockSpec(w2.shape, const3),
        pl.BlockSpec(whead.shape, const2),
        pl.BlockSpec(vec.shape, const3),
    ]
    out_specs = pl.BlockSpec((1, m, outp), lambda i: (i, 0, 0))

    # Advisory cost estimate so XLA schedules the tiny custom call sensibly.
    flops_inst = (2 * (f * 8 * hp + 2 * n * hidden * hidden + 2 * m * hidden * hidden
                       + 3 * n * hidden + m * hidden * (t + 1)
                       + n * n * n + n * n + 2 * m * n + m * t * 2 * hp)
                  + 3 * (n * 4 * hp + m * 2 * hp))
    weight_bytes = sum(x.size * x.dtype.itemsize for x in (wfeat, wtail2, wtailsc, w2, whead, vec))
    io_bytes = (target_feat.size + target_candidate.size + b * m * outp) * 4
    transc = b * (6 * n + 7 * m)

    out = pl.pallas_call(
        kernel,
        grid=(b,),
        out_shape=jax.ShapeDtypeStruct((b, m, outp), jnp.float32),
        in_specs=in_specs,
        out_specs=out_specs,
        compiler_params=pltpu.CompilerParams(dimension_semantics=("parallel",)),
        cost_estimate=pl.CostEstimate(flops=int(b * flops_inst), transcendentals=int(transc),
                                      bytes_accessed=int(weight_bytes + io_bytes)),
    )(feat3, target_candidate, wfeat, wtail2, wtailsc, w2, whead, vec)

    return out[:, :, :t], out[:, :, t]


# ----------------------------------------------------------------------------- pure-JAX reference

def _ref_block(x, p):
    def ln(v, g, b):
        mu = jnp.mean(v, -1, keepdims=True)
        var = jnp.mean(jnp.square(v - mu), -1, keepdims=True)
        return (v - mu) * jax.lax.rsqrt(var + 1e-5) * g + b
    dot = functools.partial(jnp.dot, precision=jax.lax.Precision.HIGHEST)
    h1 = jnp.maximum(ln(dot(x, p["w1"]) + p["b1"], p["g1"], p["be1"]), 0.0)
    h2 = ln(dot(h1, p["w2"]) + p["b2"], p["g2"], p["be2"])
    sc = ln(dot(x, p["ws"]) + p["bs"], p["gs"], p["bes"])
    return dot(jnp.maximum(h2 + sc, 0.0), p["wh"]) + p["bh"]


def tnt_reference(target_feat, target_candidate, params, *, m):
    f = target_feat.shape[-1]
    n = target_candidate.shape[0]
    x = jnp.concatenate([jnp.broadcast_to(target_feat, (n, f)), target_candidate], axis=1)
    prob = _ref_block(x, params["prob"])[:, 0]
    offset = _ref_block(x, params["mean"])
    _, idx = jax.lax.top_k(prob, m)
    loc = target_candidate[idx] + offset[idx]
    fm = jnp.broadcast_to(target_feat, (m, f))
    trajs = _ref_block(jnp.concatenate([fm, loc], axis=1), params["motion"])
    s = _ref_block(jnp.concatenate([fm, trajs], axis=1), params["score"])[:, 0]
    s = s - jnp.max(s)
    e = jnp.exp(s)
    return trajs, e / jnp.sum(e), prob


# ----------------------------------------------------------------------------- main

if __name__ == "__main__":
    # Small shapes consistent with the module (defaults 64/30/50, scaled down), plus a small batch.
    FEAT_DIM = 32      # global_graph_width
    HIDDEN = 32        # target_pred_hid / motion_esti_hid / score_sel_hid
    HORIZON = 6        # horizon
    M = 8              # m (number of selected targets)
    N_CAND = 64        # number of target candidates
    BATCH = 4          # instances amortizing launch/DMA overhead over one grid axis

    key = jax.random.PRNGKey(0)
    kf, kc, kp = jax.random.split(key, 3)
    target_feat = jax.random.normal(kf, (BATCH, FEAT_DIM), dtype=jnp.float32)
    target_candidate = 5.0 * jax.random.normal(kc, (BATCH, N_CAND, 2), dtype=jnp.float32)
    params = init_tnt_params(kp, FEAT_DIM, HIDDEN, HORIZON)
    packed = pack_tnt_params(params, FEAT_DIM)   # one-time packing, outside the jitted forward

    fwd = jax.jit(functools.partial(tnt_forward, m=M))
    trajs, score = fwd(target_feat, target_candidate, packed)
    jax.block_until_ready((trajs, score))

    assert trajs.shape == (BATCH, M, 2 * HORIZON), trajs.shape
    assert score.shape == (BATCH, M), score.shape
    assert bool(jnp.isfinite(trajs).all()) and bool(jnp.isfinite(score).all())
    assert bool(jnp.all(jnp.abs(jnp.sum(score, axis=-1) - 1.0) < 1e-4))  # exact softmax normalisation

    # Compare against the pure-JAX reference of the original (un-fused) module, per instance.
    for bidx in range(BATCH):
        ref_trajs, ref_score, ref_prob = tnt_reference(
            target_feat[bidx:bidx + 1], target_candidate[bidx], params, m=M)
        srt = jnp.sort(ref_prob)[::-1]
        if float(srt[M - 1] - srt[M]) > 5e-3:   # skip only if the top-k boundary is a near-tie
            assert jnp.allclose(trajs[bidx], ref_trajs, atol=2e-3, rtol=2e-3), \
                (bidx, float(jnp.max(jnp.abs(trajs[bidx] - ref_trajs))))
            assert jnp.allclose(score[bidx], ref_score, atol=2e-3), \
                (bidx, float(jnp.max(jnp.abs(score[bidx] - ref_score))))

    print("KERNEL_OK")
</pallas_src>

<mosaic_0001>
module attributes {stable_mosaic.version = 11 : i64} {
  func.func @_tnt_fused_kernel(%arg0: i32, %arg1: memref<1x1x32xf32, #tpu.memory_space<vmem>>, %arg2: memref<1x64x2xf32, #tpu.memory_space<vmem>>, %arg3: memref<32x1024xf32, #tpu.memory_space<vmem>>, %arg4: memref<2x768xf32, #tpu.memory_space<vmem>>, %arg5: memref<12x256xf32, #tpu.memory_space<vmem>>, %arg6: memref<4x32x32xf32, #tpu.memory_space<vmem>>, %arg7: memref<33x512xf32, #tpu.memory_space<vmem>>, %arg8: memref<4x9x32xf32, #tpu.memory_space<vmem>>, %arg9: memref<1x8x128xf32, #tpu.memory_space<vmem>>) attributes {dimension_semantics = [#tpu.dimension_semantics<parallel>], iteration_bounds = array<i64: 4>, scalar_prefetch = 0 : i64, scratch_operands = 0 : i64, tpu.core_type = #tpu.core_type<tc>, window_params = [{transform_indices = @transform_0, window_bounds = array<i64: 1, 1, 32>}, {transform_indices = @transform_1, window_bounds = array<i64: 1, 64, 2>}, {pipeline_mode = #tpu.pipeline_mode<synchronous>, transform_indices = @transform_2, window_bounds = array<i64: 32, 1024>}, {pipeline_mode = #tpu.pipeline_mode<synchronous>, transform_indices = @transform_3, window_bounds = array<i64: 2, 768>}, {pipeline_mode = #tpu.pipeline_mode<synchronous>, transform_indices = @transform_4, window_bounds = array<i64: 12, 256>}, {pipeline_mode = #tpu.pipeline_mode<synchronous>, transform_indices = @transform_5, window_bounds = array<i64: 4, 32, 32>}, {pipeline_mode = #tpu.pipeline_mode<synchronous>, transform_indices = @transform_6, window_bounds = array<i64: 33, 512>}, {pipeline_mode = #tpu.pipeline_mode<synchronous>, transform_indices = @transform_7, window_bounds = array<i64: 4, 9, 32>}, {transform_indices = @transform_8, window_bounds = array<i64: 1, 8, 128>}]} {
    %c0 = arith.constant 0 : index
    %c0_0 = arith.constant 0 : index
    %c0_1 = arith.constant 0 : index
    %0 = vector.load %arg1[%c0, %c0_0, %c0_1] : memref<1x1x32xf32, #tpu.memory_space<vmem>>, vector<1x1x32xf32>
    %1 = vector.shape_cast %0 : vector<1x1x32xf32> to vector<1x32xf32>
    %c0_2 = arith.constant 0 : index
    %c0_3 = arith.constant 0 : index
    %c0_4 = arith.constant 0 : index
    %2 = vector.load %arg2[%c0_2, %c0_3, %c0_4] : memref<1x64x2xf32, #tpu.memory_space<vmem>>, vector<1x64x2xf32>
    %3 = vector.shape_cast %2 : vector<1x64x2xf32> to vector<64x2xf32>
    %c0_5 = arith.constant 0 : index
    %c0_6 = arith.constant 0 : index
    %4 = vector.load %arg3[%c0_5, %c0_6] : memref<32x1024xf32, #tpu.memory_space<vmem>>, vector<32x1024xf32>
    %cst = arith.constant dense<0.000000e+00> : vector<1x1024xf32>
    %5 = tpu.matmul %1, %4, %cst {dimension_numbers = #tpu.dot_dimension_numbers<[1], [0], [0], [1], [0, 0, 1, 1], [], []>} : vector<1x32xf32>, vector<32x1024xf32>, vector<1x1024xf32> -> vector<1x1024xf32>
    %c0_7 = arith.constant 0 : index
    %c0_8 = arith.constant 0 : index
    %6 = vector.load %arg4[%c0_7, %c0_8] : memref<2x768xf32, #tpu.memory_space<vmem>>, vector<2x768xf32>
    %7 = vector.extract_strided_slice %3 {offsets = [0, 0], sizes = [64, 1], strides = [1, 1]} : vector<64x2xf32> to vector<64x1xf32>
    %8 = vector.extract_strided_slice %6 {offsets = [0, 0], sizes = [1, 512], strides = [1, 1]} : vector<2x768xf32> to vector<1x512xf32>
    %9 = vector.broadcast %7 : vector<64x1xf32> to vector<64x512xf32>
    %10 = vector.broadcast %8 : vector<1x512xf32> to vector<64x512xf32>
    %11 = arith.mulf %9, %10 : vector<64x512xf32>
    %12 = vector.extract_strided_slice %3 {offsets = [0, 1], sizes = [64, 1], strides = [1, 1]} : vector<64x2xf32> to vector<64x1xf32>
    %13 = vector.extract_strided_slice %6 {offsets = [1, 0], sizes = [1, 512], strides = [1, 1]} : vector<2x768xf32> to vector<1x512xf32>
    %14 = vector.broadcast %12 : vector<64x1xf32> to vector<64x512xf32>
    %15 = vector.broadcast %13 : vector<1x512xf32> to vector<64x512xf32>
    %16 = arith.mulf %14, %15 : vector<64x512xf32>
    %17 = arith.addf %11, %16 : vector<64x512xf32>
    %18 = vector.extract_strided_slice %17 {offsets = [0, 0], sizes = [64, 32], strides = [1, 1]} : vector<64x512xf32> to vector<64x32xf32>
    %19 = vector.extract_strided_slice %17 {offsets = [0, 128], sizes = [64, 32], strides = [1, 1]} : vector<64x512xf32> to vector<64x32xf32>
    %c0_9 = arith.constant 0 : index
    %c0_10 = arith.constant 0 : index
    %c0_11 = arith.constant 0 : index
    %20 = vector.load %arg8[%c0_9, %c0_10, %c0_11] : memref<4x9x32xf32, #tpu.memory_space<vmem>>, vector<1x9x32xf32>
    %21 = vector.shape_cast %20 : vector<1x9x32xf32> to vector<9x32xf32>
    %22 = vector.extract_strided_slice %5 {offsets = [0, 0], sizes = [1, 32], strides = [1, 1]} : vector<1x1024xf32> to vector<1x32xf32>
    %23 = vector.extract_strided_slice %5 {offsets = [0, 128], sizes = [1, 32], strides = [1, 1]} : vector<1x1024xf32> to vector<1x32xf32>
    %24 = vector.broadcast %22 : vector<1x32xf32> to vector<64x32xf32>
    %25 = arith.addf %18, %24 : vector<64x32xf32>
    %26 = vector.extract_strided_slice %21 {offsets = [0, 0], sizes = [1, 32], strides = [1, 1]} : vector<9x32xf32> to vector<1x32xf32>
    %27 = vector.broadcast %26 : vector<1x32xf32> to vector<64x32xf32>
    %28 = arith.addf %25, %27 : vector<64x32xf32>
    %29 = vector.extract_strided_slice %21 {offsets = [1, 0], sizes = [1, 32], strides = [1, 1]} : vector<9x32xf32> to vector<1x32xf32>
    %30 = vector.extract_strided_slice %21 {offsets = [2, 0], sizes = [1, 32], strides = [1, 1]} : vector<9x32xf32> to vector<1x32xf32>
    %cst_12 = arith.constant dense<0.000000e+00> : vector<64xf32>
    %31 = vector.multi_reduction <add>, %28, %cst_12 [1] : vector<64x32xf32> to vector<64xf32>
    %32 = vector.shape_cast %31 : vector<64xf32> to vector<64x1xf32>
    %cst_13 = arith.constant 3.200000e+01 : f32
    %33 = vector.broadcast %cst_13 : f32 to vector<64x1xf32>
    %34 = arith.divf %32, %33 : vector<64x1xf32>
    %35 = vector.broadcast %34 : vector<64x1xf32> to vector<64x32xf32>
    %36 = arith.subf %28, %35 : vector<64x32xf32>
    %37 = arith.mulf %36, %36 : vector<64x32xf32>
    %cst_14 = arith.constant dense<0.000000e+00> : vector<64xf32>
    %38 = vector.multi_reduction <add>, %37, %cst_14 [1] : vector<64x32xf32> to vector<64xf32>
    %39 = vector.shape_cast %38 : vector<64xf32> to vector<64x1xf32>
    %cst_15 = arith.constant 3.200000e+01 : f32
    %40 = vector.broadcast %cst_15 : f32 to vector<64x1xf32>
    %41 = arith.divf %39, %40 : vector<64x1xf32>
    %42 = vector.broadcast %34 : vector<64x1xf32> to vector<64x32xf32>
    %43 = arith.subf %28, %42 : vector<64x32xf32>
    %cst_16 = arith.constant 9.99999974E-6 : f32
    %44 = vector.broadcast %cst_16 : f32 to vector<64x1xf32>
    %45 = arith.addf %41, %44 : vector<64x1xf32>
    %46 = math.rsqrt %45 : vector<64x1xf32>
    %47 = vector.broadcast %46 : vector<64x1xf32> to vector<64x32xf32>
    %48 = arith.mulf %43, %47 : vector<64x32xf32>
    %49 = vector.broadcast %29 : vector<1x32xf32> to vector<64x32xf32>
    %50 = arith.mulf %48, %49 : vector<64x32xf32>
    %51 = vector.broadcast %30 : vector<1x32xf32> to vector<64x32xf32>
    %52 = arith.addf %50, %51 : vector<64x32xf32>
    %cst_17 = arith.constant 0.000000e+00 : f32
    %53 = vector.broadcast %cst_17 : f32 to vector<64x32xf32>
    %54 = arith.maximumf %52, %53 : vector<64x32xf32>
    %c0_18 = arith.constant 0 : index
    %c0_19 = arith.constant 0 : index
    %c0_20 = arith.constant 0 : index
    %55 = vector.load %arg6[%c0_18, %c0_19, %c0_20] : memref<4x32x32xf32, #tpu.memory_space<vmem>>, vector<1x32x32xf32>
    %56 = vector.shape_cast %55 : vector<1x32x32xf32> to vector<32x32xf32>
    %cst_21 = arith.constant dense<0.000000e+00> : vector<64x32xf32>
    %57 = tpu.matmul %54, %56, %cst_21 {dimension_numbers = #tpu.dot_dimension_numbers<[1], [0], [0], [1], [0, 0, 1, 1], [], []>} : vector<64x32xf32>, vector<32x32xf32>, vector<64x32xf32> -> vector<64x32xf32>
    %58 = vector.extract_strided_slice %21 {offsets = [3, 0], sizes = [1, 32], strides = [1, 1]} : vector<9x32xf32> to vector<1x32xf32>
    %59 = vector.broadcast %58 : vector<1x32xf32> to vector<64x32xf32>
    %60 = arith.addf %57, %59 : vector<64x32xf32>
    %61 = vector.extract_strided_slice %21 {offsets = [4, 0], sizes = [1, 32], strides = [1, 1]} : vector<9x32xf32> to vector<1x32xf32>
    %62 = vector.extract_strided_slice %21 {offsets = [5, 0], sizes = [1, 32], strides = [1, 1]} : vector<9x32xf32> to vector<1x32xf32>
    %cst_22 = arith.constant dense<0.000000e+00> : vector<64xf32>
    %63 = vector.multi_reduction <add>, %60, %cst_22 [1] : vector<64x32xf32> to vector<64xf32>
    %64 = vector.shape_cast %63 : vector<64xf32> to vector<64x1xf32>
    %cst_23 = arith.constant 3.200000e+01 : f32
    %65 = vector.broadcast %cst_23 : f32 to vector<64x1xf32>
    %66 = arith.divf %64, %65 : vector<64x1xf32>
    %67 = vector.broadcast %66 : vector<64x1xf32> to vector<64x32xf32>
    %68 = arith.subf %60, %67 : vector<64x32xf32>
    %69 = arith.mulf %68, %68 : vector<64x32xf32>
    %cst_24 = arith.constant dense<0.000000e+00> : vector<64xf32>
    %70 = vector.multi_reduction <add>, %69, %cst_24 [1] : vector<64x32xf32> to vector<64xf32>
    %71 = vector.shape_cast %70 : vector<64xf32> to vector<64x1xf32>
    %cst_25 = arith.constant 3.200000e+01 : f32
    %72 = vector.broadcast %cst_25 : f32 to vector<64x1xf32>
    %73 = arith.divf %71, %72 : vector<64x1xf32>
    %74 = vector.broadcast %66 : vector<64x1xf32> to vector<64x32xf32>
    %75 = arith.subf %60, %74 : vector<64x32xf32>
    %cst_26 = arith.constant 9.99999974E-6 : f32
    %76 = vector.broadcast %cst_26 : f32 to vector<64x1xf32>
    %77 = arith.addf %73, %76 : vector<64x1xf32>
    %78 = math.rsqrt %77 : vector<64x1xf32>
    %79 = vector.broadcast %78 : vector<64x1xf32> to vector<64x32xf32>
    %80 = arith.mulf %75, %79 : vector<64x32xf32>
    %81 = vector.broadcast %61 : vector<1x32xf32> to vector<64x32xf32>
    %82 = arith.mulf %80, %81 : vector<64x32xf32>
    %83 = vector.broadcast %62 : vector<1x32xf32> to vector<64x32xf32>
    %84 = arith.addf %82, %83 : vector<64x32xf32>
    %85 = vector.broadcast %23 : vector<1x32xf32> to vector<64x32xf32>
    %86 = arith.addf %19, %85 : vector<64x32xf32>
    %87 = vector.extract_strided_slice %21 {offsets = [6, 0], sizes = [1, 32], strides = [1, 1]} : vector<9x32xf32> to vector<1x32xf32>
    %88 = vector.broadcast %87 : vector<1x32xf32> to vector<64x32xf32>
    %89 = arith.addf %86, %88 : vector<64x32xf32>
    %90 = vector.extract_strided_slice %21 {offsets = [7, 0], sizes = [1, 32], strides = [1, 1]} : vector<9x32xf32> to vector<1x32xf32>
    %91 = vector.extract_strided_slice %21 {offsets = [8, 0], sizes = [1, 32], strides = [1, 1]} : vector<9x32xf32> to vector<1x32xf32>
    %cst_27 = arith.constant dense<0.000000e+00> : vector<64xf32>
    %92 = vector.multi_reduction <add>, %89, %cst_27 [1] : vector<64x32xf32> to vector<64xf32>
    %93 = vector.shape_cast %92 : vector<64xf32> to vector<64x1xf32>
    %cst_28 = arith.constant 3.200000e+01 : f32
    %94 = vector.broadcast %cst_28 : f32 to vector<64x1xf32>
    %95 = arith.divf %93, %94 : vector<64x1xf32>
    %96 = vector.broadcast %95 : vector<64x1xf32> to vector<64x32xf32>
    %97 = arith.subf %89, %96 : vector<64x32xf32>
    %98 = arith.mulf %97, %97 : vector<64x32xf32>
    %cst_29 = arith.constant dense<0.000000e+00> : vector<64xf32>
    %99 = vector.multi_reduction <add>, %98, %cst_29 [1] : vector<64x32xf32> to vector<64xf32>
    %100 = vector.shape_cast %99 : vector<64xf32> to vector<64x1xf32>
    %cst_30 = arith.constant 3.200000e+01 : f32
    %101 = vector.broadcast %cst_30 : f32 to vector<64x1xf32>
    %102 = arith.divf %100, %101 : vector<64x1xf32>
    %103 = vector.broadcast %95 : vector<64x1xf32> to vector<64x32xf32>
    %104 = arith.subf %89, %103 : vector<64x32xf32>
    %cst_31 = arith.constant 9.99999974E-6 : f32
    %105 = vector.broadcast %cst_31 : f32 to vector<64x1xf32>
    %106 = arith.addf %102, %105 : vector<64x1xf32>
    %107 = math.rsqrt %106 : vector<64x1xf32>
    %108 = vector.broadcast %107 : vector<64x1xf32> to vector<64x32xf32>
    %109 = arith.mulf %104, %108 : vector<64x32xf32>
    %110 = vector.broadcast %90 : vector<1x32xf32> to vector<64x32xf32>
    %111 = arith.mulf %109, %110 : vector<64x32xf32>
    %112 = vector.broadcast %91 : vector<1x32xf32> to vector<64x32xf32>
    %113 = arith.addf %111, %112 : vector<64x32xf32>
    %114 = arith.addf %84, %113 : vector<64x32xf32>
    %cst_32 = arith.constant 0.000000e+00 : f32
    %115 = vector.broadcast %cst_32 : f32 to vector<64x32xf32>
    %116 = arith.maximumf %114, %115 : vector<64x32xf32>
    %117 = vector.extract_strided_slice %17 {offsets = [0, 256], sizes = [64, 32], strides = [1, 1]} : vector<64x512xf32> to vector<64x32xf32>
    %118 = vector.extract_strided_slice %17 {offsets = [0, 384], sizes = [64, 32], strides = [1, 1]} : vector<64x512xf32> to vector<64x32xf32>
    %c1 = arith.constant 1 : index
    %c0_33 = arith.constant 0 : index
    %c0_34 = arith.constant 0 : index
    %119 = vector.load %arg8[%c1, %c0_33, %c0_34] : memref<4x9x32xf32, #tpu.memory_space<vmem>>, vector<1x9x32xf32>
    %120 = vector.shape_cast %119 : vector<1x9x32xf32> to vector<9x32xf32>
    %121 = vector.extract_strided_slice %5 {offsets = [0, 256], sizes = [1, 32], strides = [1, 1]} : vector<1x1024xf32> to vector<1x32xf32>
    %122 = vector.extract_strided_slice %5 {offsets = [0, 384], sizes = [1, 32], strides = [1, 1]} : vector<1x1024xf32> to vector<1x32xf32>
    %123 = vector.broadcast %121 : vector<1x32xf32> to vector<64x32xf32>
    %124 = arith.addf %117, %123 : vector<64x32xf32>
    %125 = vector.extract_strided_slice %120 {offsets = [0, 0], sizes = [1, 32], strides = [1, 1]} : vector<9x32xf32> to vector<1x32xf32>
    %126 = vector.broadcast %125 : vector<1x32xf32> to vector<64x32xf32>
    %127 = arith.addf %124, %126 : vector<64x32xf32>
    %128 = vector.extract_strided_slice %120 {offsets = [1, 0], sizes = [1, 32], strides = [1, 1]} : vector<9x32xf32> to vector<1x32xf32>
    %129 = vector.extract_strided_slice %120 {offsets = [2, 0], sizes = [1, 32], strides = [1, 1]} : vector<9x32xf32> to vector<1x32xf32>
    %cst_35 = arith.constant dense<0.000000e+00> : vector<64xf32>
    %130 = vector.multi_reduction <add>, %127, %cst_35 [1] : vector<64x32xf32> to vector<64xf32>
    %131 = vector.shape_cast %130 : vector<64xf32> to vector<64x1xf32>
    %cst_36 = arith.constant 3.200000e+01 : f32
    %132 = vector.broadcast %cst_36 : f32 to vector<64x1xf32>
    %133 = arith.divf %131, %132 : vector<64x1xf32>
    %134 = vector.broadcast %133 : vector<64x1xf32> to vector<64x32xf32>
    %135 = arith.subf %127, %134 : vector<64x32xf32>
    %136 = arith.mulf %135, %135 : vector<64x32xf32>
    %cst_37 = arith.constant dense<0.000000e+00> : vector<64xf32>
    %137 = vector.multi_reduction <add>, %136, %cst_37 [1] : vector<64x32xf32> to vector<64xf32>
    %138 = vector.shape_cast %137 : vector<64xf32> to vector<64x1xf32>
    %cst_38 = arith.constant 3.200000e+01 : f32
    %139 = vector.broadcast %cst_38 : f32 to vector<64x1xf32>
    %140 = arith.divf %138, %139 : vector<64x1xf32>
    %141 = vector.broadcast %133 : vector<64x1xf32> to vector<64x32xf32>
    %142 = arith.subf %127, %141 : vector<64x32xf32>
    %cst_39 = arith.constant 9.99999974E-6 : f32
    %143 = vector.broadcast %cst_39 : f32 to vector<64x1xf32>
    %144 = arith.addf %140, %143 : vector<64x1xf32>
    %145 = math.rsqrt %144 : vector<64x1xf32>
    %146 = vector.broadcast %145 : vector<64x1xf32> to vector<64x32xf32>
    %147 = arith.mulf %142, %146 : vector<64x32xf32>
    %148 = vector.broadcast %128 : vector<1x32xf32> to vector<64x32xf32>
    %149 = arith.mulf %147, %148 : vector<64x32xf32>
    %150 = vector.broadcast %129 : vector<1x32xf32> to vector<64x32xf32>
    %151 = arith.addf %149, %150 : vector<64x32xf32>
    %cst_40 = arith.constant 0.000000e+00 : f32
    %152 = vector.broadcast %cst_40 : f32 to vector<64x32xf32>
    %153 = arith.maximumf %151, %152 : vector<64x32xf32>
    %c1_41 = arith.constant 1 : index
    %c0_42 = arith.constant 0 : index
    %c0_43 = arith.constant 0 : index
    %154 = vector.load %arg6[%c1_41, %c0_42, %c0_43] : memref<4x32x32xf32, #tpu.memory_space<vmem>>, vector<1x32x32xf32>
    %155 = vector.shape_cast %154 : vector<1x32x32xf32> to vector<32x32xf32>
    %cst_44 = arith.constant dense<0.000000e+00> : vector<64x32xf32>
    %156 = tpu.matmul %153, %155, %cst_44 {dimension_numbers = #tpu.dot_dimension_numbers<[1], [0], [0], [1], [0, 0, 1, 1], [], []>} : vector<64x32xf32>, vector<32x32xf32>, vector<64x32xf32> -> vector<64x32xf32>
    %157 = vector.extract_strided_slice %120 {offsets = [3, 0], sizes = [1, 32], strides = [1, 1]} : vector<9x32xf32> to vector<1x32xf32>
    %158 = vector.broadcast %157 : vector<1x32xf32> to vector<64x32xf32>
    %159 = arith.addf %156, %158 : vector<64x32xf32>
    %160 = vector.extract_strided_slice %120 {offsets = [4, 0], sizes = [1, 32], strides = [1, 1]} : vector<9x32xf32> to vector<1x32xf32>
    %161 = vector.extract_strided_slice %120 {offsets = [5, 0], sizes = [1, 32], strides = [1, 1]} : vector<9x32xf32> to vector<1x32xf32>
    %cst_45 = arith.constant dense<0.000000e+00> : vector<64xf32>
    %162 = vector.multi_reduction <add>, %159, %cst_45 [1] : vector<64x32xf32> to vector<64xf32>
    %163 = vector.shape_cast %162 : vector<64xf32> to vector<64x1xf32>
    %cst_46 = arith.constant 3.200000e+01 : f32
    %164 = vector.broadcast %cst_46 : f32 to vector<64x1xf32>
    %165 = arith.divf %163, %164 : vector<64x1xf32>
    %166 = vector.broadcast %165 : vector<64x1xf32> to vector<64x32xf32>
    %167 = arith.subf %159, %166 : vector<64x32xf32>
    %168 = arith.mulf %167, %167 : vector<64x32xf32>
    %cst_47 = arith.constant dense<0.000000e+00> : vector<64xf32>
    %169 = vector.multi_reduction <add>, %168, %cst_47 [1] : vector<64x32xf32> to vector<64xf32>
    %170 = vector.shape_cast %169 : vector<64xf32> to vector<64x1xf32>
    %cst_48 = arith.constant 3.200000e+01 : f32
    %171 = vector.broadcast %cst_48 : f32 to vector<64x1xf32>
    %172 = arith.divf %170, %171 : vector<64x1xf32>
    %173 = vector.broadcast %165 : vector<64x1xf32> to vector<64x32xf32>
    %174 = arith.subf %159, %173 : vector<64x32xf32>
    %cst_49 = arith.constant 9.99999974E-6 : f32
    %175 = vector.broadcast %cst_49 : f32 to vector<64x1xf32>
    %176 = arith.addf %172, %175 : vector<64x1xf32>
    %177 = math.rsqrt %176 : vector<64x1xf32>
    %178 = vector.broadcast %177 : vector<64x1xf32> to vector<64x32xf32>
    %179 = arith.mulf %174, %178 : vector<64x32xf32>
    %180 = vector.broadcast %160 : vector<1x32xf32> to vector<64x32xf32>
    %181 = arith.mulf %179, %180 : vector<64x32xf32>
    %182 = vector.broadcast %161 : vector<1x32xf32> to vector<64x32xf32>
    %183 = arith.addf %181, %182 : vector<64x32xf32>
    %184 = vector.broadcast %122 : vector<1x32xf32> to vector<64x32xf32>
    %185 = arith.addf %118, %184 : vector<64x32xf32>
    %186 = vector.extract_strided_slice %120 {offsets = [6, 0], sizes = [1, 32], strides = [1, 1]} : vector<9x32xf32> to vector<1x32xf32>
    %187 = vector.broadcast %186 : vector<1x32xf32> to vector<64x32xf32>
    %188 = arith.addf %185, %187 : vector<64x32xf32>
    %189 = vector.extract_strided_slice %120 {offsets = [7, 0], sizes = [1, 32], strides = [1, 1]} : vector<9x32xf32> to vector<1x32xf32>
    %190 = vector.extract_strided_slice %120 {offsets = [8, 0], sizes = [1, 32], strides = [1, 1]} : vector<9x32xf32> to vector<1x32xf32>
    %cst_50 = arith.constant dense<0.000000e+00> : vector<64xf32>
    %191 = vector.multi_reduction <add>, %188, %cst_50 [1] : vector<64x32xf32> to vector<64xf32>
    %192 = vector.shape_cast %191 : vector<64xf32> to vector<64x1xf32>
    %cst_51 = arith.constant 3.200000e+01 : f32
    %193 = vector.broadcast %cst_51 : f32 to vector<64x1xf32>
    %194 = arith.divf %192, %193 : vector<64x1xf32>
    %195 = vector.broadcast %194 : vector<64x1xf32> to vector<64x32xf32>
    %196 = arith.subf %188, %195 : vector<64x32xf32>
    %197 = arith.mulf %196, %196 : vector<64x32xf32>
    %cst_52 = arith.constant dense<0.000000e+00> : vector<64xf32>
    %198 = vector.multi_reduction <add>, %197, %cst_52 [1] : vector<64x32xf32> to vector<64xf32>
    %199 = vector.shape_cast %198 : vector<64xf32> to vector<64x1xf32>
    %cst_53 = arith.constant 3.200000e+01 : f32
    %200 = vector.broadcast %cst_53 : f32 to vector<64x1xf32>
    %201 = arith.divf %199, %200 : vector<64x1xf32>
    %202 = vector.broadcast %194 : vector<64x1xf32> to vector<64x32xf32>
    %203 = arith.subf %188, %202 : vector<64x32xf32>
    %cst_54 = arith.constant 9.99999974E-6 : f32
    %204 = vector.broadcast %cst_54 : f32 to vector<64x1xf32>
    %205 = arith.addf %201, %204 : vector<64x1xf32>
    %206 = math.rsqrt %205 : vector<64x1xf32>
    %207 = vector.broadcast %206 : vector<64x1xf32> to vector<64x32xf32>
    %208 = arith.mulf %203, %207 : vector<64x32xf32>
    %209 = vector.broadcast %189 : vector<1x32xf32> to vector<64x32xf32>
    %210 = arith.mulf %208, %209 : vector<64x32xf32>
    %211 = vector.broadcast %190 : vector<1x32xf32> to vector<64x32xf32>
    %212 = arith.addf %210, %211 : vector<64x32xf32>
    %213 = arith.addf %183, %212 : vector<64x32xf32>
    %cst_55 = arith.constant 0.000000e+00 : f32
    %214 = vector.broadcast %cst_55 : f32 to vector<64x32xf32>
    %215 = arith.maximumf %213, %214 : vector<64x32xf32>
    %c0_56 = arith.constant 0 : index
    %c0_57 = arith.constant 0 : index
    %216 = vector.load %arg7[%c0_56, %c0_57] : memref<33x512xf32, #tpu.memory_space<vmem>>, vector<32x1xf32>
    %c32 = arith.constant 32 : index
    %c0_58 = arith.constant 0 : index
    %217 = vector.load %arg7[%c32, %c0_58] : memref<33x512xf32, #tpu.memory_space<vmem>>, vector<1x1xf32>
    %cst_59 = arith.constant dense<0.000000e+00> : vector<64x1xf32>
    %218 = tpu.matmul %116, %216, %cst_59 {dimension_numbers = #tpu.dot_dimension_numbers<[1], [0], [0], [1], [0, 0, 1, 1], [], []>} : vector<64x32xf32>, vector<32x1xf32>, vector<64x1xf32> -> vector<64x1xf32>
    %219 = vector.broadcast %217 : vector<1x1xf32> to vector<64x1xf32>
    %220 = arith.addf %218, %219 : vector<64x1xf32>
    %c0_60 = arith.constant 0 : index
    %c128 = arith.constant 128 : index
    %221 = vector.load %arg7[%c0_60, %c128] : memref<33x512xf32, #tpu.memory_space<vmem>>, vector<32x2xf32>
    %c32_61 = arith.constant 32 : index
    %c128_62 = arith.constant 128 : index
    %222 = vector.load %arg7[%c32_61, %c128_62] : memref<33x512xf32, #tpu.memory_space<vmem>>, vector<1x2xf32>
    %cst_63 = arith.constant dense<0.000000e+00> : vector<64x2xf32>
    %223 = tpu.matmul %215, %221, %cst_63 {dimension_numbers = #tpu.dot_dimension_numbers<[1], [0], [0], [1], [0, 0, 1, 1], [], []>} : vector<64x32xf32>, vector<32x2xf32>, vector<64x2xf32> -> vector<64x2xf32>
    %224 = vector.broadcast %222 : vector<1x2xf32> to vector<64x2xf32>
    %225 = arith.addf %223, %224 : vector<64x2xf32>
    %226 = tpu.iota {dimensions = array<i32: 0>} : vector<64x64xi32>
    %227 = tpu.iota {dimensions = array<i32: 1>} : vector<64x64xi32>
    %228 = arith.cmpi eq, %226, %227 : vector<64x64xi32>
    %229 = arith.extui %228 : vector<64x64xi1> to vector<64x64xi32>
    %230 = arith.sitofp %229 : vector<64x64xi32> to vector<64x64xf32>
    %231 = vector.broadcast %220 : vector<64x1xf32> to vector<64x64xf32>
    %232 = arith.mulf %230, %231 : vector<64x64xf32>
    %cst_64 = arith.constant 1.000000e+00 : f32
    %233 = vector.broadcast %cst_64 : f32 to vector<64x64xf32>
    %cst_65 = arith.constant dense<0.000000e+00> : vector<64x64xf32>
    %234 = tpu.matmul %233, %232, %cst_65 {dimension_numbers = #tpu.dot_dimension_numbers<[1], [0], [0], [1], [0, 0, 1, 1], [], []>} : vector<64x64xf32>, vector<64x64xf32>, vector<64x64xf32> -> vector<64x64xf32>
    %235 = arith.mulf %234, %230 : vector<64x64xf32>
    %cst_66 = arith.constant dense<0.000000e+00> : vector<64xf32>
    %236 = vector.multi_reduction <add>, %235, %cst_66 [1] : vector<64x64xf32> to vector<64xf32>
    %237 = vector.shape_cast %236 : vector<64xf32> to vector<64x1xf32>
    %238 = vector.broadcast %237 : vector<64x1xf32> to vector<64x64xf32>
    %239 = arith.cmpf ogt, %238, %234 : vector<64x64xf32>
    %240 = vector.broadcast %237 : vector<64x1xf32> to vector<64x64xf32>
    %241 = arith.cmpf oeq, %240, %234 : vector<64x64xf32>
    %242 = arith.cmpi slt, %226, %227 : vector<64x64xi32>
    %243 = arith.andi %241, %242 : vector<64x64xi1>
    %244 = arith.ori %239, %243 : vector<64x64xi1>
    %cst_67 = arith.constant 1.000000e+00 : f32
    %245 = vector.broadcast %cst_67 : f32 to vector<1x64xf32>
    %246 = arith.extui %244 : vector<64x64xi1> to vector<64x64xi32>
    %247 = arith.sitofp %246 : vector<64x64xi32> to vector<64x64xf32>
    %cst_68 = arith.constant dense<0.000000e+00> : vector<1x64xf32>
    %248 = tpu.matmul %245, %247, %cst_68 {dimension_numbers = #tpu.dot_dimension_numbers<[1], [0], [0], [1], [0, 0, 1, 1], [], []>} : vector<1x64xf32>, vector<64x64xf32>, vector<1x64xf32> -> vector<1x64xf32>
    %249 = tpu.iota {dimensions = array<i32: 0>} : vector<8x1xi32>
    %250 = arith.sitofp %249 : vector<8x1xi32> to vector<8x1xf32>
    %251 = vector.broadcast %248 : vector<1x64xf32> to vector<8x64xf32>
    %252 = vector.broadcast %250 : vector<8x1xf32> to vector<8x64xf32>
    %253 = arith.cmpf oeq, %251, %252 : vector<8x64xf32>
    %254 = arith.extui %253 : vector<8x64xi1> to vector<8x64xi32>
    %255 = arith.sitofp %254 : vector<8x64xi32> to vector<8x64xf32>
    %256 = arith.addf %3, %225 : vector<64x2xf32>
    %cst_69 = arith.constant dense<0.000000e+00> : vector<8x2xf32>
    %257 = tpu.matmul %255, %256, %cst_69 {dimension_numbers = #tpu.dot_dimension_numbers<[1], [0], [0], [1], [0, 0, 1, 1], [], []>} : vector<8x64xf32>, vector<64x2xf32>, vector<8x2xf32> -> vector<8x2xf32>
    %258 = vector.extract_strided_slice %6 {offsets = [0, 512], sizes = [2, 256], strides = [1, 1]} : vector<2x768xf32> to vector<2x256xf32>
    %259 = vector.extract_strided_slice %257 {offsets = [0, 0], sizes = [8, 1], strides = [1, 1]} : vector<8x2xf32> to vector<8x1xf32>
    %260 = vector.extract_strided_slice %258 {offsets = [0, 0], sizes = [1, 256], strides = [1, 1]} : vector<2x256xf32> to vector<1x256xf32>
    %261 = vector.broadcast %259 : vector<8x1xf32> to vector<8x256xf32>
    %262 = vector.broadcast %260 : vector<1x256xf32> to vector<8x256xf32>
    %263 = arith.mulf %261, %262 : vector<8x256xf32>
    %264 = vector.extract_strided_slice %257 {offsets = [0, 1], sizes = [8, 1], strides = [1, 1]} : vector<8x2xf32> to vector<8x1xf32>
    %265 = vector.extract_strided_slice %258 {offsets = [1, 0], sizes = [1, 256], strides = [1, 1]} : vector<2x256xf32> to vector<1x256xf32>
    %266 = vector.broadcast %264 : vector<8x1xf32> to vector<8x256xf32>
    %267 = vector.broadcast %265 : vector<1x256xf32> to vector<8x256xf32>
    %268 = arith.mulf %266, %267 : vector<8x256xf32>
    %269 = arith.addf %263, %268 : vector<8x256xf32>
    %270 = vector.extract_strided_slice %269 {offsets = [0, 0], sizes = [8, 32], strides = [1, 1]} : vector<8x256xf32> to vector<8x32xf32>
    %271 = vector.extract_strided_slice %269 {offsets = [0, 128], sizes = [8, 32], strides = [1, 1]} : vector<8x256xf32> to vector<8x32xf32>
    %c2 = arith.constant 2 : index
    %c0_70 = arith.constant 0 : index
    %c0_71 = arith.constant 0 : index
    %272 = vector.load %arg8[%c2, %c0_70, %c0_71] : memref<4x9x32xf32, #tpu.memory_space<vmem>>, vector<1x9x32xf32>
    %273 = vector.shape_cast %272 : vector<1x9x32xf32> to vector<9x32xf32>
    %274 = vector.extract_strided_slice %5 {offsets = [0, 512], sizes = [1, 32], strides = [1, 1]} : vector<1x1024xf32> to vector<1x32xf32>
    %275 = vector.extract_strided_slice %5 {offsets = [0, 640], sizes = [1, 32], strides = [1, 1]} : vector<1x1024xf32> to vector<1x32xf32>
    %276 = vector.broadcast %274 : vector<1x32xf32> to vector<8x32xf32>
    %277 = arith.addf %270, %276 : vector<8x32xf32>
    %278 = vector.extract_strided_slice %273 {offsets = [0, 0], sizes = [1, 32], strides = [1, 1]} : vector<9x32xf32> to vector<1x32xf32>
    %279 = vector.broadcast %278 : vector<1x32xf32> to vector<8x32xf32>
    %280 = arith.addf %277, %279 : vector<8x32xf32>
    %281 = vector.extract_strided_slice %273 {offsets = [1, 0], sizes = [1, 32], strides = [1, 1]} : vector<9x32xf32> to vector<1x32xf32>
    %282 = vector.extract_strided_slice %273 {offsets = [2, 0], sizes = [1, 32], strides = [1, 1]} : vector<9x32xf32> to vector<1x32xf32>
    %cst_72 = arith.constant dense<0.000000e+00> : vector<8xf32>
    %283 = vector.multi_reduction <add>, %280, %cst_72 [1] : vector<8x32xf32> to vector<8xf32>
    %284 = vector.shape_cast %283 : vector<8xf32> to vector<8x1xf32>
    %cst_73 = arith.constant 3.200000e+01 : f32
    %285 = vector.broadcast %cst_73 : f32 to vector<8x1xf32>
    %286 = arith.divf %284, %285 : vector<8x1xf32>
    %287 = vector.broadcast %286 : vector<8x1xf32> to vector<8x32xf32>
    %288 = arith.subf %280, %287 : vector<8x32xf32>
    %289 = arith.mulf %288, %288 : vector<8x32xf32>
    %cst_74 = arith.constant dense<0.000000e+00> : vector<8xf32>
    %290 = vector.multi_reduction <add>, %289, %cst_74 [1] : vector<8x32xf32> to vector<8xf32>
    %291 = vector.shape_cast %290 : vector<8xf32> to vector<8x1xf32>
    %cst_75 = arith.constant 3.200000e+01 : f32
    %292 = vector.broadcast %cst_75 : f32 to vector<8x1xf32>
    %293 = arith.divf %291, %292 : vector<8x1xf32>
    %294 = vector.broadcast %286 : vector<8x1xf32> to vector<8x32xf32>
    %295 = arith.subf %280, %294 : vector<8x32xf32>
    %cst_76 = arith.constant 9.99999974E-6 : f32
    %296 = vector.broadcast %cst_76 : f32 to vector<8x1xf32>
    %297 = arith.addf %293, %296 : vector<8x1xf32>
    %298 = math.rsqrt %297 : vector<8x1xf32>
    %299 = vector.broadcast %298 : vector<8x1xf32> to vector<8x32xf32>
    %300 = arith.mulf %295, %299 : vector<8x32xf32>
    %301 = vector.broadcast %281 : vector<1x32xf32> to vector<8x32xf32>
    %302 = arith.mulf %300, %301 : vector<8x32xf32>
    %303 = vector.broadcast %282 : vector<1x32xf32> to vector<8x32xf32>
    %304 = arith.addf %302, %303 : vector<8x32xf32>
    %cst_77 = arith.constant 0.000000e+00 : f32
    %305 = vector.broadcast %cst_77 : f32 to vector<8x32xf32>
    %306 = arith.maximumf %304, %305 : vector<8x32xf32>
    %c2_78 = arith.constant 2 : index
    %c0_79 = arith.constant 0 : index
    %c0_80 = arith.constant 0 : index
    %307 = vector.load %arg6[%c2_78, %c0_79, %c0_80] : memref<4x32x32xf32, #tpu.memory_space<vmem>>, vector<1x32x32xf32>
    %308 = vector.shape_cast %307 : vector<1x32x32xf32> to vector<32x32xf32>
    %cst_81 = arith.constant dense<0.000000e+00> : vector<8x32xf32>
    %309 = tpu.matmul %306, %308, %cst_81 {dimension_numbers = #tpu.dot_dimension_numbers<[1], [0], [0], [1], [0, 0, 1, 1], [], []>} : vector<8x32xf32>, vector<32x32xf32>, vector<8x32xf32> -> vector<8x32xf32>
    %310 = vector.extract_strided_slice %273 {offsets = [3, 0], sizes = [1, 32], strides = [1, 1]} : vector<9x32xf32> to vector<1x32xf32>
    %311 = vector.broadcast %310 : vector<1x32xf32> to vector<8x32xf32>
    %312 = arith.addf %309, %311 : vector<8x32xf32>
    %313 = vector.extract_strided_slice %273 {offsets = [4, 0], sizes = [1, 32], strides = [1, 1]} : vector<9x32xf32> to vector<1x32xf32>
    %314 = vector.extract_strided_slice %273 {offsets = [5, 0], sizes = [1, 32], strides = [1, 1]} : vector<9x32xf32> to vector<1x32xf32>
    %cst_82 = arith.constant dense<0.000000e+00> : vector<8xf32>
    %315 = vector.multi_reduction <add>, %312, %cst_82 [1] : vector<8x32xf32> to vector<8xf32>
    %316 = vector.shape_cast %315 : vector<8xf32> to vector<8x1xf32>
    %cst_83 = arith.constant 3.200000e+01 : f32
    %317 = vector.broadcast %cst_83 : f32 to vector<8x1xf32>
    %318 = arith.divf %316, %317 : vector<8x1xf32>
    %319 = vector.broadcast %318 : vector<8x1xf32> to vector<8x32xf32>
    %320 = arith.subf %312, %319 : vector<8x32xf32>
    %321 = arith.mulf %320, %320 : vector<8x32xf32>
    %cst_84 = arith.constant dense<0.000000e+00> : vector<8xf32>
    %322 = vector.multi_reduction <add>, %321, %cst_84 [1] : vector<8x32xf32> to vector<8xf32>
    %323 = vector.shape_cast %322 : vector<8xf32> to vector<8x1xf32>
    %cst_85 = arith.constant 3.200000e+01 : f32
    %324 = vector.broadcast %cst_85 : f32 to vector<8x1xf32>
    %325 = arith.divf %323, %324 : vector<8x1xf32>
    %326 = vector.broadcast %318 : vector<8x1xf32> to vector<8x32xf32>
    %327 = arith.subf %312, %326 : vector<8x32xf32>
    %cst_86 = arith.constant 9.99999974E-6 : f32
    %328 = vector.broadcast %cst_86 : f32 to vector<8x1xf32>
    %329 = arith.addf %325, %328 : vector<8x1xf32>
    %330 = math.rsqrt %329 : vector<8x1xf32>
    %331 = vector.broadcast %330 : vector<8x1xf32> to vector<8x32xf32>
    %332 = arith.mulf %327, %331 : vector<8x32xf32>
    %333 = vector.broadcast %313 : vector<1x32xf32> to vector<8x32xf32>
    %334 = arith.mulf %332, %333 : vector<8x32xf32>
    %335 = vector.broadcast %314 : vector<1x32xf32> to vector<8x32xf32>
    %336 = arith.addf %334, %335 : vector<8x32xf32>
    %337 = vector.broadcast %275 : vector<1x32xf32> to vector<8x32xf32>
    %338 = arith.addf %271, %337 : vector<8x32xf32>
    %339 = vector.extract_strided_slice %273 {offsets = [6, 0], sizes = [1, 32], strides = [1, 1]} : vector<9x32xf32> to vector<1x32xf32>
    %340 = vector.broadcast %339 : vector<1x32xf32> to vector<8x32xf32>
    %341 = arith.addf %338, %340 : vector<8x32xf32>
    %342 = vector.extract_strided_slice %273 {offsets = [7, 0], sizes = [1, 32], strides = [1, 1]} : vector<9x32xf32> to vector<1x32xf32>
    %343 = vector.extract_strided_slice %273 {offsets = [8, 0], sizes = [1, 32], strides = [1, 1]} : vector<9x32xf32> to vector<1x32xf32>
    %cst_87 = arith.constant dense<0.000000e+00> : vector<8xf32>
    %344 = vector.multi_reduction <add>, %341, %cst_87 [1] : vector<8x32xf32> to vector<8xf32>
    %345 = vector.shape_cast %344 : vector<8xf32> to vector<8x1xf32>
    %cst_88 = arith.constant 3.200000e+01 : f32
    %346 = vector.broadcast %cst_88 : f32 to vector<8x1xf32>
    %347 = arith.divf %345, %346 : vector<8x1xf32>
    %348 = vector.broadcast %347 : vector<8x1xf32> to vector<8x32xf32>
    %349 = arith.subf %341, %348 : vector<8x32xf32>
    %350 = arith.mulf %349, %349 : vector<8x32xf32>
    %cst_89 = arith.constant dense<0.000000e+00> : vector<8xf32>
    %351 = vector.multi_reduction <add>, %350, %cst_89 [1] : vector<8x32xf32> to vector<8xf32>
    %352 = vector.shape_cast %351 : vector<8xf32> to vector<8x1xf32>
    %cst_90 = arith.constant 3.200000e+01 : f32
    %353 = vector.broadcast %cst_90 : f32 to vector<8x1xf32>
    %354 = arith.divf %352, %353 : vector<8x1xf32>
    %355 = vector.broadcast %347 : vector<8x1xf32> to vector<8x32xf32>
    %356 = arith.subf %341, %355 : vector<8x32xf32>
    %cst_91 = arith.constant 9.99999974E-6 : f32
    %357 = vector.broadcast %cst_91 : f32 to vector<8x1xf32>
    %358 = arith.addf %354, %357 : vector<8x1xf32>
    %359 = math.rsqrt %358 : vector<8x1xf32>
    %360 = vector.broadcast %359 : vector<8x1xf32> to vector<8x32xf32>
    %361 = arith.mulf %356, %360 : vector<8x32xf32>
    %362 = vector.broadcast %342 : vector<1x32xf32> to vector<8x32xf32>
    %363 = arith.mulf %361, %362 : vector<8x32xf32>
    %364 = vector.broadcast %343 : vector<1x32xf32> to vector<8x32xf32>
    %365 = arith.addf %363, %364 : vector<8x32xf32>
    %366 = arith.addf %336, %365 : vector<8x32xf32>
    %cst_92 = arith.constant 0.000000e+00 : f32
    %367 = vector.broadcast %cst_92 : f32 to vector<8x32xf32>
    %368 = arith.maximumf %366, %367 : vector<8x32xf32>
    %c0_93 = arith.constant 0 : index
    %c256 = arith.constant 256 : index
    %369 = vector.load %arg7[%c0_93, %c256] : memref<33x512xf32, #tpu.memory_space<vmem>>, vector<32x12xf32>
    %c32_94 = arith.constant 32 : index
    %c256_95 = arith.constant 256 : index
    %370 = vector.load %arg7[%c32_94, %c256_95] : memref<33x512xf32, #tpu.memory_space<vmem>>, vector<1x12xf32>
    %cst_96 = arith.constant dense<0.000000e+00> : vector<8x12xf32>
    %371 = tpu.matmul %368, %369, %cst_96 {dimension_numbers = #tpu.dot_dimension_numbers<[1], [0], [0], [1], [0, 0, 1, 1], [], []>} : vector<8x32xf32>, vector<32x12xf32>, vector<8x12xf32> -> vector<8x12xf32>
    %372 = vector.broadcast %370 : vector<1x12xf32> to vector<8x12xf32>
    %373 = arith.addf %371, %372 : vector<8x12xf32>
    %c0_97 = arith.constant 0 : index
    %c0_98 = arith.constant 0 : index
    %374 = vector.load %arg5[%c0_97, %c0_98] : memref<12x256xf32, #tpu.memory_space<vmem>>, vector<12x256xf32>
    %cst_99 = arith.constant dense<0.000000e+00> : vector<8x256xf32>
    %375 = tpu.matmul %373, %374, %cst_99 {dimension_numbers = #tpu.dot_dimension_numbers<[1], [0], [0], [1], [0, 0, 1, 1], [], []>} : vector<8x12xf32>, vector<12x256xf32>, vector<8x256xf32> -> vector<8x256xf32>
    %376 = vector.extract_strided_slice %375 {offsets = [0, 0], sizes = [8, 32], strides = [1, 1]} : vector<8x256xf32> to vector<8x32xf32>
    %377 = vector.extract_strided_slice %375 {offsets = [0, 128], sizes = [8, 32], strides = [1, 1]} : vector<8x256xf32> to vector<8x32xf32>
    %c3 = arith.constant 3 : index
    %c0_100 = arith.constant 0 : index
    %c0_101 = arith.constant 0 : index
    %378 = vector.load %arg8[%c3, %c0_100, %c0_101] : memref<4x9x32xf32, #tpu.memory_space<vmem>>, vector<1x9x32xf32>
    %379 = vector.shape_cast %378 : vector<1x9x32xf32> to vector<9x32xf32>
    %380 = vector.extract_strided_slice %5 {offsets = [0, 768], sizes = [1, 32], strides = [1, 1]} : vector<1x1024xf32> to vector<1x32xf32>
    %381 = vector.extract_strided_slice %5 {offsets = [0, 896], sizes = [1, 32], strides = [1, 1]} : vector<1x1024xf32> to vector<1x32xf32>
    %382 = vector.broadcast %380 : vector<1x32xf32> to vector<8x32xf32>
    %383 = arith.addf %376, %382 : vector<8x32xf32>
    %384 = vector.extract_strided_slice %379 {offsets = [0, 0], sizes = [1, 32], strides = [1, 1]} : vector<9x32xf32> to vector<1x32xf32>
    %385 = vector.broadcast %384 : vector<1x32xf32> to vector<8x32xf32>
    %386 = arith.addf %383, %385 : vector<8x32xf32>
    %387 = vector.extract_strided_slice %379 {offsets = [1, 0], sizes = [1, 32], strides = [1, 1]} : vector<9x32xf32> to vector<1x32xf32>
    %388 = vector.extract_strided_slice %379 {offsets = [2, 0], sizes = [1, 32], strides = [1, 1]} : vector<9x32xf32> to vector<1x32xf32>
    %cst_102 = arith.constant dense<0.000000e+00> : vector<8xf32>
    %389 = vector.multi_reduction <add>, %386, %cst_102 [1] : vector<8x32xf32> to vector<8xf32>
    %390 = vector.shape_cast %389 : vector<8xf32> to vector<8x1xf32>
    %cst_103 = arith.constant 3.200000e+01 : f32
    %391 = vector.broadcast %cst_103 : f32 to vector<8x1xf32>
    %392 = arith.divf %390, %391 : vector<8x1xf32>
    %393 = vector.broadcast %392 : vector<8x1xf32> to vector<8x32xf32>
    %394 = arith.subf %386, %393 : vector<8x32xf32>
    %395 = arith.mulf %394, %394 : vector<8x32xf32>
    %cst_104 = arith.constant dense<0.000000e+00> : vector<8xf32>
    %396 = vector.multi_reduction <add>, %395, %cst_104 [1] : vector<8x32xf32> to vector<8xf32>
    %397 = vector.shape_cast %396 : vector<8xf32> to vector<8x1xf32>
    %cst_105 = arith.constant 3.200000e+01 : f32
    %398 = vector.broadcast %cst_105 : f32 to vector<8x1xf32>
    %399 = arith.divf %397, %398 : vector<8x1xf32>
    %400 = vector.broadcast %392 : vector<8x1xf32> to vector<8x32xf32>
    %401 = arith.subf %386, %400 : vector<8x32xf32>
    %cst_106 = arith.constant 9.99999974E-6 : f32
    %402 = vector.broadcast %cst_106 : f32 to vector<8x1xf32>
    %403 = arith.addf %399, %402 : vector<8x1xf32>
    %404 = math.rsqrt %403 : vector<8x1xf32>
    %405 = vector.broadcast %404 : vector<8x1xf32> to vector<8x32xf32>
    %406 = arith.mulf %401, %405 : vector<8x32xf32>
    %407 = vector.broadcast %387 : vector<1x32xf32> to vector<8x32xf32>
    %408 = arith.mulf %406, %407 : vector<8x32xf32>
    %409 = vector.broadcast %388 : vector<1x32xf32> to vector<8x32xf32>
    %410 = arith.addf %408, %409 : vector<8x32xf32>
    %cst_107 = arith.constant 0.000000e+00 : f32
    %411 = vector.broadcast %cst_107 : f32 to vector<8x32xf32>
    %412 = arith.maximumf %410, %411 : vector<8x32xf32>
    %c3_108 = arith.constant 3 : index
    %c0_109 = arith.constant 0 : index
    %c0_110 = arith.constant 0 : index
    %413 = vector.load %arg6[%c3_108, %c0_109, %c0_110] : memref<4x32x32xf32, #tpu.memory_space<vmem>>, vector<1x32x32xf32>
    %414 = vector.shape_cast %413 : vector<1x32x32xf32> to vector<32x32xf32>
    %cst_111 = arith.constant dense<0.000000e+00> : vector<8x32xf32>
    %415 = tpu.matmul %412, %414, %cst_111 {dimension_numbers = #tpu.dot_dimension_numbers<[1], [0], [0], [1], [0, 0, 1, 1], [], []>} : vector<8x32xf32>, vector<32x32xf32>, vector<8x32xf32> -> vector<8x32xf32>
    %416 = vector.extract_strided_slice %379 {offsets = [3, 0], sizes = [1, 32], strides = [1, 1]} : vector<9x32xf32> to vector<1x32xf32>
    %417 = vector.broadcast %416 : vector<1x32xf32> to vector<8x32xf32>
    %418 = arith.addf %415, %417 : vector<8x32xf32>
    %419 = vector.extract_strided_slice %379 {offsets = [4, 0], sizes = [1, 32], strides = [1, 1]} : vector<9x32xf32> to vector<1x32xf32>
    %420 = vector.extract_strided_slice %379 {offsets = [5, 0], sizes = [1, 32], strides = [1, 1]} : vector<9x32xf32> to vector<1x32xf32>
    %cst_112 = arith.constant dense<0.000000e+00> : vector<8xf32>
    %421 = vector.multi_reduction <add>, %418, %cst_112 [1] : vector<8x32xf32> to vector<8xf32>
    %422 = vector.shape_cast %421 : vector<8xf32> to vector<8x1xf32>
    %cst_113 = arith.constant 3.200000e+01 : f32
    %423 = vector.broadcast %cst_113 : f32 to vector<8x1xf32>
    %424 = arith.divf %422, %423 : vector<8x1xf32>
    %425 = vector.broadcast %424 : vector<8x1xf32> to vector<8x32xf32>
    %426 = arith.subf %418, %425 : vector<8x32xf32>
    %427 = arith.mulf %426, %426 : vector<8x32xf32>
    %cst_114 = arith.constant dense<0.000000e+00> : vector<8xf32>
    %428 = vector.multi_reduction <add>, %427, %cst_114 [1] : vector<8x32xf32> to vector<8xf32>
    %429 = vector.shape_cast %428 : vector<8xf32> to vector<8x1xf32>
    %cst_115 = arith.constant 3.200000e+01 : f32
    %430 = vector.broadcast %cst_115 : f32 to vector<8x1xf32>
    %431 = arith.divf %429, %430 : vector<8x1xf32>
    %432 = vector.broadcast %424 : vector<8x1xf32> to vector<8x32xf32>
    %433 = arith.subf %418, %432 : vector<8x32xf32>
    %cst_116 = arith.constant 9.99999974E-6 : f32
    %434 = vector.broadcast %cst_116 : f32 to vector<8x1xf32>
    %435 = arith.addf %431, %434 : vector<8x1xf32>
    %436 = math.rsqrt %435 : vector<8x1xf32>
    %437 = vector.broadcast %436 : vector<8x1xf32> to vector<8x32xf32>
    %438 = arith.mulf %433, %437 : vector<8x32xf32>
    %439 = vector.broadcast %419 : vector<1x32xf32> to vector<8x32xf32>
    %440 = arith.mulf %438, %439 : vector<8x32xf32>
    %441 = vector.broadcast %420 : vector<1x32xf32> to vector<8x32xf32>
    %442 = arith.addf %440, %441 : vector<8x32xf32>
    %443 = vector.broadcast %381 : vector<1x32xf32> to vector<8x32xf32>
    %444 = arith.addf %377, %443 : vector<8x32xf32>
    %445 = vector.extract_strided_slice %379 {offsets = [6, 0], sizes = [1, 32], strides = [1, 1]} : vector<9x32xf32> to vector<1x32xf32>
    %446 = vector.broadcast %445 : vector<1x32xf32> to vector<8x32xf32>
    %447 = arith.addf %444, %446 : vector<8x32xf32>
    %448 = vector.extract_strided_slice %379 {offsets = [7, 0], sizes = [1, 32], strides = [1, 1]} : vector<9x32xf32> to vector<1x32xf32>
    %449 = vector.extract_strided_slice %379 {offsets = [8, 0], sizes = [1, 32], strides = [1, 1]} : vector<9x32xf32> to vector<1x32xf32>
    %cst_117 = arith.constant dense<0.000000e+00> : vector<8xf32>
    %450 = vector.multi_reduction <add>, %447, %cst_117 [1] : vector<8x32xf32> to vector<8xf32>
    %451 = vector.shape_cast %450 : vector<8xf32> to vector<8x1xf32>
    %cst_118 = arith.constant 3.200000e+01 : f32
    %452 = vector.broadcast %cst_118 : f32 to vector<8x1xf32>
    %453 = arith.divf %451, %452 : vector<8x1xf32>
    %454 = vector.broadcast %453 : vector<8x1xf32> to vector<8x32xf32>
    %455 = arith.subf %447, %454 : vector<8x32xf32>
    %456 = arith.mulf %455, %455 : vector<8x32xf32>
    %cst_119 = arith.constant dense<0.000000e+00> : vector<8xf32>
    %457 = vector.multi_reduction <add>, %456, %cst_119 [1] : vector<8x32xf32> to vector<8xf32>
    %458 = vector.shape_cast %457 : vector<8xf32> to vector<8x1xf32>
    %cst_120 = arith.constant 3.200000e+01 : f32
    %459 = vector.broadcast %cst_120 : f32 to vector<8x1xf32>
    %460 = arith.divf %458, %459 : vector<8x1xf32>
    %461 = vector.broadcast %453 : vector<8x1xf32> to vector<8x32xf32>
    %462 = arith.subf %447, %461 : vector<8x32xf32>
    %cst_121 = arith.constant 9.99999974E-6 : f32
    %463 = vector.broadcast %cst_121 : f32 to vector<8x1xf32>
    %464 = arith.addf %460, %463 : vector<8x1xf32>
    %465 = math.rsqrt %464 : vector<8x1xf32>
    %466 = vector.broadcast %465 : vector<8x1xf32> to vector<8x32xf32>
    %467 = arith.mulf %462, %466 : vector<8x32xf32>
    %468 = vector.broadcast %448 : vector<1x32xf32> to vector<8x32xf32>
    %469 = arith.mulf %467, %468 : vector<8x32xf32>
    %470 = vector.broadcast %449 : vector<1x32xf32> to vector<8x32xf32>
    %471 = arith.addf %469, %470 : vector<8x32xf32>
    %472 = arith.addf %442, %471 : vector<8x32xf32>
    %cst_122 = arith.constant 0.000000e+00 : f32
    %473 = vector.broadcast %cst_122 : f32 to vector<8x32xf32>
    %474 = arith.maximumf %472, %473 : vector<8x32xf32>
    %c0_123 = arith.constant 0 : index
    %c384 = arith.constant 384 : index
    %475 = vector.load %arg7[%c0_123, %c384] : memref<33x512xf32, #tpu.memory_space<vmem>>, vector<32x1xf32>
    %c32_124 = arith.constant 32 : index
    %c384_125 = arith.constant 384 : index
    %476 = vector.load %arg7[%c32_124, %c384_125] : memref<33x512xf32, #tpu.memory_space<vmem>>, vector<1x1xf32>
    %cst_126 = arith.constant dense<0.000000e+00> : vector<8x1xf32>
    %477 = tpu.matmul %474, %475, %cst_126 {dimension_numbers = #tpu.dot_dimension_numbers<[1], [0], [0], [1], [0, 0, 1, 1], [], []>} : vector<8x32xf32>, vector<32x1xf32>, vector<8x1xf32> -> vector<8x1xf32>
    %478 = vector.broadcast %476 : vector<1x1xf32> to vector<8x1xf32>
    %479 = arith.addf %477, %478 : vector<8x1xf32>
    %cst_127 = arith.constant dense<0xFF800000> : vector<1xf32>
    %480 = vector.multi_reduction <maximumf>, %479, %cst_127 [0] : vector<8x1xf32> to vector<1xf32>
    %481 = vector.shape_cast %480 : vector<1xf32> to vector<1x1xf32>
    %482 = vector.broadcast %481 : vector<1x1xf32> to vector<8x1xf32>
    %483 = arith.subf %479, %482 : vector<8x1xf32>
    %484 = math.exp %483 : vector<8x1xf32>
    %cst_128 = arith.constant dense<0.000000e+00> : vector<1xf32>
    %485 = vector.multi_reduction <add>, %484, %cst_128 [0] : vector<8x1xf32> to vector<1xf32>
    %486 = vector.shape_cast %485 : vector<1xf32> to vector<1x1xf32>
    %487 = vector.broadcast %486 : vector<1x1xf32> to vector<8x1xf32>
    %488 = arith.divf %484, %487 : vector<8x1xf32>
    %cst_129 = arith.constant 0.000000e+00 : f32
    %489 = vector.broadcast %cst_129 : f32 to vector<8x115xf32>
    %490 = tpu.concatenate %373, %488, %489 in 1 : vector<8x12xf32>, vector<8x1xf32>, vector<8x115xf32> -> vector<8x128xf32>
    %c0_130 = arith.constant 0 : index
    %c0_131 = arith.constant 0 : index
    %c0_132 = arith.constant 0 : index
    %491 = vector.load %arg9[%c0_130, %c0_131, %c0_132] : memref<1x8x128xf32, #tpu.memory_space<vmem>>, vector<1x8x128xf32>
    %492 = vector.shape_cast %491 : vector<1x8x128xf32> to vector<8x128xf32>
    %493 = vector.shape_cast %490 : vector<8x128xf32> to vector<1x8x128xf32>
    tpu.vector_store %arg9[%c0_130, %c0_131, %c0_132], %493 {strides = array<i32>} : memref<1x8x128xf32, #tpu.memory_space<vmem>>, vector<1x8x128xf32>,
    return
  }
  func.func @transform_0(%arg0: i32) -> (i32, i32, i32) {
    %c0_i32 = arith.constant 0 : i32
    %c0_i32_0 = arith.constant 0 : i32
    %c0_i32_1 = arith.constant 0 : i32
    return %arg0, %c0_i32, %c0_i32_0 : i32, i32, i32
  }
  func.func @transform_1(%arg0: i32) -> (i32, i32, i32) {
    %c0_i32 = arith.constant 0 : i32
    %c0_i32_0 = arith.constant 0 : i32
    %c0_i32_1 = arith.constant 0 : i32
    return %arg0, %c0_i32, %c0_i32_0 : i32, i32, i32
  }
  func.func @transform_2(%arg0: i32) -> (i32, i32) {
    %c0_i32 = arith.constant 0 : i32
    %c0_i32_0 = arith.constant 0 : i32
    %c0_i32_1 = arith.constant 0 : i32
    return %c0_i32, %c0_i32_0 : i32, i32
  }
  func.func @transform_3(%arg0: i32) -> (i32, i32) {
    %c0_i32 = arith.constant 0 : i32
    %c0_i32_0 = arith.constant 0 : i32
    %c0_i32_1 = arith.constant 0 : i32
    return %c0_i32, %c0_i32_0 : i32, i32
  }
  func.func @transform_4(%arg0: i32) -> (i32, i32) {
    %c0_i32 = arith.constant 0 : i32
    %c0_i32_0 = arith.constant 0 : i32
    %c0_i32_1 = arith.constant 0 : i32
    return %c0_i32, %c0_i32_0 : i32, i32
  }
  func.func @transform_5(%arg0: i32) -> (i32, i32, i32) {
    %c0_i32 = arith.constant 0 : i32
    %c0_i32_0 = arith.constant 0 : i32
    %c0_i32_1 = arith.constant 0 : i32
    %c0_i32_2 = arith.constant 0 : i32
    return %c0_i32, %c0_i32_0, %c0_i32_1 : i32, i32, i32
  }
  func.func @transform_6(%arg0: i32) -> (i32, i32) {
    %c0_i32 = arith.constant 0 : i32
    %c0_i32_0 = arith.constant 0 : i32
    %c0_i32_1 = arith.constant 0 : i32
    return %c0_i32, %c0_i32_0 : i32, i32
  }
  func.func @transform_7(%arg0: i32) -> (i32, i32, i32) {
    %c0_i32 = arith.constant 0 : i32
    %c0_i32_0 = arith.constant 0 : i32
    %c0_i32_1 = arith.constant 0 : i32
    %c0_i32_2 = arith.constant 0 : i32
    return %c0_i32, %c0_i32_0, %c0_i32_1 : i32, i32, i32
  }
  func.func @transform_8(%arg0: i32) -> (i32, i32, i32) {
    %c0_i32 = arith.constant 0 : i32
    %c0_i32_0 = arith.constant 0 : i32
    %c0_i32_1 = arith.constant 0 : i32
    return %arg0, %c0_i32, %c0_i32_0 : i32, i32, i32
  }
}

</mosaic_0001>

<bundles_post_ra>
// kernel: tnt_forward.1
= control target key start
LH: loop header
LB: loop body
LE: loop exit
PB: predicated region body
PF: predicated region fallthrough
CT: control target
= control target key end

     0   :  { %13 = vsyncpa [#allocation3], 0  ;;  %s5480_s0 = inlined_call_operand.vmem [shape: f32[4,1,32], index: 0, kind: input, shape index: {}]   ;;  %s5481_s1 = inlined_call_operand.vmem [shape: f32[4,64,2], index: 1, kind: input, shape index: {}]   ;;  %s5482_s2 = inlined_call_operand.vmem [shape: f32[32,1024], index: 2, kind: input, shape index: {}]   ;;  %s5483_s3 = inlined_call_operand.vmem [shape: f32[2,768], index: 3, kind: input, shape index: {}]   ;;  %s5484_s4 = inlined_call_operand.vmem [shape: f32[12,256], index: 4, kind: input, shape index: {}]   ;;  %s5485_s5 = inlined_call_operand.hbm [shape: f32[4,32,32], index: 5, kind: input, shape index: {}]   ;;  %s5486_s6 = inlined_call_operand.hbm [shape: f32[33,512], index: 6, kind: input, shape index: {}]   ;;  %s5487_s7 = inlined_call_operand.vmem [shape: f32[4,9,32], index: 7, kind: input, shape index: {}]   ;;  %s5488_s8 = inlined_call_operand.vmem [shape: f32[4,8,128], index: 8, kind: output, shape index: {}]  }
   0x1   :  { %14 = vsyncpa [#allocation5], 0  ;;  %s3532_s27 = smov 0  }
   0x2 LB: > { %s249_s30 = sshll.u32 %s5485_s5, 4  ;;  %s3541_s9 = sadd.s32 4294967295, %s3473_s27   ;;  %s3473_s27 = sphi %s3532_s27, %s20_s27   ;;  %s250_s30 = int_to_ptr.hbm [resolvable:$true] %s249_s30 }
   0x3   : > { %p3109_p0 = scmp.ge.s32.totalorder %s3473_s27, 1  ;;  %p229_p1 = scmp.lt.s32.totalorder %s3473_s27, 5 }
   0x4   : > { %p3230_p2 = scmp.eq.s32.totalorder %s3541_s9, 0  ;;  %s3475_s11 = smov [#allocation2]  }
   0x5   : > { %p3546_p3 = pnand %p3109_p0, %p229_p1  ;;  %s251_s12 = sshll.u32 %s3475_s11, 4  ;;  %s252_s12 = int_to_ptr.vmem [resolvable:$true] %s251_s12 }
   0x6   : > { %s263_s15 = sshll.u32 %s5486_s6, 4  ;;  %s3476_s16 = smov [#allocation4]   ;;  %s264_s15 = int_to_ptr.hbm [resolvable:$true] %s263_s15 }
   0x7   : > { %p3223_p4 = pneg %p3546_p3  ;;  %s265_s17 = sshll.u32 %s3476_s16, 4  ;;  %s266_s17 = int_to_ptr.vmem [resolvable:$true] %s265_s17 }
   0x8   : > { %s3477_s18 = smov 128   ;;  %s3478_s19 = smov 8  }
   0x9   : > { %p3224_p5 = pnand %p3230_p2, %p3223_p4  ;;  %s3479_s20 = smov 512  }
   0xa   : > { %s3480_s21 = smov 32   ;;  %298 = sbr.rel (%p3546_p3) target bundleno = 3947 (0xf6b), region = 52 }
   0xb   : > { %3226 = dma.hbm_to_vmem [thread:$0]  (!%p3224_p5), %s250_s30, 2048, %s252_s12, [#allocation3], %s3477_s18, %s3477_s18, %s3478_s19  }
   0xc   : > { %3229 = dma.hbm_to_vmem [thread:$0]  (!%p3224_p5), %s264_s15, 2560, %s266_s17, [#allocation5], %s3479_s20, %s3479_s20, %s3480_s21  }
   0xf   : > { %3464 = dma.done.wait (%p3230_p2), [#allocation3], 2048  }
  0x10   : > { %3466 = vsyncadd (%p3230_p2), [#allocation3], 4294965248 }
  0x11   : > { %3468 = dma.done.wait (%p3230_p2), [#allocation5], 2560  }
  0x12   : > { %3470 = vsyncadd (%p3230_p2), [#allocation5], 4294964736  ;;  %p340_p6 = scmp.lt.s32.totalorder %s3541_s9, 3  ;;  %v5489_v0 = vmov 1   ;;  %v3482_v1 = vmov 0   ;;  %v385_v2 = vld [vmem:[%s5482_s2 + $0xc0] sm:$0xff] }
  0x13   : > { %3254 = vset.pattern.permute.xlu0 %v5489_v0  ;;  %3258 = vset.pattern.permute.xlu2 %v3482_v1  ;;  %v386_v3 = vld [vmem:[%s5482_s2 + $0xc8] sm:$0xff]  ;;  %v387_v4 = vld [vmem:[%s5482_s2 + $0xd0] sm:$0xff]  ;;  %v377_v8 = vld [vmem:[%s5482_s2 + $0x80] sm:$0xff]  ;;  %vm5505_vm0 = vcmask 261120   ;;  %s3486_s11 = smov 12  }
  0x14   : > { %3256 = vset.pattern.permute.xlu1 %v3482_v1  ;;  %s5577_s9 = smov (!%p340_p6, %s3541_s9), 3  ;;  %409 = vmatpush.msra.mxu0 %v385_v2  ;;  %v378_v9 = vld [vmem:[%s5482_s2 + $0x88] sm:$0xff]  ;;  %v379_v10 = vld [vmem:[%s5482_s2 + $0x90] sm:$0xff]  ;;  %v369_v11 = vld [vmem:[%s5482_s2 + $0x40] sm:$0xff] }
  0x15   : > { %s3210_s22 = sshll.u32 %s5577_s9, 6  ;;  %429 = vmatpush.msra.mxu1 %v386_v3  ;;  %449 = vmatpush.msra.mxu2 %v387_v4  ;;  %v370_v12 = vld [vmem:[%s5482_s2 + $0x48] sm:$0xff]  ;;  %s3611_s24 = scalar_lea.vmem %s5480_s0, %s5577_s9  ;;  %v371_v13 = vld [vmem:[%s5482_s2 + $0x50] sm:$0xff]  ;;  %v361_v14 = vld [vmem:[%s5482_s2] sm:$0xff] }
  0x16   : > { %s3578_s25 = scalar_lea.vmem %s5481_s1, %s3210_s22  ;;  %410 = vmatpush.msra.mxu0 %v377_v8  ;;  %v362_v15 = vld [vmem:[%s5482_s2 + $0x8] sm:$0xff]  ;;  %v363_v16 = vld [vmem:[%s5482_s2 + $0x10] sm:$0xff]  ;;  %v3626_v17 = vld [vmem:[%s3611_s24] sm:$0x1]  ;;  %s3118_s12 = sshll.u32 %s5577_s9, 3 }
  0x17   : > { %v355_v5 = vld [vmem:[%s3578_s25 + $0x10] sm:$0xff]  ;;  %v354_v6 = vld [vmem:[%s3578_s25 + $0x8] sm:$0xff]  ;;  %v353_v7 = vld [vmem:[%s3578_s25] sm:$0xff]  ;;  %430 = vmatpush.msra.mxu1 %v378_v9  ;;  %450 = vmatpush.msra.mxu2 %v379_v10 }
  0x18   : > { %571 = vperm.xlu2 %3258, %v355_v5   ;;  %566 = vperm.xlu1 %3256, %v354_v6   ;;  %v388_v18 = vld [vmem:[%s5482_s2 + $0xd8] sm:$0xff]  ;;  %v357_v23 = vld [vmem:[%s3578_s25 + $0x20] sm:$0xff]  ;;  %v358_v24 = vld [vmem:[%s3578_s25 + $0x28] sm:$0xff] }
  0x19   : > { %645 = vperm.xlu0 %3254, %v353_v7   ;;  %411 = vmatpush.msra.mxu0 %v369_v11  ;;  %v380_v19 = vld [vmem:[%s5482_s2 + $0x98] sm:$0xff]  ;;  %v359_v25 = vld [vmem:[%s3578_s25 + $0x30] sm:$0xff]  ;;  %v557_v29 = vld [vmem:[%s5483_s3] sm:$0xff] }
  0x1a   : > { %431 = vmatpush.msra.mxu1 %v370_v12  ;;  %451 = vmatpush.msra.mxu2 %v371_v13  ;;  %v372_v20 = vld [vmem:[%s5482_s2 + $0x58] sm:$0xff]  ;;  %v677_v30 = vperm.slane %v557_v29, 3  ;;  %v601_v32 = vperm.slane %v557_v29, 2  ;;  %v678_v40 = vperm.slane %v557_v29, 5  ;;  %v602_v41 = vperm.slane %v557_v29, 4  ;;  %v3733_v8 = vld [vmem:[%s5487_s7] sm:$0xff] }
  0x1b   : > { %412 = vmatpush.msra.mxu0 %v361_v14  ;;  %v364_v21 = vld [vmem:[%s5482_s2 + $0x18] sm:$0xff]  ;;  %v603_v42 = vperm.slane %v557_v29, 6  ;;  %v679_v43 = vperm.slane %v557_v29, 7  ;;  %v600_v44 = vperm.slane %v557_v29, 0  ;;  %v676_v48 = vperm.slane %v557_v29, 1 }
  0x1c   : > { %432 = vmatpush.msra.mxu1 %v362_v15  ;;  %452 = vmatpush.msra.mxu2 %v363_v16  ;;  %v356_v22 = vld [vmem:[%s3578_s25 + $0x18] sm:$0xff]  ;;  %v3673_v33 = vperm.slane %v677_v30, 1  ;;  %v3675_v35 = vperm.slane %v601_v32, 0  ;;  %v3686_v45 = vperm.slane %v678_v40, 1  ;;  %v3688_v46 = vperm.slane %v602_v41, 0 }
  0x1d   : > { %3119 = vmatmul.msk.f32.vlgmr.msra.gmra.mxu0 %vm5505_vm0, %v3626_v17  ;;  %3120 = vmatmul.msk.f32.vlgmr.msra.gmra.mxu1 %vm5505_vm0, %v3626_v17  ;;  %v360_v26 = vld [vmem:[%s3578_s25 + $0x38] sm:$0xff]  ;;  %v3690_v47 = vperm.slane %v603_v42, 0  ;;  %v3692_v49 = vperm.slane %v679_v43, 1  ;;  %v3696_v51 = vperm.slane %v600_v44, 0  ;;  %v3708_v59 = vperm.slane %v676_v48, 1 }
  0x1e   : > { %3121 = vmatmul.msk.f32.vlgmr.msra.gmra.mxu2 %vm5505_vm0, %v3626_v17  ;;  %469 = vmatpush.msrb.mxu1 %v388_v18 }
  0x1f   : > { %5511 = vst [vmem:[#allocation12_spill] sm:$0xff] %v3690_v47 }
  0x20   : > { %3259 = vset.pattern.permute.xlu2 %v5489_v0  ;;  %3257 = vset.pattern.permute.xlu1 %v5489_v0  ;;  %5512 = vst [vmem:[#allocation13_spill] sm:$0xff] %v3692_v49 }
  0x21   : > { %3255 = vset.pattern.permute.xlu0 %v3482_v1  ;;  %653 = vperm.xlu2 %3259, %v355_v5  }
  0x22   : > { %649 = vperm.xlu1 %3257, %v354_v6   ;;  %561 = vperm.xlu0 %3255, %v353_v7  }
  0x23   : > { %470 = vmatpush.msrb.mxu1 %v380_v19 }
  0x25   : > { %471 = vmatpush.msrb.mxu1 %v372_v20 }
  0x27   : > { %472 = vmatpush.msrb.mxu1 %v364_v21  ;;  %v3752_v21 = vperm.slane %v3733_v8, 0 }
  0x28   : > { %3122 = vmatmul.msk.f32.vlgmr.msrb.gmra.mxu1 %vm5505_vm0, %v3626_v17 }
  0x29   : > { %657 = vperm.xlu2 %3259, %v356_v22  }
  0x2a   : > { %3260 = vset.pattern.permute.xlu1 %v3482_v1  ;;  %581 = vperm.xlu0 %3255, %v357_v23  }
  0x2b   : > { %576 = vperm.xlu1 %3260, %v356_v22  }
  0x31   : > { %3262 = vset.pattern.permute.xlu2 %v3482_v1 }
  0x32   : > { %3263 = vset.pattern.permute.xlu0 %v5489_v0  ;;  %586 = vperm.xlu2 %3262, %v358_v24  }
  0x33   : > { %3261 = vset.pattern.permute.xlu1 %v5489_v0  ;;  %669 = vperm.xlu0 %3263, %v359_v25  }
  0x34   : > { %661 = vperm.xlu1 %3261, %v357_v23  }
  0x3a   : > { %591 = vperm.xlu2 %3262, %v359_v25  }
  0x3b   : > { %3265 = vset.pattern.permute.xlu0 %v3482_v1 }
  0x3c   : > { %665 = vperm.xlu1 %3261, %v358_v24  }
  0x42   : > { %596 = vperm.xlu2 %3262, %v360_v26  }
  0x44   : > { %3266 = vset.pattern.permute.xlu1 %v3482_v1 }
  0x4a   : > { %3264 = vset.pattern.permute.xlu2 %v5489_v0 }
  0x4b   : > { %673 = vperm.xlu2 %3264, %v360_v26  }
  0x53   : > { %3267 = vset.pattern.permute.xlu2 %v3482_v1 }
  0x72   : > { %v3664_v27 = vpop.permute.xlu2 %571 }
  0x73   : > { %5507 = vst [vmem:[#allocation8_spill] sm:$0xff] %v3664_v27  ;;  %v620_v62 = vmul.f32 %v3696_v51, %v3664_v27 }
  0x7b   : > { %v3666_v28 = vpop.permute.xlu2 %653 }
  0x7c   : > { %5508 = vst [vmem:[#allocation9_spill] sm:$0xff] %v3666_v28  ;;  %v696_v4 = vmul.f32 %v3708_v59, %v3666_v28 }
  0x7e   : > { %v728_v13 = vadd.f32 %v696_v4, %v620_v62 }
  0x83   : > { %v3671_v31 = vpop.permute.xlu2 %657 }
  0x84   : > { %5509 = vst [vmem:[#allocation10_spill] sm:$0xff] %v3671_v31  ;;  %v700_v16 = vmul.f32 %v3708_v59, %v3671_v31 }
  0x8a   : > { %v3677_v36 = vpop.permute.xlu1 %566 }
  0x8b   : > { %v646_v34 = vpop.permute.xlu0 %645  ;;  %v3682_v38 = vmul.f32 %v3675_v35, %v3677_v36  ;;  %v616_v2 = vmul.f32 %v3696_v51, %v3677_v36 }
  0x8c   : > { %v689_v37 = vmul.f32 %v3673_v33, %v646_v34  ;;  %v3684_v39 = vpop.permute.xlu2 %586  ;;  %v690_v55 = vmul.f32 %v3686_v45, %v646_v34  ;;  %v691_v60 = vmul.f32 %v3692_v49, %v646_v34  ;;  %v688_v9 = vmul.f32 %v3708_v59, %v646_v34 }
  0x8d   : > { %5510 = vst [vmem:[#allocation11_spill] sm:$0xff] %v3684_v39 }
  0x94   : > { %v3694_v50 = vpop.permute.xlu1 %649  ;;  %v562_v52 = vpop.permute.xlu0 %561 }
  0x95   : > { %v3700_v53 = vmul.f32 %v3673_v33, %v3694_v50  ;;  %v3702_v54 = vpop.permute.xlu2 %591  ;;  %v613_v56 = vmul.f32 %v3675_v35, %v562_v52  ;;  %v614_v57 = vmul.f32 %v3688_v46, %v562_v52  ;;  %v615_v58 = vmul.f32 %v3690_v47, %v562_v52 }
  0x96   : > { %5513 = vst [vmem:[#allocation14_spill] sm:$0xff] %v3702_v54  ;;  %v3713_v61 = vmul.f32 %v3675_v35, %v3702_v54  ;;  %v692_v3 = vmul.f32 %v3708_v59, %v3694_v50  ;;  %v612_v6 = vmul.f32 %v3696_v51, %v562_v52  ;;  %v636_v42 = vmul.f32 %v3696_v51, %v3702_v54 }
  0x97   : > { %v3717_v63 = vadd.f32 %v689_v37, %v613_v56  ;;  %v3719_v1 = vadd.f32 %v690_v55, %v614_v57  ;;  %v3727_v5 = vadd.f32 %v691_v60, %v615_v58 }
  0x98   : > { %v724_v14 = vadd.f32 %v692_v3, %v616_v2  ;;  %v720_v22 = vadd.f32 %v688_v9, %v612_v6 }
  0x9a   : > { %v414_v7 = vpop.f32.mrf.mxu0 }
  0x9b   : > { %v3738_v12 = vperm.slane %v414_v7, 0 }
  0x9c   : > { %v582_v10 = vpop.permute.xlu0 %581 }
  0x9d   : > { %v3736_v11 = vpop.permute.xlu1 %576  ;;  %v629_v15 = vmul.f32 %v3675_v35, %v582_v10  ;;  %v3749_v20 = vpop.permute.xlu2 %596  ;;  %v757_v24 = vadd.f32 %v3738_v12, %v728_v13  ;;  %v756_v25 = vadd.f32 %v3738_v12, %v724_v14  ;;  %v755_v26 = vadd.f32 %v3738_v12, %v720_v22 }
  0x9e   : > { %5514 = vst [vmem:[#allocation15_spill] sm:$0xff] %v3736_v11  ;;  %v624_v18 = vmul.f32 %v3696_v51, %v3736_v11  ;;  %v3747_v19 = vmul.f32 %v3675_v35, %v3736_v11  ;;  %v3756_v23 = vmul.f32 %v3675_v35, %v3749_v20  ;;  %v628_v55 = vmul.f32 %v3696_v51, %v582_v10 }
  0x9f   : > { %5515 = vst [vmem:[#allocation16_spill] sm:$0xff] %v3749_v20  ;;  %v3762_v30 = vadd.f32 %v3752_v21, %v757_v24  ;;  %v3765_v32 = vadd.f32 %v3752_v21, %v756_v25  ;;  %v3768_v34 = vadd.f32 %v3752_v21, %v755_v26  ;;  %v630_v60 = vmul.f32 %v3688_v46, %v582_v10 }
  0xa0   : > { %v732_v29 = vadd.f32 %v700_v16, %v624_v18  ;;  %v631_v7 = vmul.f32 %v3690_v47, %v582_v10  ;;  %v632_v16 = vmul.f32 %v3696_v51, %v3684_v39  ;;  %v618_v10 = vmul.f32 %v3688_v46, %v3677_v36 }
  0xa1   : > { %v778_v37 = vsel %vm5505_vm0, %v3762_v30, 0.0  ;;  %v775_v40 = vsel %vm5505_vm0, %v3765_v32, 0.0  ;;  %v772_v41 = vsel %vm5505_vm0, %v3768_v34, 0.0  ;;  %v694_v25 = vmul.f32 %v3686_v45, %v3694_v50 }
  0xa2   : > { %779 = vadd.xlane.f32.xlu2 %v778_v37  ;;  %776 = vadd.xlane.f32.xlu0 %v775_v40  ;;  %v758_v44 = vadd.f32 %v3738_v12, %v732_v29  ;;  %v640_v29 = vmul.f32 %v3696_v51, %v3749_v20 }
  0xa3   : > { %773 = vadd.xlane.f32.xlu1 %v772_v41 }
  0xa4   : > { %v3790_v2 = vadd.f32 %v3752_v21, %v758_v44 }
  0xa5   : > { %v3778_v43 = vpop.permute.xlu0 %669  ;;  %v3798_v14 = vpop.permute.xlu2 %673 }
  0xa6   : > { %5516 = vst [vmem:[#allocation17_spill] sm:$0xff] %v3778_v43  ;;  %v712_v48 = vmul.f32 %v3708_v59, %v3778_v43  ;;  %v662_v52 = vpop.permute.xlu1 %661  ;;  %v781_v18 = vsel %vm5505_vm0, %v3790_v2, 0.0  ;;  %v716_v37 = vmul.f32 %v3708_v59, %v3798_v14 }
  0xa7   : > { %v704_v56 = vmul.f32 %v3708_v59, %v662_v52  ;;  %v705_v57 = vmul.f32 %v3673_v33, %v662_v52  ;;  %v706_v58 = vmul.f32 %v3686_v45, %v662_v52  ;;  %v707_v62 = vmul.f32 %v3692_v49, %v662_v52 }
  0xa8   : > { %v744_v3 = vadd.f32 %v712_v48, %v636_v42  ;;  %v3829_v48 = vadd.f32 %v3700_v53, %v3682_v38  ;;  %v3831_v52 = vadd.f32 %v694_v25, %v618_v10  ;;  %v619_v38 = vmul.f32 %v3690_v47, %v3677_v36 }
  0xa9   : > { %v736_v4 = vadd.f32 %v704_v56, %v628_v55  ;;  %v3792_v6 = vadd.f32 %v705_v57, %v629_v15  ;;  %v3796_v13 = vadd.f32 %v706_v58, %v630_v60  ;;  %v3808_v24 = vadd.f32 %v707_v62, %v631_v7 }
  0xaa   : > { %v761_v9 = vadd.f32 %v3738_v12, %v744_v3  ;;  %v748_v55 = vadd.f32 %v716_v37, %v640_v29  ;;  %v695_v53 = vmul.f32 %v3692_v49, %v3694_v50  ;;  %v621_v50 = vmul.f32 %v3675_v35, %v3664_v27 }
  0xab   : > { %v759_v15 = vadd.f32 %v3738_v12, %v736_v4  ;;  %5517 = vst [vmem:[#allocation18_spill] sm:$0xff] %v3808_v24  ;;  %782 = vadd.xlane.f32.xlu1 %v781_v18  ;;  %v701_v4 = vmul.f32 %v3673_v33, %v3671_v31  ;;  %v633_v7 = vmul.f32 %v3675_v35, %v3684_v39  ;;  %v3483_v25 = vmov 32.0  }
  0xac   : > { %v3805_v22 = vadd.f32 %v3752_v21, %v761_v9  ;;  %v762_v58 = vadd.f32 %v3738_v12, %v748_v55  ;;  %v3849_v62 = vadd.f32 %v695_v53, %v619_v38  ;;  %v717_v18 = vmul.f32 %v3673_v33, %v3798_v14 }
  0xad   : > { %v3825_v42 = vadd.f32 %v3752_v21, %v759_v15  ;;  %3274 = vrcp.f32 %v3483_v25 }
  0xae   : > { %v3814_v26 = vpop.permute.xlu1 %665  ;;  %v790_v41 = vsel %vm5505_vm0, %v3805_v22, 0.0  ;;  %v3847_v60 = vadd.f32 %v3752_v21, %v762_v58  ;;  %v3878_v10 = vadd.f32 %v717_v18, %v3756_v23 }
  0xaf   : > { %5518 = vst [vmem:[#allocation19_spill] sm:$0xff] %v3814_v26  ;;  %v708_v40 = vmul.f32 %v3708_v59, %v3814_v26  ;;  %791 = vadd.xlane.f32.xlu0 %v790_v41  ;;  %v784_v59 = vsel %vm5505_vm0, %v3825_v42, 0.0  ;;  %v709_v36 = vmul.f32 %v3673_v33, %v3814_v26 }
  0xb0   : > { %v793_v3 = vsel %vm5505_vm0, %v3847_v60, 0.0 }
  0xb1   : > { %v740_v44 = vadd.f32 %v708_v40, %v632_v16  ;;  %v3868_v16 = vadd.f32 %v709_v36, %v633_v7 }
  0xb3   : > { %v760_v51 = vadd.f32 %v3738_v12, %v740_v44  ;;  %785 = vadd.xlane.f32.xlu1 %v784_v59  ;;  %v3856_v12 = vadd.f32 %v701_v4, %v3747_v19  ;;  %v713_v19 = vmul.f32 %v3673_v33, %v3778_v43  ;;  %v3275_v29 = vpop.eup %3274 }
  0xb4   : > { %v797_v35 = vmul.f32 32.0, %v3275_v29  ;;  %vm801_vm1 = vweird.f32 %v3275_v29 }
  0xb5   : > { %v3837_v56 = vadd.f32 %v3752_v21, %v760_v51  ;;  %v697_v21 = vmul.f32 %v3673_v33, %v3666_v28  ;;  %v3875_v15 = vadd.f32 %v713_v19, %v3713_v61 }
  0xb6   : > { %v798_v37 = vsub.f32 1.0, %v797_v35  ;;  %v434_v35 = vpop.f32.mrf.mxu1 }
  0xb7   : > { %v787_v57 = vsel %vm5505_vm0, %v3837_v56, 0.0  ;;  %v3866_v9 = vadd.f32 %v697_v21, %v621_v50 }
  0xb8   : > { %788 = vadd.xlane.f32.xlu2 %v787_v57  ;;  %v799_v40 = vmul.f32 %v3275_v29, %v798_v37 }
  0xba   : > { %v800_v41 = vadd.f32 %v3275_v29, %v799_v40 }
  0xbc   : > { %v3880_v44 = vsel %vm801_vm1, %v3275_v29, %v800_v41  ;;  %v3915_v41 = vperm.slane %v434_v35, 0  ;;  %v983_v35 = vld [vmem:[#allocation2 + $0x10] sm:$0xff] }
  0xc0   : > { %794 = vadd.xlane.f32.xlu2 %v793_v3 }
 0x115   : > { %v777_v51 = vpop.xlane.xlu0 %776  ;;  %v780_v55 = vpop.xlane.xlu2 %779 }
 0x116   : > { %v804_v33 = vmul.f32 %v3880_v44, %v777_v51  ;;  %v774_v59 = vpop.xlane.xlu1 %773  ;;  %v805_v57 = vmul.f32 %v3880_v44, %v780_v55 }
 0x117   : > { %v803_v61 = vmul.f32 %v3880_v44, %v774_v59 }
 0x118   : > { %v3885_v23 = vsub.f32 %v3765_v32, %v804_v33  ;;  %v3897_v4 = vsub.f32 %v3762_v30, %v805_v57 }
 0x119   : > { %v3889_v58 = vsub.f32 %v3768_v34, %v803_v61  ;;  %v3929_v61 = vperm.slane %v3733_v8, 6 }
 0x11a   : > { %v820_v38 = vmul.f32 %v3885_v23, %v3885_v23  ;;  %v821_v7 = vmul.f32 %v3897_v4, %v3897_v4 }
 0x11b   : > { %v819_v53 = vmul.f32 %v3889_v58, %v3889_v58 }
 0x11c   : > { %v830_v3 = vsel %vm5505_vm0, %v820_v38, 0.0  ;;  %v833_v25 = vsel %vm5505_vm0, %v821_v7, 0.0 }
 0x11d   : > { %831 = vadd.xlane.f32.xlu0 %v830_v3  ;;  %v827_v32 = vsel %vm5505_vm0, %v819_v53, 0.0  ;;  %v1246_v53 = vadd.f32 %v3915_v41, %v3717_v63 }
 0x11e   : > { %828 = vadd.xlane.f32.xlu1 %v827_v32  ;;  %v783_v36 = vpop.xlane.xlu1 %782 }
 0x11f   : > { %v806_v50 = vmul.f32 %v3880_v44, %v783_v36  ;;  %v3940_v36 = vadd.f32 %v3929_v61, %v1246_v53 }
 0x121   : > { %v3902_v34 = vsub.f32 %v3790_v2, %v806_v50 }
 0x122   : > { %v792_v21 = vpop.xlane.xlu0 %791 }
 0x123   : > { %v809_v19 = vmul.f32 %v3880_v44, %v792_v21  ;;  %v822_v30 = vmul.f32 %v3902_v34, %v3902_v34  ;;  %v1263_v21 = vsel %vm5505_vm0, %v3940_v36, 0.0 }
 0x125   : > { %v3910_v18 = vsub.f32 %v3805_v22, %v809_v19  ;;  %v836_v29 = vsel %vm5505_vm0, %v822_v30, 0.0  ;;  %v389_v19 = vld [vmem:[%s5482_s2 + $0xe0] sm:$0xff] }
 0x126   : > { %834 = vadd.xlane.f32.xlu1 %v833_v25  ;;  %837 = vadd.xlane.f32.xlu2 %v836_v29  ;;  %v786_v2 = vpop.xlane.xlu1 %785  ;;  %v373_v30 = vld [vmem:[%s5482_s2 + $0x60] sm:$0xff]  ;;  %v984_v29 = vld [vmem:[#allocation2 + $0x18] sm:$0xff] }
 0x127   : > { %v807_v37 = vmul.f32 %v3880_v44, %v786_v2  ;;  %v825_v22 = vmul.f32 %v3910_v18, %v3910_v18  ;;  %489 = vmatpush.msrb.mxu0 %v389_v19  ;;  %v365_v25 = vld [vmem:[%s5482_s2 + $0x20] sm:$0xff]  ;;  %3211 = vmatpush.msra.mxu3 %v984_v29  ;;  %v982_v2 = vld [vmem:[#allocation2 + $0x8] sm:$0xff] }
 0x129   : > { %v3918_v51 = vsub.f32 %v3825_v42, %v807_v37  ;;  %v845_v57 = vsel %vm5505_vm0, %v825_v22, 0.0  ;;  %3212 = vmatpush.msra.mxu3 %v983_v35 }
 0x12b   : > { %v789_v40 = vpop.xlane.xlu2 %788  ;;  %v823_v59 = vmul.f32 %v3918_v51, %v3918_v51  ;;  %3213 = vmatpush.msra.mxu3 %v982_v2 }
 0x12c   : > { %v808_v55 = vmul.f32 %v3880_v44, %v789_v40  ;;  %v981_v40 = vld [vmem:[#allocation2] sm:$0xff] }
 0x12d   : > { %v839_v38 = vsel %vm5505_vm0, %v823_v59, 0.0  ;;  %3214 = vmatpush.msra.mxu3 %v981_v40 }
 0x12e   : > { %v3924_v33 = vsub.f32 %v3837_v56, %v808_v55  ;;  %846 = vadd.xlane.f32.xlu2 %v845_v57  ;;  %840 = vadd.xlane.f32.xlu0 %v839_v38 }
 0x130   : > { %v824_v42 = vmul.f32 %v3924_v33, %v3924_v33 }
 0x132   : > { %v842_v56 = vsel %vm5505_vm0, %v824_v42, 0.0 }
 0x133   : > { %v795_v3 = vpop.xlane.xlu2 %794  ;;  %843 = vadd.xlane.f32.xlu1 %v842_v56 }
 0x134   : > { %v810_v32 = vmul.f32 %v3880_v44, %v795_v3 }
 0x136   : > { %v3943_v50 = vsub.f32 %v3847_v60, %v810_v32  ;;  %1264 = vadd.xlane.f32.xlu2 %v1263_v21  ;;  %v381_v60 = vld [vmem:[%s5482_s2 + $0xa0] sm:$0xff] }
 0x137   : > { %490 = vmatpush.msrb.mxu0 %v381_v60 }
 0x138   : > { %v826_v63 = vmul.f32 %v3943_v50, %v3943_v50 }
 0x139   : > { %491 = vmatpush.msrb.mxu0 %v373_v30 }
 0x13a   : > { %v848_v7 = vsel %vm5505_vm0, %v826_v63, 0.0 }
 0x13b   : > { %849 = vadd.xlane.f32.xlu0 %v848_v7  ;;  %492 = vmatpush.msrb.mxu0 %v365_v25 }
 0x13c   : > { %3123 = vmatmul.msk.f32.vlgmr.msrb.gmra.mxu0 %vm5505_vm0, %v3626_v17 }
 0x13d   : > { %1022 = vmatpush.msra.mxu0 %v984_v29 }
 0x13f   : > { %1023 = vmatpush.msra.mxu0 %v983_v35 }
 0x141   : > { %1024 = vmatpush.msra.mxu0 %v982_v2 }
 0x143   : > { %1025 = vmatpush.msra.mxu0 %v981_v40 }
 0x190   : > { %v832_v37 = vpop.xlane.xlu0 %831 }
 0x191   : > { %v852_v55 = vmul.f32 %v832_v37, %v3880_v44  ;;  %v829_v22 = vpop.xlane.xlu1 %828 }
 0x192   : > { %v851_v59 = vmul.f32 %v829_v22, %v3880_v44 }
 0x193   : > { %v860_v57 = vadd.f32 1e-05, %v852_v55 }
 0x194   : > { %v859_v17 = vadd.f32 1e-05, %v851_v59 }
 0x195   : > { %3276 = vrsqrt.f32 %v860_v57  ;;  %vm883_vm5 = vweird.f32 %v860_v57 }
 0x196   : > { %3278 = vrsqrt.f32 %v859_v17  ;;  %vm873_vm4 = vweird.f32 %v859_v17 }
 0x199   : > { %v838_v38 = vpop.xlane.xlu2 %837  ;;  %v835_v42 = vpop.xlane.xlu1 %834 }
 0x19a   : > { %v854_v53 = vmul.f32 %v838_v38, %v3880_v44  ;;  %v853_v56 = vmul.f32 %v835_v42, %v3880_v44 }
 0x19b   : > { %v3277_v3 = vpop.eup %3276 }
 0x19c   : > { %v3279_v32 = vpop.eup %3278  ;;  %v878_v21 = vmul.f32 %v3277_v3, %v860_v57  ;;  %v3968_v63 = vadd.f32 1e-05, %v854_v53  ;;  %v861_v7 = vadd.f32 1e-05, %v853_v56  ;;  %vm884_vm2 = vweird.f32 %v3277_v3 }
 0x19d   : > { %v868_v19 = vmul.f32 %v3279_v32, %v859_v17  ;;  %vm874_vm3 = vweird.f32 %v3279_v32  ;;  %vm885_vm7 = vmor %vm883_vm5, %vm884_vm2  ;;  %v3990_v17 = vperm.slane %v3733_v8, 2 }
 0x19e   : > { %v879_v60 = vmul.f32 %v3277_v3, %v878_v21  ;;  %3280 = vrsqrt.f32 %v3968_v63  ;;  %vm875_vm6 = vmor %vm873_vm4, %vm874_vm3  ;;  %vm893_vm9 = vweird.f32 %v861_v7  ;;  %vm903_vm13 = vweird.f32 %v3968_v63 }
 0x19f   : > { %v869_v30 = vmul.f32 %v3279_v32, %v868_v19  ;;  %3282 = vrsqrt.f32 %v861_v7 }
 0x1a0   : > { %v880_v25 = vmul.f32 0.5, %v879_v60 }
 0x1a1   : > { %v870_v29 = vmul.f32 0.5, %v869_v30  ;;  %v847_v35 = vpop.xlane.xlu2 %846  ;;  %v841_v2 = vpop.xlane.xlu0 %840 }
 0x1a2   : > { %v881_v37 = vsub.f32 1.5, %v880_v25  ;;  %v857_v40 = vmul.f32 %v847_v35, %v3880_v44  ;;  %v855_v55 = vmul.f32 %v841_v2, %v3880_v44  ;;  %v3983_v25 = vperm.slane %v3733_v8, 1 }
 0x1a3   : > { %v871_v22 = vsub.f32 1.5, %v870_v29 }
 0x1a4   : > { %v3973_v38 = vpop.eup %3280  ;;  %v882_v42 = vmul.f32 %v3277_v3, %v881_v37  ;;  %v3975_v53 = vadd.f32 1e-05, %v857_v40  ;;  %v3977_v56 = vadd.f32 1e-05, %v855_v55 }
 0x1a5   : > { %v3283_v19 = vpop.eup %3282  ;;  %v872_v60 = vmul.f32 %v3279_v32, %v871_v22  ;;  %v898_v30 = vmul.f32 %v3973_v38, %v3968_v63  ;;  %vm904_vm11 = vweird.f32 %v3973_v38 }
 0x1a6   : > { %v844_v59 = vpop.xlane.xlu1 %843  ;;  %v888_v29 = vmul.f32 %v3283_v19, %v861_v7  ;;  %3284 = vrsqrt.f32 %v3975_v53  ;;  %v886_v37 = vsel %vm885_vm7, %v3277_v3, %v882_v42  ;;  %vm894_vm8 = vweird.f32 %v3283_v19  ;;  %vm4013_vm14 = vmor %vm903_vm13, %vm904_vm11 }
 0x1a7   : > { %v856_v21 = vmul.f32 %v844_v59, %v3880_v44  ;;  %v876_v35 = vsel %vm875_vm6, %v3279_v32, %v872_v60  ;;  %v899_v2 = vmul.f32 %v3973_v38, %v898_v30  ;;  %3286 = vrsqrt.f32 %v3977_v56  ;;  %vm895_vm10 = vmor %vm893_vm9, %vm894_vm8 }
 0x1a8   : > { %v947_v57 = vmul.f32 %v876_v35, %v3889_v58  ;;  %v889_v40 = vmul.f32 %v3283_v19, %v888_v29  ;;  %v948_v32 = vmul.f32 %v886_v37, %v3885_v23  ;;  %vm913_vm15 = vweird.f32 %v3977_v56 }
 0x1a9   : > { %v864_v55 = vadd.f32 1e-05, %v856_v21  ;;  %v900_v0 = vmul.f32 0.5, %v899_v2  ;;  %vm933_vm6 = vweird.f32 %v3975_v53 }
 0x1aa   : > { %v956_v22 = vmul.f32 %v3983_v25, %v947_v57  ;;  %v890_v59 = vmul.f32 0.5, %v889_v40  ;;  %v957_v37 = vmul.f32 %v3983_v25, %v948_v32 }
 0x1ab   : > { %3288 = vrsqrt.f32 %v864_v55  ;;  %v901_v2 = vsub.f32 1.5, %v900_v0  ;;  %vm923_vm3 = vweird.f32 %v864_v55 }
 0x1ac   : > { %v3995_v60 = vpop.eup %3284  ;;  %v891_v30 = vsub.f32 1.5, %v890_v59  ;;  %v965_v3 = vadd.f32 %v3990_v17, %v956_v22  ;;  %v966_v0 = vadd.f32 %v3990_v17, %v957_v37 }
 0x1ad   : > { %v3287_v42 = vpop.eup %3286  ;;  %v928_v58 = vmul.f32 %v3995_v60, %v3975_v53  ;;  %v902_v32 = vmul.f32 %v3973_v38, %v901_v2  ;;  %vm934_vm5 = vweird.f32 %v3995_v60 }
 0x1ae   : > { %v850_v24 = vpop.xlane.xlu0 %849  ;;  %v892_v21 = vmul.f32 %v3283_v19, %v891_v30  ;;  %v908_v29 = vmul.f32 %v3287_v42, %v3977_v56  ;;  %v973_v23 = vmax.f32 %v965_v3, 0.0  ;;  %vm914_vm12 = vweird.f32 %v3287_v42  ;;  %vm935_vm7 = vmor %vm933_vm6, %vm934_vm5 }
 0x1af   : > { %v858_v49 = vmul.f32 %v850_v24, %v3880_v44  ;;  %v929_v24 = vmul.f32 %v3995_v60, %v928_v58  ;;  %vm915_vm2 = vmor %vm913_vm15, %vm914_vm12  ;;  %v974_v2 = vmax.f32 %v966_v0, 0.0  ;;  %v906_v63 = vsel %vm4013_vm14, %v3973_v38, %v902_v32 }
 0x1b0   : > { %v896_v40 = vsel %vm895_vm10, %v3283_v19, %v892_v21  ;;  %v909_v22 = vmul.f32 %v3287_v42, %v908_v29  ;;  %3127 = vmatmul.msk.f32.vlgmr.msra.gmra.mxu0 %vm5505_vm0, %v973_v23 }
 0x1b1   : > { %v4002_v35 = vadd.f32 1e-05, %v858_v49  ;;  %v3289_v57 = vpop.eup %3288  ;;  %v949_v30 = vmul.f32 %v896_v40, %v3897_v4  ;;  %v930_v3 = vmul.f32 0.5, %v929_v24 }
 0x1b2   : > { %v918_v59 = vmul.f32 %v3289_v57, %v864_v55  ;;  %v910_v7 = vmul.f32 0.5, %v909_v22  ;;  %vm924_vm1 = vweird.f32 %v3289_v57 }
 0x1b3   : > { %3290 = vrsqrt.f32 %v4002_v35  ;;  %v958_v40 = vmul.f32 %v3983_v25, %v949_v30  ;;  %v931_v24 = vsub.f32 1.5, %v930_v3  ;;  %vm925_vm4 = vmor %vm923_vm3, %vm924_vm1  ;;  %v950_v30 = vmul.f32 %v906_v63, %v3902_v34 }
 0x1b4   : > { %v919_v49 = vmul.f32 %v3289_v57, %v918_v59  ;;  %v911_v19 = vsub.f32 1.5, %v910_v7  ;;  %vm943_vm9 = vweird.f32 %v4002_v35 }
 0x1b5   : > { %v959_v32 = vmul.f32 %v3983_v25, %v950_v30 }
 0x1b6   : > { %v920_v58 = vmul.f32 0.5, %v919_v49  ;;  %v912_v23 = vmul.f32 %v3287_v42, %v911_v19  ;;  %v967_v19 = vadd.f32 %v3990_v17, %v958_v40 }
 0x1b8   : > { %v921_v37 = vsub.f32 1.5, %v920_v58  ;;  %v916_v22 = vsel %vm915_vm2, %v3287_v42, %v912_v23  ;;  %3128 = vmatmul.msk.f32.gmra.mxu0 %vm5505_vm0, %v974_v2  ;;  %v932_v58 = vmul.f32 %v3995_v60, %v931_v24 }
 0x1b9   : > { %v3291_v21 = vpop.eup %3290  ;;  %v951_v56 = vmul.f32 %v916_v22, %v3918_v51  ;;  %v975_v51 = vmax.f32 %v967_v19, 0.0 }
 0x1ba   : > { %v938_v4 = vmul.f32 %v3291_v21, %v4002_v35  ;;  %v922_v59 = vmul.f32 %v3289_v57, %v921_v37  ;;  %v936_v34 = vsel %vm935_vm7, %v3995_v60, %v932_v58  ;;  %vm944_vm8 = vweird.f32 %v3291_v21 }
 0x1bb   : > { %v960_v0 = vmul.f32 %v3983_v25, %v951_v56  ;;  %v953_v53 = vmul.f32 %v936_v34, %v3910_v18  ;;  %vm945_vm10 = vmor %vm943_vm9, %vm944_vm8  ;;  %v1248_v58 = vadd.f32 %v3915_v41, %v3866_v9 }
 0x1bc   : > { %v939_v7 = vmul.f32 %v3291_v21, %v938_v4  ;;  %v926_v49 = vsel %vm925_vm4, %v3289_v57, %v922_v59 }
 0x1bd   : > { %v952_v55 = vmul.f32 %v926_v49, %v3924_v33  ;;  %v969_v42 = vadd.f32 %v3990_v17, %v960_v0  ;;  %v968_v33 = vadd.f32 %v3990_v17, %v959_v32  ;;  %v962_v60 = vmul.f32 %v3983_v25, %v953_v53 }
 0x1be   : > { %v940_v38 = vmul.f32 0.5, %v939_v7  ;;  %v4051_v7 = vpop.f32.mrf.mxu0  ;;  %v1251_v53 = vadd.f32 %v3915_v41, %v3868_v16 }
 0x1bf   : > { %v977_v57 = vmax.f32 %v969_v42, 0.0  ;;  %v961_v3 = vmul.f32 %v3983_v25, %v952_v55  ;;  %v976_v4 = vmax.f32 %v968_v33, 0.0  ;;  %v971_v63 = vadd.f32 %v3990_v17, %v962_v60  ;;  %5521 = vst [vmem:[#allocation20_spill] sm:$0xff] %v4051_v7 }
 0x1c0   : > { %v941_v29 = vsub.f32 1.5, %v940_v38  ;;  %3129 = vmatmul.msk.f32.gmra.mxu0 %vm5505_vm0, %v975_v51 }
 0x1c1   : > { %3131 = vmatmul.msk.f32.vlgmr.msra.gmra.mxu3 %vm5505_vm0, %v977_v57  ;;  %v970_v23 = vadd.f32 %v3990_v17, %v961_v3  ;;  %v979_v22 = vmax.f32 %v971_v63, 0.0  ;;  %v1249_v57 = vadd.f32 %v3915_v41, %v3856_v12  ;;  %v4108_v63 = vadd.f32 %v3929_v61, %v1251_v53 }
 0x1c2   : > { %v942_v37 = vmul.f32 %v3291_v21, %v941_v29 }
 0x1c3   : > { %v978_v2 = vmax.f32 %v970_v23, 0.0  ;;  %v4088_v3 = vadd.f32 %v3929_v61, %v1249_v57 }
 0x1c4   : > { %v946_v40 = vsel %vm945_vm10, %v3291_v21, %v942_v37  ;;  %v4054_v21 = vperm.slane %v3733_v8, 3  ;;  %v1265_v37 = vpop.xlane.xlu2 %1264 }
 0x1c5   : > { %v954_v24 = vmul.f32 %v946_v40, %v3943_v50  ;;  %v1272_v33 = vsel %vm5505_vm0, %v4088_v3, 0.0  ;;  %v1287_v60 = vmul.f32 %v1265_v37, %v3880_v44 }
 0x1c7   : > { %v963_v18 = vmul.f32 %v3983_v25, %v954_v24  ;;  %v1247_v25 = vadd.f32 %v3915_v41, %v3829_v48  ;;  %v4073_v48 = vadd.f32 %v3929_v61, %v1248_v58  ;;  %v4114_v16 = vsub.f32 %v3940_v36, %v1287_v60 }
 0x1c8   : > { %3130 = vmatmul.msk.f32.gmra.mxu0 %vm5505_vm0, %v976_v4  ;;  %v1250_v4 = vadd.f32 %v3915_v41, %v3792_v6  ;;  %v1278_v6 = vsel %vm5505_vm0, %v4108_v63, 0.0 }
 0x1c9   : > { %3132 = vmatmul.msk.f32.gmra.mxu3 %vm5505_vm0, %v978_v2  ;;  %v972_v35 = vadd.f32 %v3990_v17, %v963_v18  ;;  %v4061_v19 = vadd.f32 %v3929_v61, %v1247_v25  ;;  %v1269_v51 = vsel %vm5505_vm0, %v4073_v48, 0.0  ;;  %v1303_v36 = vmul.f32 %v4114_v16, %v4114_v16 }
 0x1ca   : > { %v4111_v24 = vadd.f32 %v3929_v61, %v1250_v4 }
 0x1cb   : > { %v980_v59 = vmax.f32 %v972_v35, 0.0  ;;  %v1266_v30 = vsel %vm5505_vm0, %v4061_v19, 0.0  ;;  %v1252_v35 = vadd.f32 %v3915_v41, %v3875_v15  ;;  %v1311_v25 = vsel %vm5505_vm0, %v1303_v36, 0.0 }
 0x1cc   : > { %v1275_v18 = vsel %vm5505_vm0, %v4111_v24, 0.0 }
 0x1d1   : > { %3133 = vmatmul.msk.f32.gmra.mxu3 %vm5505_vm0, %v979_v22 }
 0x1d9   : > { %3134 = vmatmul.msk.f32.gmra.mxu3 %vm5505_vm0, %v980_v59 }
 0x22d   : > { %v1027_v56 = vpop.f32.mrf.mxu0 }
 0x22e   : > { %v1028_v49 = vadd.f32 %v1027_v56, %v4054_v21 }
 0x230   : > { %v1051_v50 = vsel %vm5505_vm0, %v1028_v49, 0.0 }
 0x231   : > { %1052 = vadd.xlane.f32.xlu1 %v1051_v50  ;;  %v4130_v50 = vadd.f32 %v3929_v61, %v1252_v35 }
 0x233   : > { %v1281_v15 = vsel %vm5505_vm0, %v4130_v50, 0.0 }
 0x235   : > { %v1030_v17 = vpop.f32.mrf.mxu0 }
 0x236   : > { %v4064_v0 = vadd.f32 %v1030_v17, %v4054_v21 }
 0x238   : > { %v1054_v8 = vsel %vm5505_vm0, %v4064_v0, 0.0 }
 0x239   : > { %1055 = vadd.xlane.f32.xlu0 %v1054_v8  ;;  %1267 = vadd.xlane.f32.xlu1 %v1266_v30 }
 0x23d   : > { %v1033_v38 = vpop.f32.mrf.mxu0 }
 0x23e   : > { %v4076_v55 = vadd.f32 %v1033_v38, %v4054_v21 }
 0x240   : > { %v1057_v42 = vsel %vm5505_vm0, %v4076_v55, 0.0 }
 0x241   : > { %1058 = vadd.xlane.f32.xlu2 %v1057_v42  ;;  %1270 = vadd.xlane.f32.xlu0 %v1269_v51 }
 0x244   : > { %v1039_v9 = vpop.f32.mrf.mxu3 }
 0x245   : > { %v4085_v32 = vadd.f32 %v1039_v9, %v4054_v21  ;;  %v1036_v34 = vpop.f32.mrf.mxu0 }
 0x246   : > { %v4091_v29 = vadd.f32 %v1036_v34, %v4054_v21 }
 0x247   : > { %v1063_v23 = vsel %vm5505_vm0, %v4085_v32, 0.0 }
 0x248   : > { %v1060_v12 = vsel %vm5505_vm0, %v4091_v29, 0.0 }
 0x249   : > { %1273 = vadd.xlane.f32.xlu2 %v1272_v33  ;;  %1064 = vadd.xlane.f32.xlu0 %v1063_v23 }
 0x24a   : > { %1061 = vadd.xlane.f32.xlu1 %v1060_v12 }
 0x24c   : > { %v1042_v2 = vpop.f32.mrf.mxu3 }
 0x24d   : > { %v4105_v40 = vadd.f32 %v1042_v2, %v4054_v21 }
 0x24f   : > { %v1066_v22 = vsel %vm5505_vm0, %v4105_v40, 0.0 }
 0x251   : > { %1067 = vadd.xlane.f32.xlu2 %v1066_v22  ;;  %1279 = vadd.xlane.f32.xlu0 %v1278_v6 }
 0x252   : > { %1276 = vadd.xlane.f32.xlu1 %v1275_v18 }
 0x254   : > { %v1045_v59 = vpop.f32.mrf.mxu3 }
 0x255   : > { %v4125_v56 = vadd.f32 %v1045_v59, %v4054_v21 }
 0x257   : > { %v1069_v17 = vsel %vm5505_vm0, %v4125_v56, 0.0 }
 0x259   : > { %1312 = vadd.xlane.f32.xlu2 %v1311_v25  ;;  %1070 = vadd.xlane.f32.xlu0 %v1069_v17 }
 0x25a   : > { %1282 = vadd.xlane.f32.xlu1 %v1281_v15 }
 0x25c   : > { %v1048_v42 = vpop.f32.mrf.mxu3 }
 0x25d   : > { %v4146_v23 = vadd.f32 %v1048_v42, %v4054_v21 }
 0x25f   : > { %v1072_v2 = vsel %vm5505_vm0, %v4146_v23, 0.0 }
 0x2a4   : > { %v1053_v8 = vpop.xlane.xlu1 %1052 }
 0x2a5   : > { %v1075_v30 = vmul.f32 %v1053_v8, %v3880_v44 }
 0x2a7   : > { %v4138_v58 = vsub.f32 %v1028_v49, %v1075_v30 }
 0x2a9   : > { %v1091_v38 = vmul.f32 %v4138_v58, %v4138_v58 }
 0x2ab   : > { %v1099_v51 = vsel %vm5505_vm0, %v1091_v38, 0.0 }
 0x2ac   : > { %v1056_v57 = vpop.xlane.xlu0 %1055  ;;  %1100 = vadd.xlane.f32.xlu1 %v1099_v51  ;;  %v1268_v9 = vpop.xlane.xlu1 %1267 }
 0x2ad   : > { %v1076_v34 = vmul.f32 %v1056_v57, %v3880_v44  ;;  %v1288_v33 = vmul.f32 %v1268_v9, %v3880_v44 }
 0x2af   : > { %v4149_v12 = vsub.f32 %v4064_v0, %v1076_v34  ;;  %v4152_v49 = vsub.f32 %v4061_v19, %v1288_v33  ;;  %v1253_v0 = vadd.f32 %v3915_v41, %v3878_v10 }
 0x2b1   : > { %v1092_v53 = vmul.f32 %v4149_v12, %v4149_v12  ;;  %v1304_v37 = vmul.f32 %v4152_v49, %v4152_v49  ;;  %v4173_v59 = vadd.f32 %v3929_v61, %v1253_v0 }
 0x2b3   : > { %v1102_v4 = vsel %vm5505_vm0, %v1092_v53, 0.0  ;;  %v1314_v21 = vsel %vm5505_vm0, %v1304_v37, 0.0  ;;  %v1284_v36 = vsel %vm5505_vm0, %v4173_v59, 0.0 }
 0x2b4   : > { %v1059_v60 = vpop.xlane.xlu2 %1058  ;;  %1103 = vadd.xlane.f32.xlu2 %v1102_v4  ;;  %v1271_v19 = vpop.xlane.xlu0 %1270  ;;  %1073 = vadd.xlane.f32.xlu1 %v1072_v2 }
 0x2b5   : > { %v1077_v22 = vmul.f32 %v1059_v60, %v3880_v44  ;;  %v1289_v6 = vmul.f32 %v1271_v19, %v3880_v44  ;;  %1315 = vadd.xlane.f32.xlu0 %v1314_v21 }
 0x2b7   : > { %v4167_v18 = vsub.f32 %v4076_v55, %v1077_v22  ;;  %v4170_v35 = vsub.f32 %v4073_v48, %v1289_v6 }
 0x2b9   : > { %v1305_v10 = vmul.f32 %v4170_v35, %v4170_v35  ;;  %v1093_v41 = vmul.f32 %v4167_v18, %v4167_v18 }
 0x2bb   : > { %v1317_v25 = vsel %vm5505_vm0, %v1305_v10, 0.0  ;;  %v1105_v55 = vsel %vm5505_vm0, %v1093_v41, 0.0 }
 0x2bc   : > { %v1274_v17 = vpop.xlane.xlu2 %1273  ;;  %1285 = vadd.xlane.f32.xlu2 %v1284_v36  ;;  %v1065_v48 = vpop.xlane.xlu0 %1064  ;;  %1318 = vadd.xlane.f32.xlu1 %v1317_v25 }
 0x2bd   : > { %v1290_v61 = vmul.f32 %v1274_v17, %v3880_v44  ;;  %v1079_v15 = vmul.f32 %v1065_v48, %v3880_v44  ;;  %1106 = vadd.xlane.f32.xlu0 %v1105_v55  ;;  %v1062_v8 = vpop.xlane.xlu1 %1061  ;;  %v454_v25 = vpop.f32.mrf.mxu2 }
 0x2be   : > { %v1078_v30 = vmul.f32 %v1062_v8, %v3880_v44  ;;  %v4238_v8 = vld [vmem:[%s5487_s7 + $0x10] sm:$0xff] }
 0x2bf   : > { %v4187_v38 = vsub.f32 %v4088_v3, %v1290_v61  ;;  %v4190_v42 = vsub.f32 %v4085_v32, %v1079_v15  ;;  %v4230_v61 = vperm.slane %v454_v25, 0  ;;  %v384_v25 = vld [vmem:[%s5482_s2 + $0xb8] sm:$0xff] }
 0x2c0   : > { %v4193_v51 = vsub.f32 %v4091_v29, %v1078_v30 }
 0x2c1   : > { %v1095_v57 = vmul.f32 %v4190_v42, %v4190_v42  ;;  %v1306_v9 = vmul.f32 %v4187_v38, %v4187_v38 }
 0x2c2   : > { %v1094_v34 = vmul.f32 %v4193_v51, %v4193_v51 }
 0x2c3   : > { %v1111_v33 = vsel %vm5505_vm0, %v1095_v57, 0.0  ;;  %v1320_v3 = vsel %vm5505_vm0, %v1306_v9, 0.0 }
 0x2c4   : > { %v1068_v53 = vpop.xlane.xlu2 %1067  ;;  %v1280_v37 = vpop.xlane.xlu0 %1279  ;;  %1112 = vadd.xlane.f32.xlu1 %v1111_v33  ;;  %v1108_v32 = vsel %vm5505_vm0, %v1094_v34, 0.0  ;;  %v1477_v33 = vadd.f32 %v4230_v61, %v3719_v1 }
 0x2c5   : > { %v1080_v29 = vmul.f32 %v1068_v53, %v3880_v44  ;;  %v1292_v4 = vmul.f32 %v1280_v37, %v3880_v44  ;;  %1321 = vadd.xlane.f32.xlu0 %v1320_v3  ;;  %1109 = vadd.xlane.f32.xlu2 %v1108_v32  ;;  %v1277_v2 = vpop.xlane.xlu1 %1276  ;;  %v702_v3 = vmul.f32 %v3686_v45, %v3671_v31 }
 0x2c6   : > { %v1291_v21 = vmul.f32 %v1277_v2, %v3880_v44 }
 0x2c7   : > { %v4208_v0 = vsub.f32 %v4105_v40, %v1080_v29  ;;  %v4211_v60 = vsub.f32 %v4108_v63, %v1292_v4 }
 0x2c8   : > { %v4214_v19 = vsub.f32 %v4111_v24, %v1291_v21  ;;  %v391_v21 = vld [vmem:[%s5482_s2 + $0xf0] sm:$0xff] }
 0x2c9   : > { %v1308_v22 = vmul.f32 %v4211_v60, %v4211_v60  ;;  %v1096_v6 = vmul.f32 %v4208_v0, %v4208_v0  ;;  %529 = vmatpush.msrb.mxu2 %v391_v21 }
 0x2ca   : > { %v1307_v10 = vmul.f32 %v4214_v19, %v4214_v19 }
 0x2cb   : > { %v1326_v41 = vsel %vm5505_vm0, %v1308_v22, 0.0  ;;  %v1114_v40 = vsel %vm5505_vm0, %v1096_v6, 0.0  ;;  %v383_v6 = vld [vmem:[%s5482_s2 + $0xb0] sm:$0xff] }
 0x2cc   : > { %v1071_v36 = vpop.xlane.xlu0 %1070  ;;  %1327 = vadd.xlane.f32.xlu1 %v1326_v41  ;;  %v1323_v63 = vsel %vm5505_vm0, %v1307_v10, 0.0  ;;  %v1313_v2 = vpop.xlane.xlu2 %1312  ;;  %530 = vmatpush.msrb.mxu2 %v383_v6  ;;  %v375_v10 = vld [vmem:[%s5482_s2 + $0x70] sm:$0xff] }
 0x2cd   : > { %v1081_v24 = vmul.f32 %v1071_v36, %v3880_v44  ;;  %1115 = vadd.xlane.f32.xlu0 %v1114_v40  ;;  %1324 = vadd.xlane.f32.xlu2 %v1323_v63  ;;  %v1283_v55 = vpop.xlane.xlu1 %1282  ;;  %v1335_v22 = vmul.f32 %v1313_v2, %v3880_v44  ;;  %v367_v40 = vld [vmem:[%s5482_s2 + $0x30] sm:$0xff]  ;;  %v4282_v36 = vld [vmem:[%s3611_s24] sm:$0x1]  ;;  %v392_v63 = vld [vmem:[%s5482_s2 + $0xf8] sm:$0xff] }
 0x2ce   : > { %v1293_v17 = vmul.f32 %v1283_v55, %v3880_v44  ;;  %531 = vmatpush.msrb.mxu2 %v375_v10  ;;  %v368_v55 = vld [vmem:[%s5482_s2 + $0x38] sm:$0xff]  ;;  %v1478_v10 = vadd.f32 %v4230_v61, %v3831_v52  ;;  %v1481_v52 = vadd.f32 %v4230_v61, %v3796_v13 }
 0x2cf   : > { %v4228_v48 = vsub.f32 %v4125_v56, %v1081_v24  ;;  %v4246_v56 = vperm.slane %v4238_v8, 0  ;;  %v4276_v41 = vadd.f32 1e-05, %v1335_v22  ;;  %v376_v24 = vld [vmem:[%s5482_s2 + $0x78] sm:$0xff] }
 0x2d0   : > { %v4233_v15 = vsub.f32 %v4130_v50, %v1293_v17  ;;  %v626_v50 = vmul.f32 %v3688_v46, %v3736_v11  ;;  %532 = vmatpush.msrb.mxu2 %v367_v40 }
 0x2d1   : > { %v1097_v30 = vmul.f32 %v4228_v48, %v4228_v48  ;;  %v4256_v53 = vadd.f32 %v4246_v56, %v1477_v33  ;;  %3125 = vmatmul.msk.f32.vlgmr.msrb.gmra.mxu2 %vm5505_vm0, %v4282_v36  ;;  %3292 = vrsqrt.f32 %v4276_v41  ;;  %v2190_v33 = vld [vmem:[#allocation4 + $0x20] sm:$0xff]  ;;  %vm1357_vm12 = vweird.f32 %v4276_v41 }
 0x2d2   : > { %v1309_v57 = vmul.f32 %v4233_v15, %v4233_v15  ;;  %v734_v37 = vadd.f32 %v702_v3, %v626_v50  ;;  %549 = vmatpush.msra.mxu2 %v392_v63  ;;  %v622_v63 = vmul.f32 %v3688_v46, %v3664_v27 }
 0x2d3   : > { %v1117_v9 = vsel %vm5505_vm0, %v1097_v30, 0.0  ;;  %v1494_v32 = vsel %vm5505_vm0, %v4256_v53, 0.0  ;;  %v2192_v30 = vld [vmem:[#allocation4 + $0x60] sm:$0xff] }
 0x2d4   : > { %v1329_v34 = vsel %vm5505_vm0, %v1309_v57, 0.0  ;;  %v1480_v29 = vadd.f32 %v4230_v61, %v734_v37  ;;  %550 = vmatpush.msra.mxu2 %v384_v25 }
 0x2d5   : > { %1118 = vadd.xlane.f32.xlu2 %v1117_v9  ;;  %1330 = vadd.xlane.f32.xlu0 %v1329_v34  ;;  %v2191_v9 = vld [vmem:[#allocation4 + $0x40] sm:$0xff] }
 0x2d6   : > { %v4262_v4 = vadd.f32 %v4246_v56, %v1480_v29  ;;  %551 = vmatpush.msra.mxu2 %v376_v24 }
 0x2d7   : > { %v4299_v17 = vpop.eup %3292 }
 0x2d8   : > { %v1503_v1 = vsel %vm5505_vm0, %v4262_v4, 0.0  ;;  %552 = vmatpush.msra.mxu2 %v368_v55  ;;  %v1352_v57 = vmul.f32 %v4299_v17, %v4276_v41  ;;  %vm1358_vm11 = vweird.f32 %v4299_v17 }
 0x2d9   : > { %3126 = vmatmul.msk.f32.vlgmr.msra.gmra.mxu2 %vm5505_vm0, %v4282_v36  ;;  %vm4353_vm13 = vmor %vm1357_vm12, %vm1358_vm11 }
 0x2da   : > { %2230 = vmatpush.msrb.mxu2 %v2192_v30  ;;  %v1353_v3 = vmul.f32 %v4299_v17, %v1352_v57  ;;  %v698_v57 = vmul.f32 %v3686_v45, %v3666_v28 }
 0x2dc   : > { %2231 = vmatpush.msrb.mxu2 %v2191_v9  ;;  %v1354_v29 = vmul.f32 0.5, %v1353_v3 }
 0x2dd   : > { %1495 = vadd.xlane.f32.xlu0 %v1494_v32  ;;  %v2189_v32 = vld [vmem:[#allocation4] sm:$0xff] }
 0x2de   : > { %2232 = vmatpush.msrb.mxu2 %v2190_v33  ;;  %v1355_v24 = vsub.f32 1.5, %v1354_v29  ;;  %v4329_v33 = vadd.f32 %v4246_v56, %v1478_v10 }
 0x2e0   : > { %2233 = vmatpush.msrb.mxu2 %v2189_v32  ;;  %v634_v32 = vmul.f32 %v3688_v46, %v3684_v39  ;;  %v1356_v29 = vmul.f32 %v4299_v17, %v1355_v24 }
 0x2e5   : > { %1504 = vadd.xlane.f32.xlu0 %v1503_v1 }
 0x31f   : > { %v1101_v50 = vpop.xlane.xlu1 %1100 }
 0x320   : > { %v1123_v34 = vmul.f32 %v1101_v50, %v3880_v44 }
 0x322   : > { %v1131_v37 = vadd.f32 1e-05, %v1123_v34 }
 0x324   : > { %3294 = vrsqrt.f32 %v1131_v37  ;;  %vm1145_vm15 = vweird.f32 %v1131_v37 }
 0x327   : > { %v1104_v1 = vpop.xlane.xlu2 %1103  ;;  %v1074_v2 = vpop.xlane.xlu1 %1073 }
 0x328   : > { %v1124_v21 = vmul.f32 %v1104_v1, %v3880_v44  ;;  %v1316_v22 = vpop.xlane.xlu0 %1315  ;;  %v1082_v6 = vmul.f32 %v1074_v2, %v3880_v44  ;;  %v730_v1 = vadd.f32 %v698_v57, %v622_v63  ;;  %v638_v2 = vmul.f32 %v3688_v46, %v3702_v54 }
 0x329   : > { %v1336_v40 = vmul.f32 %v1316_v22, %v3880_v44  ;;  %v1497_v57 = vsel %vm5505_vm0, %v4329_v33, 0.0 }
 0x32a   : > { %v3295_v25 = vpop.eup %3294  ;;  %v4314_v55 = vadd.f32 1e-05, %v1124_v21  ;;  %v4317_v30 = vsub.f32 %v4146_v23, %v1082_v6  ;;  %v710_v23 = vmul.f32 %v3686_v45, %v3814_v26  ;;  %v714_v21 = vmul.f32 %v3686_v45, %v3778_v43 }
 0x32b   : > { %v1140_v9 = vmul.f32 %v3295_v25, %v1131_v37  ;;  %v4321_v50 = vadd.f32 1e-05, %v1336_v40  ;;  %v4344_v40 = vadd.f32 %v4246_v56, %v1481_v52  ;;  %vm1146_vm14 = vweird.f32 %v3295_v25 }
 0x32c   : > { %3296 = vrsqrt.f32 %v4314_v55  ;;  %v1098_v34 = vmul.f32 %v4317_v30, %v4317_v30  ;;  %v1479_v43 = vadd.f32 %v4230_v61, %v730_v1  ;;  %vm1147_vm1 = vmor %vm1145_vm15, %vm1146_vm14  ;;  %vm1155_vm4 = vweird.f32 %v4314_v55 }
 0x32d   : > { %v1141_v3 = vmul.f32 %v3295_v25, %v1140_v9  ;;  %3298 = vrsqrt.f32 %v4321_v50  ;;  %vm1367_vm6 = vweird.f32 %v4321_v50 }
 0x32e   : > { %v1120_v13 = vsel %vm5505_vm0, %v1098_v34, 0.0 }
 0x32f   : > { %v1142_v22 = vmul.f32 0.5, %v1141_v3  ;;  %v1286_v6 = vpop.xlane.xlu2 %1285  ;;  %1121 = vadd.xlane.f32.xlu1 %v1120_v13  ;;  %v1319_v10 = vpop.xlane.xlu1 %1318  ;;  %v742_v13 = vadd.f32 %v710_v23, %v634_v32 }
 0x330   : > { %v1294_v24 = vmul.f32 %v1286_v6, %v3880_v44  ;;  %v1107_v9 = vpop.xlane.xlu0 %1106  ;;  %v1337_v63 = vmul.f32 %v1319_v10, %v3880_v44  ;;  %v1360_v6 = vsel %vm4353_vm13, %v4299_v17, %v1356_v29  ;;  %v3389_v17 = vld [vmem:[%s5487_s7] sm:$0xff] }
 0x331   : > { %v1143_v3 = vsub.f32 1.5, %v1142_v22  ;;  %v1125_v52 = vmul.f32 %v1107_v9, %v3880_v44  ;;  %v4378_v29 = vperm.slane %v3389_v17, 7  ;;  %v1431_v37 = vmul.f32 %v1360_v6, %v4114_v16 }
 0x332   : > { %v4358_v41 = vpop.eup %3296  ;;  %v4364_v10 = vsub.f32 %v4173_v59, %v1294_v24  ;;  %v4366_v7 = vadd.f32 1e-05, %v1337_v63  ;;  %v4380_v59 = vperm.slane %v3389_v17, 4  ;;  %v4394_v39 = vperm.slane %v3389_v17, 5 }
 0x333   : > { %v4369_v54 = vpop.eup %3298  ;;  %v1144_v22 = vmul.f32 %v3295_v25, %v1143_v3  ;;  %v1150_v23 = vmul.f32 %v4358_v41, %v4314_v55  ;;  %v4373_v32 = vadd.f32 1e-05, %v1125_v52  ;;  %v1482_v52 = vadd.f32 %v4230_v61, %v742_v13  ;;  %v4405_v13 = vld [vmem:[%s5487_s7 + $0x8] ss:$0 sm:$0xff] }
 0x334   : > { %v1362_v1 = vmul.f32 %v4369_v54, %v4321_v50  ;;  %3300 = vrsqrt.f32 %v4366_v7  ;;  %v1310_v3 = vmul.f32 %v4364_v10, %v4364_v10  ;;  %v4397_v16 = vadd.f32 %v4246_v56, %v1479_v43 }
 0x335   : > { %v1148_v24 = vsel %vm1147_vm1, %v3295_v25, %v1144_v22  ;;  %v1151_v9 = vmul.f32 %v4358_v41, %v1150_v23  ;;  %3302 = vrsqrt.f32 %v4373_v32  ;;  %vm1156_vm2 = vweird.f32 %v4358_v41 }
 0x336   : > { %v1219_v63 = vmul.f32 %v1148_v24, %v4138_v58  ;;  %v1363_v34 = vmul.f32 %v4369_v54, %v1362_v1  ;;  %v1332_v23 = vsel %vm5505_vm0, %v1310_v3, 0.0  ;;  %v746_v24 = vadd.f32 %v714_v21, %v638_v2  ;;  %vm4451_vm5 = vmor %vm1155_vm4, %vm1156_vm2 }
 0x337   : > { %v1152_v26 = vmul.f32 0.5, %v1151_v9  ;;  %1498 = vadd.xlane.f32.xlu1 %v1497_v57  ;;  %v1113_v31 = vpop.xlane.xlu1 %1112  ;;  %v1440_v57 = vmul.f32 %v4378_v29, %v1431_v37  ;;  %1333 = vadd.xlane.f32.xlu2 %v1332_v23  ;;  %v4419_v3 = vadd.f32 %v4246_v56, %v1482_v52  ;;  %v1500_v52 = vsel %vm5505_vm0, %v4397_v16, 0.0 }
 0x338   : > { %v1228_v25 = vmul.f32 %v4380_v59, %v1219_v63  ;;  %v1364_v6 = vmul.f32 0.5, %v1363_v34  ;;  %v1322_v22 = vpop.xlane.xlu0 %1321  ;;  %v1110_v58 = vpop.xlane.xlu2 %1109  ;;  %v1127_v1 = vmul.f32 %v1113_v31, %v3880_v44  ;;  %v4414_v63 = vmul.f32 %v3688_v46, %v3749_v20 }
 0x339   : > { %v1338_v17 = vmul.f32 %v1322_v22, %v3880_v44  ;;  %v1126_v43 = vmul.f32 %v1110_v58, %v3880_v44  ;;  %v1153_v31 = vsub.f32 1.5, %v1152_v26  ;;  %v1506_v34 = vsel %vm5505_vm0, %v4344_v40, 0.0 }
 0x33a   : > { %v4410_v9 = vpop.eup %3300  ;;  %v1365_v22 = vsub.f32 1.5, %v1364_v6  ;;  %v4427_v21 = vadd.f32 1e-05, %v1127_v1  ;;  %v1237_v46 = vadd.f32 %v4394_v39, %v1228_v25  ;;  %v1449_v20 = vadd.f32 %v4405_v13, %v1440_v57 }
 0x33b   : > { %v4421_v37 = vpop.eup %3302  ;;  %v1372_v58 = vmul.f32 %v4410_v9, %v4366_v7  ;;  %v4425_v2 = vadd.f32 1e-05, %v1338_v17  ;;  %v4432_v23 = vadd.f32 1e-05, %v1126_v43  ;;  %v1483_v17 = vadd.f32 %v4230_v61, %v746_v24 }
 0x33c   : > { %v1160_v26 = vmul.f32 %v4421_v37, %v4373_v32  ;;  %vm1368_vm3 = vweird.f32 %v4369_v54  ;;  %v1154_v1 = vmul.f32 %v4358_v41, %v1153_v31  ;;  %v1366_v43 = vmul.f32 %v4369_v54, %v1365_v22 }
 0x33d   : > { %v1373_v6 = vmul.f32 %v4410_v9, %v1372_v58  ;;  %3304 = vrsqrt.f32 %v4425_v2  ;;  %v1457_v27 = vadd.f32 %v1449_v20, %v1237_v46  ;;  %v4459_v55 = vadd.f32 %v4246_v56, %v1483_v17  ;;  %vm4463_vm7 = vmor %vm1367_vm6, %vm1368_vm3 }
 0x33e   : > { %v1161_v25 = vmul.f32 %v4421_v37, %v1160_v26  ;;  %3306 = vrsqrt.f32 %v4432_v23  ;;  %vm1166_vm8 = vweird.f32 %v4421_v37  ;;  %vm1165_vm9 = vweird.f32 %v4373_v32 }
 0x33f   : > { %v1374_v11 = vmul.f32 0.5, %v1373_v6  ;;  %3308 = vrsqrt.f32 %v4427_v21  ;;  %1507 = vadd.xlane.f32.xlu1 %v1506_v34  ;;  %v1328_v57 = vpop.xlane.xlu1 %1327  ;;  %1501 = vadd.xlane.f32.xlu2 %v1500_v52  ;;  %v1465_v50 = vmax.f32 %v1457_v27, 0.0  ;;  %v1370_v52 = vsel %vm4463_vm7, %v4369_v54, %v1366_v43  ;;  %vm4504_vm10 = vmor %vm1165_vm9, %vm1166_vm8 }
 0x340   : > { %v1162_v24 = vmul.f32 0.5, %v1161_v25  ;;  %v1116_v58 = vpop.xlane.xlu0 %1115  ;;  %v1325_v28 = vpop.xlane.xlu2 %1324  ;;  %v1340_v47 = vmul.f32 %v1328_v57, %v3880_v44  ;;  %v1432_v43 = vmul.f32 %v1370_v52, %v4152_v49  ;;  %vm1378_vm11 = vweird.f32 %v4410_v9 }
 0x341   : > { %v1128_v31 = vmul.f32 %v1116_v58, %v3880_v44  ;;  %v1339_v34 = vmul.f32 %v1325_v28, %v3880_v44  ;;  %v1158_v28 = vsel %vm4451_vm5, %v4358_v41, %v1154_v1  ;;  %v1375_v17 = vsub.f32 1.5, %v1374_v11  ;;  %3145 = vmatmul.msk.f32.vlgmr.msrb.gmra.mxu2 %vm5505_vm0, %v1465_v50 }
 0x342   : > { %v1163_v22 = vsub.f32 1.5, %v1162_v24  ;;  %v4468_v46 = vadd.f32 1e-05, %v1340_v47  ;;  %v1512_v11 = vsel %vm5505_vm0, %v4459_v55, 0.0  ;;  %v1220_v1 = vmul.f32 %v1158_v28, %v4149_v12 }
 0x343   : > { %v4470_v6 = vpop.eup %3304  ;;  %v4478_v25 = vadd.f32 1e-05, %v1128_v31  ;;  %v4485_v47 = vadd.f32 1e-05, %v1339_v34  ;;  %v1376_v31 = vmul.f32 %v4410_v9, %v1375_v17  ;;  %v1509_v12 = vsel %vm5505_vm0, %v4419_v3, 0.0 }
 0x344   : > { %v4480_v57 = vpop.eup %3306  ;;  %v1164_v24 = vmul.f32 %v4421_v37, %v1163_v22  ;;  %v1382_v27 = vmul.f32 %v4470_v6, %v4425_v2  ;;  %3310 = vrsqrt.f32 %v4468_v46  ;;  %v718_v52 = vmul.f32 %v3686_v45, %v3798_v14 }
 0x345   : > { %v4489_v41 = vpop.eup %3308  ;;  %v1170_v54 = vmul.f32 %v4480_v57, %v4432_v23  ;;  %3312 = vrsqrt.f32 %v4478_v25  ;;  %vm1377_vm12 = vweird.f32 %v4366_v7  ;;  %vm1175_vm14 = vweird.f32 %v4432_v23 }
 0x346   : > { %v1383_v58 = vmul.f32 %v4470_v6, %v1382_v27  ;;  %v1180_v26 = vmul.f32 %v4489_v41, %v4427_v21  ;;  %v1168_v49 = vsel %vm4504_vm10, %v4421_v37, %v1164_v24  ;;  %3314 = vrsqrt.f32 %v4485_v47  ;;  %vm4532_vm13 = vmor %vm1377_vm12, %vm1378_vm11 }
 0x347   : > { %v1171_v34 = vmul.f32 %v4480_v57, %v1170_v54  ;;  %1513 = vadd.xlane.f32.xlu1 %v1512_v11  ;;  %1510 = vadd.xlane.f32.xlu2 %v1509_v12  ;;  %v1229_v24 = vmul.f32 %v4380_v59, %v1220_v1  ;;  %v1221_v32 = vmul.f32 %v1168_v49, %v4167_v18  ;;  %vm1176_vm15 = vweird.f32 %v4480_v57 }
 0x348   : > { %v1384_v20 = vmul.f32 0.5, %v1383_v58  ;;  %v1181_v22 = vmul.f32 %v4489_v41, %v1180_v26  ;;  %v1119_v50 = vpop.xlane.xlu2 %1118  ;;  %v1331_v28 = vpop.xlane.xlu0 %1330  ;;  %v1441_v58 = vmul.f32 %v4378_v29, %v1432_v43  ;;  %v1380_v1 = vsel %vm4532_vm13, %v4410_v9, %v1376_v31  ;;  %vm4559_vm3 = vmor %vm1175_vm14, %vm1176_vm15 }
 0x349   : > { %v1172_v17 = vmul.f32 0.5, %v1171_v34  ;;  %v1129_v27 = vmul.f32 %v1119_v50, %v3880_v44  ;;  %v1341_v37 = vmul.f32 %v1331_v28, %v3880_v44  ;;  %vm1388_vm1 = vweird.f32 %v4470_v6 }
 0x34a   : > { %v4522_v54 = vpop.eup %3310  ;;  %v1385_v11 = vsub.f32 1.5, %v1384_v20  ;;  %v1182_v43 = vmul.f32 0.5, %v1181_v22  ;;  %v1238_v9 = vadd.f32 %v4394_v39, %v1229_v24  ;;  %v1450_v31 = vadd.f32 %v4405_v13, %v1441_v58 }
 0x34b   : > { %v4527_v26 = vpop.eup %3312  ;;  %v1173_v7 = vsub.f32 1.5, %v1172_v17  ;;  %v4537_v34 = vadd.f32 1e-05, %v1129_v27  ;;  %v1402_v50 = vmul.f32 %v4522_v54, %v4468_v46  ;;  %v4551_v28 = vadd.f32 1e-05, %v1341_v37 }
 0x34c   : > { %v1190_v18 = vmul.f32 %v4527_v26, %v4478_v25  ;;  %v1386_v12 = vmul.f32 %v4470_v6, %v1385_v11  ;;  %v3315_v20 = vpop.eup %3314  ;;  %v1433_v22 = vmul.f32 %v1380_v1, %v4170_v35  ;;  %vm1387_vm2 = vweird.f32 %v4425_v2 }
 0x34d   : > { %v1174_v49 = vmul.f32 %v4480_v57, %v1173_v7  ;;  %3316 = vrsqrt.f32 %v4537_v34  ;;  %v1392_v27 = vmul.f32 %v3315_v20, %v4485_v47  ;;  %v1230_v11 = vmul.f32 %v4380_v59, %v1221_v32  ;;  %vm4565_vm4 = vmor %vm1387_vm2, %vm1388_vm1 }
 0x34e   : > { %v1183_v24 = vsub.f32 1.5, %v1182_v43  ;;  %v1191_v2 = vmul.f32 %v4527_v26, %v1190_v18  ;;  %v1390_v58 = vsel %vm4565_vm4, %v4470_v6, %v1386_v12  ;;  %3318 = vrsqrt.f32 %v4551_v28 }
 0x34f   : > { %v1178_v35 = vsel %vm4559_vm3, %v4480_v57, %v1174_v49  ;;  %v1393_v45 = vmul.f32 %v3315_v20, %v1392_v27  ;;  %v750_v32 = vadd.f32 %v718_v52, %v4414_v63  ;;  %vm1186_vm5 = vweird.f32 %v4489_v41 }
 0x350   : > { %v1496_v23 = vpop.xlane.xlu0 %1495  ;;  %v1403_v7 = vmul.f32 %v4522_v54, %v1402_v50  ;;  %v1458_v1 = vadd.f32 %v1450_v31, %v1238_v9  ;;  %v1222_v18 = vmul.f32 %v1178_v35, %v4193_v51  ;;  %v1239_v17 = vadd.f32 %v4394_v39, %v1230_v11 }
 0x351   : > { %v1518_v57 = vmul.f32 %v1496_v23, %v3880_v44  ;;  %v1394_v49 = vmul.f32 0.5, %v1393_v45  ;;  %v1442_v6 = vmul.f32 %v4378_v29, %v1433_v22  ;;  %v1434_v12 = vmul.f32 %v1390_v58, %v4187_v38 }
 0x352   : > { %v1184_v63 = vmul.f32 %v4489_v41, %v1183_v24  ;;  %v1192_v52 = vmul.f32 0.5, %v1191_v2  ;;  %vm1398_vm6 = vweird.f32 %v3315_v20  ;;  %v1466_v50 = vmax.f32 %v1458_v1, 0.0 }
 0x353   : > { %v4581_v43 = vpop.eup %3316  ;;  %v1395_v27 = vsub.f32 1.5, %v1394_v49  ;;  %v4589_v9 = vsub.f32 %v4256_v53, %v1518_v57  ;;  %v1451_v31 = vadd.f32 %v4405_v13, %v1442_v6  ;;  %vm1185_vm7 = vweird.f32 %v4427_v21 }
 0x354   : > { %v1404_v51 = vmul.f32 0.5, %v1403_v7  ;;  %v1200_v11 = vmul.f32 %v4581_v43, %v4537_v34  ;;  %v4595_v22 = vpop.eup %3318  ;;  %vm4599_vm8 = vmor %vm1185_vm7, %vm1186_vm5  ;;  %vm1397_vm9 = vweird.f32 %v4485_v47  ;;  %3146 = vmatmul.msk.f32.gmra.mxu2 %vm5505_vm0, %v1466_v50  ;;  %v1231_v21 = vmul.f32 %v4380_v59, %v1222_v18 }
 0x355   : > { %v1396_v37 = vmul.f32 %v3315_v20, %v1395_v27  ;;  %v1459_v53 = vadd.f32 %v1451_v31, %v1239_v17  ;;  %vm1399_vm10 = vmor %vm1397_vm9, %vm1398_vm6  ;;  %v1412_v35 = vmul.f32 %v4595_v22, %v4551_v28  ;;  %v1534_v24 = vmul.f32 %v4589_v9, %v4589_v9 }
 0x356   : > { %v1484_v2 = vadd.f32 %v4230_v61, %v750_v32  ;;  %v1188_v23 = vsel %vm4599_vm8, %v4489_v41, %v1184_v63  ;;  %v1193_v47 = vsub.f32 1.5, %v1192_v52  ;;  %v1443_v45 = vmul.f32 %v4378_v29, %v1434_v12 }
 0x357   : > { %v1400_v58 = vsel %vm1399_vm10, %v3315_v20, %v1396_v37  ;;  %v1405_v7 = vsub.f32 1.5, %v1404_v51  ;;  %v1201_v1 = vmul.f32 %v4581_v43, %v1200_v11  ;;  %v1413_v57 = vmul.f32 %v4595_v22, %v1412_v35 }
 0x358   : > { %v1542_v18 = vsel %vm5505_vm0, %v1534_v24, 0.0  ;;  %v1435_v49 = vmul.f32 %v1400_v58, %v4214_v19  ;;  %v1467_v17 = vmax.f32 %v1459_v53, 0.0  ;;  %v1240_v61 = vadd.f32 %v4394_v39, %v1231_v21 }
 0x359   : > { %1543 = vadd.xlane.f32.xlu0 %v1542_v18  ;;  %v1452_v32 = vadd.f32 %v4405_v13, %v1443_v45  ;;  %v1223_v41 = vmul.f32 %v1188_v23, %v4190_v42  ;;  %vm1196_vm11 = vweird.f32 %v4527_v26  ;;  %vm1408_vm12 = vweird.f32 %v4522_v54 }
 0x35a   : > { %v4626_v20 = vadd.f32 %v4246_v56, %v1484_v2  ;;  %v1194_v6 = vmul.f32 %v4527_v26, %v1193_v47  ;;  %v1406_v12 = vmul.f32 %v4522_v54, %v1405_v7  ;;  %v1202_v19 = vmul.f32 0.5, %v1201_v1 }
 0x35b   : > { %v1414_v63 = vmul.f32 0.5, %v1413_v57  ;;  %vm1407_vm13 = vweird.f32 %v4468_v46  ;;  %v1460_v52 = vadd.f32 %v1452_v32, %v1240_v61  ;;  %v1444_v42 = vmul.f32 %v4378_v29, %v1435_v49 }
 0x35c   : > { %3147 = vmatmul.msk.f32.gmra.mxu2 %vm5505_vm0, %v1467_v17  ;;  %vm1195_vm14 = vweird.f32 %v4478_v25  ;;  %vm1409_vm15 = vmor %vm1407_vm13, %vm1408_vm12  ;;  %v1515_v56 = vsel %vm5505_vm0, %v4626_v20, 0.0  ;;  %v1232_v27 = vmul.f32 %v4380_v59, %v1223_v41  ;;  %v1203_v51 = vsub.f32 1.5, %v1202_v19  ;;  %v1505_v17 = vpop.xlane.xlu0 %1504 }
 0x35d   : > { %vm1197_vm1 = vmor %vm1195_vm14, %vm1196_vm11  ;;  %v1410_v31 = vsel %vm1409_vm15, %v4522_v54, %v1406_v12  ;;  %v1415_v46 = vsub.f32 1.5, %v1414_v63  ;;  %v1468_v11 = vmax.f32 %v1460_v52, 0.0  ;;  %v1453_v38 = vadd.f32 %v4405_v13, %v1444_v42 }
 0x35e   : > { %v1198_v50 = vsel %vm1197_vm1, %v4527_v26, %v1194_v6  ;;  %v1436_v25 = vmul.f32 %v1410_v31, %v4211_v60  ;;  %vm1206_vm2 = vweird.f32 %v4581_v43  ;;  %v1241_v53 = vadd.f32 %v4394_v39, %v1232_v27 }
 0x35f   : > { %v1224_v37 = vmul.f32 %v1198_v50, %v4208_v0  ;;  %v1204_v21 = vmul.f32 %v4581_v43, %v1203_v51  ;;  %v1416_v26 = vmul.f32 %v4595_v22, %v1415_v46  ;;  %vm1418_vm3 = vweird.f32 %v4595_v22 }
 0x360   : > { %vm1205_vm4 = vweird.f32 %v4537_v34  ;;  %v1461_v54 = vadd.f32 %v1453_v38, %v1241_v53  ;;  %vm1417_vm6 = vweird.f32 %v4551_v28  ;;  %v1445_v60 = vmul.f32 %v4378_v29, %v1436_v25 }
 0x361   : > { %1516 = vadd.xlane.f32.xlu0 %v1515_v56  ;;  %vm1207_vm5 = vmor %vm1205_vm4, %vm1206_vm2  ;;  %v1233_v0 = vmul.f32 %v4380_v59, %v1224_v37  ;;  %v1521_v12 = vmul.f32 %v1505_v17, %v3880_v44 }
 0x362   : > { %vm1419_vm7 = vmor %vm1417_vm6, %vm1418_vm3  ;;  %v1208_v35 = vsel %vm1207_vm5, %v4581_v43, %v1204_v21  ;;  %v1469_v2 = vmax.f32 %v1461_v54, 0.0  ;;  %v1454_v58 = vadd.f32 %v4405_v13, %v1445_v60 }
 0x363   : > { %v1420_v24 = vsel %vm1419_vm7, %v4595_v22, %v1416_v26  ;;  %v1225_v23 = vmul.f32 %v1208_v35, %v4228_v48  ;;  %v1242_v47 = vadd.f32 %v4394_v39, %v1233_v0  ;;  %v4675_v50 = vsub.f32 %v4262_v4, %v1521_v12 }
 0x364   : > { %3148 = vmatmul.msk.f32.gmra.mxu2 %vm5505_vm0, %v1468_v11  ;;  %v1437_v34 = vmul.f32 %v1420_v24, %v4233_v15 }
 0x365   : > { %v1462_v28 = vadd.f32 %v1454_v58, %v1242_v47  ;;  %v1234_v45 = vmul.f32 %v4380_v59, %v1225_v23  ;;  %v1537_v53 = vmul.f32 %v4675_v50, %v4675_v50  ;;  %v4696_v58 = vpop.f32.mrf.mxu2 }
 0x366   : > { %v1446_v7 = vmul.f32 %v4378_v29, %v1437_v34 }
 0x367   : > { %v1470_v1 = vmax.f32 %v1462_v28, 0.0  ;;  %v1243_v43 = vadd.f32 %v4394_v39, %v1234_v45  ;;  %v1551_v35 = vsel %vm5505_vm0, %v1537_v53, 0.0 }
 0x368   : > { %v1455_v22 = vadd.f32 %v4405_v13, %v1446_v7 }
 0x36a   : > { %v1463_v48 = vadd.f32 %v1455_v22, %v1243_v43 }
 0x36c   : > { %3149 = vmatmul.msk.f32.gmra.mxu2 %vm5505_vm0, %v1469_v2  ;;  %v1471_v15 = vmax.f32 %v1463_v48, 0.0 }
 0x374   : > { %3150 = vmatmul.msk.f32.gmra.mxu2 %vm5505_vm0, %v1470_v1 }
 0x37c   : > { %3151 = vmatmul.msk.f32.gmra.mxu2 %vm5505_vm0, %v1471_v15 }
 0x3a2   : > { %v1122_v57 = vpop.xlane.xlu1 %1121 }
 0x3a3   : > { %v1130_v18 = vmul.f32 %v1122_v57, %v3880_v44 }
 0x3a5   : > { %v1138_v49 = vadd.f32 1e-05, %v1130_v18 }
 0x3a7   : > { %3320 = vrsqrt.f32 %v1138_v49  ;;  %vm1215_vm9 = vweird.f32 %v1138_v49 }
 0x3aa   : > { %v1499_v61 = vpop.xlane.xlu1 %1498  ;;  %v1334_v41 = vpop.xlane.xlu2 %1333 }
 0x3ab   : > { %v1519_v32 = vmul.f32 %v1499_v61, %v3880_v44  ;;  %v1342_v19 = vmul.f32 %v1334_v41, %v3880_v44  ;;  %v4715_v61 = vpop.f32.mrf.mxu2 }
 0x3ad   : > { %v3321_v6 = vpop.eup %3320  ;;  %v4670_v63 = vsub.f32 %v4329_v33, %v1519_v32  ;;  %v1350_v42 = vadd.f32 1e-05, %v1342_v19  ;;  %v1700_v19 = vld [vmem:[#allocation2 + $0x38] sm:$0xff] }
 0x3ae   : > { %v1210_v52 = vmul.f32 %v3321_v6, %v1138_v49  ;;  %vm1216_vm8 = vweird.f32 %v3321_v6 }
 0x3af   : > { %v1535_v56 = vmul.f32 %v4670_v63, %v4670_v63  ;;  %3322 = vrsqrt.f32 %v1350_v42  ;;  %vm1217_vm10 = vmor %vm1215_vm9, %vm1216_vm8  ;;  %vm1427_vm12 = vweird.f32 %v1350_v42 }
 0x3b0   : > { %v1211_v27 = vmul.f32 %v3321_v6, %v1210_v52 }
 0x3b1   : > { %v1545_v31 = vsel %vm5505_vm0, %v1535_v56, 0.0 }
 0x3b2   : > { %v1212_v51 = vmul.f32 0.5, %v1211_v27  ;;  %1546 = vadd.xlane.f32.xlu2 %v1545_v31  ;;  %v1508_v46 = vpop.xlane.xlu1 %1507  ;;  %v1502_v33 = vpop.xlane.xlu2 %1501  ;;  %v1699_v27 = vld [vmem:[#allocation2 + $0x30] sm:$0xff]  ;;  %v1698_v31 = vld [vmem:[#allocation2 + $0x28] sm:$0xff] }
 0x3b3   : > { %v1522_v11 = vmul.f32 %v1508_v46, %v3880_v44  ;;  %v1520_v37 = vmul.f32 %v1502_v33, %v3880_v44 }
 0x3b4   : > { %v1213_v38 = vsub.f32 1.5, %v1212_v51  ;;  %v1697_v51 = vld [vmem:[#allocation2 + $0x20] sm:$0xff] }
 0x3b5   : > { %v4681_v25 = vsub.f32 %v4344_v40, %v1522_v11  ;;  %v3323_v4 = vpop.eup %3322  ;;  %v4686_v21 = vsub.f32 %v4397_v16, %v1520_v37 }
 0x3b6   : > { %v1214_v54 = vmul.f32 %v3321_v6, %v1213_v38  ;;  %v1422_v0 = vmul.f32 %v3323_v4, %v1350_v42  ;;  %vm1428_vm11 = vweird.f32 %v3323_v4 }
 0x3b7   : > { %v1538_v26 = vmul.f32 %v4681_v25, %v4681_v25  ;;  %v1536_v60 = vmul.f32 %v4686_v21, %v4686_v21  ;;  %vm1429_vm13 = vmor %vm1427_vm12, %vm1428_vm11 }
 0x3b8   : > { %v1423_v24 = vmul.f32 %v3323_v4, %v1422_v0  ;;  %v1218_v34 = vsel %vm1217_vm10, %v3321_v6, %v1214_v54  ;;  %v390_v6 = vld [vmem:[%s5482_s2 + $0xe8] sm:$0xff] }
 0x3b9   : > { %v1554_v40 = vsel %vm5505_vm0, %v1538_v26, 0.0  ;;  %v1548_v16 = vsel %vm5505_vm0, %v1536_v60, 0.0  ;;  %v1226_v43 = vmul.f32 %v1218_v34, %v4317_v30  ;;  %509 = vmatpush.msra.mxu1 %v390_v6 }
 0x3ba   : > { %1552 = vadd.xlane.f32.xlu2 %v1551_v35  ;;  %1555 = vadd.xlane.f32.xlu0 %v1554_v40  ;;  %v1514_v2 = vpop.xlane.xlu1 %1513  ;;  %v1424_v47 = vmul.f32 0.5, %v1423_v24  ;;  %v1511_v28 = vpop.xlane.xlu2 %1510  ;;  %v4747_v40 = vperm.slane %v4238_v8, 1 }
 0x3bb   : > { %v1524_v23 = vmul.f32 %v1514_v2, %v3880_v44  ;;  %1549 = vadd.xlane.f32.xlu1 %v1548_v16  ;;  %v1523_v45 = vmul.f32 %v1511_v28, %v3880_v44  ;;  %v4751_v2 = vperm.slane %v4238_v8, 2  ;;  %v4756_v28 = vld [vmem:[#allocation4 + $0x80] ss:$0 sm:$0xff] }
 0x3bc   : > { %v1425_v1 = vsub.f32 1.5, %v1424_v47 }
 0x3bd   : > { %v4700_v7 = vsub.f32 %v4459_v55, %v1524_v23  ;;  %v4704_v22 = vsub.f32 %v4419_v3, %v1523_v45  ;;  %v1235_v3 = vmul.f32 %v4380_v59, %v1226_v43 }
 0x3be   : > { %v1426_v15 = vmul.f32 %v3323_v4, %v1425_v1 }
 0x3bf   : > { %v1540_v48 = vmul.f32 %v4700_v7, %v4700_v7  ;;  %v1539_v57 = vmul.f32 %v4704_v22, %v4704_v22  ;;  %v1244_v32 = vadd.f32 %v4394_v39, %v1235_v3  ;;  %v366_v39 = vld [vmem:[%s5482_s2 + $0x28] sm:$0xff]  ;;  %v4768_v3 = vperm.slane %v4238_v8, 6 }
 0x3c0   : > { %v1430_v55 = vsel %vm1429_vm13, %v3323_v4, %v1426_v15 }
 0x3c1   : > { %v1560_v18 = vsel %vm5505_vm0, %v1540_v48, 0.0  ;;  %v1438_v49 = vmul.f32 %v1430_v55, %v4364_v10  ;;  %v1557_v30 = vsel %vm5505_vm0, %v1539_v57, 0.0  ;;  %v382_v10 = vld [vmem:[%s5482_s2 + $0xa8] sm:$0xff]  ;;  %v474_v55 = vpop.f32.mrf.mxu1 }
 0x3c2   : > { %1561 = vadd.xlane.f32.xlu2 %v1560_v18  ;;  %510 = vmatpush.msra.mxu1 %v382_v10 }
 0x3c3   : > { %1558 = vadd.xlane.f32.xlu1 %v1557_v30  ;;  %v1447_v17 = vmul.f32 %v4378_v29, %v1438_v49  ;;  %v374_v29 = vld [vmem:[%s5482_s2 + $0x68] sm:$0xff]  ;;  %v4763_v49 = vperm.slane %v474_v55, 0 }
 0x3c4   : > { %511 = vmatpush.msra.mxu1 %v374_v29  ;;  %v4733_v42 = vpop.f32.mrf.mxu2 }
 0x3c5   : > { %v1456_v41 = vadd.f32 %v4405_v13, %v1447_v17  ;;  %v1962_v30 = vadd.f32 %v4763_v49, %v3727_v5 }
 0x3c6   : > { %512 = vmatpush.msra.mxu1 %v366_v39 }
 0x3c7   : > { %v1464_v12 = vadd.f32 %v1456_v41, %v1244_v32  ;;  %3124 = vmatmul.msk.f32.vlgmr.msra.gmra.mxu1 %vm5505_vm0, %v4282_v36  ;;  %v4771_v17 = vadd.f32 %v4768_v3, %v1962_v30 }
 0x3c8   : > { %1738 = vmatpush.msrb.mxu1 %v1700_v19 }
 0x3c9   : > { %v1472_v59 = vmax.f32 %v1464_v12, 0.0  ;;  %v1979_v41 = vsel %vm5505_vm0, %v4771_v17, 0.0 }
 0x3ca   : > { %1739 = vmatpush.msrb.mxu1 %v1699_v27 }
 0x3cb   : > { %3152 = vmatmul.msk.f32.gmra.mxu2 %vm5505_vm0, %v1472_v59 }
 0x3cc   : > { %v1544_v13 = vpop.xlane.xlu0 %1543  ;;  %1740 = vmatpush.msrb.mxu1 %v1698_v31 }
 0x3cd   : > { %v1566_v52 = vmul.f32 %v1544_v13, %v3880_v44 }
 0x3ce   : > { %1741 = vmatpush.msrb.mxu1 %v1697_v51 }
 0x3cf   : > { %v1574_v56 = vadd.f32 1e-05, %v1566_v52 }
 0x3d1   : > { %3324 = vrsqrt.f32 %v1574_v56  ;;  %vm1588_vm15 = vweird.f32 %v1574_v56 }
 0x3d4   : > { %v1517_v46 = vpop.xlane.xlu0 %1516 }
 0x3d5   : > { %v1525_v11 = vmul.f32 %v1517_v46, %v3880_v44 }
 0x3d7   : > { %v3325_v38 = vpop.eup %3324  ;;  %v4739_v33 = vsub.f32 %v4626_v20, %v1525_v11  ;;  %v2238_v53 = vpop.f32.mrf.mxu2 }
 0x3d8   : > { %v1583_v37 = vmul.f32 %v3325_v38, %v1574_v56  ;;  %vm1589_vm14 = vweird.f32 %v3325_v38  ;;  %v2239_v18 = vadd.f32 %v2238_v53, %v4756_v28 }
 0x3d9   : > { %v1541_v36 = vmul.f32 %v4739_v33, %v4739_v33  ;;  %vm1590_vm1 = vmor %vm1588_vm15, %vm1589_vm14 }
 0x3da   : > { %v1584_v4 = vmul.f32 %v3325_v38, %v1583_v37 }
 0x3db   : > { %v1563_v26 = vsel %vm5505_vm0, %v1541_v36, 0.0 }
 0x3dc   : > { %v1585_v54 = vmul.f32 0.5, %v1584_v4  ;;  %1564 = vadd.xlane.f32.xlu0 %v1563_v26 }
 0x3de   : > { %v1586_v0 = vsub.f32 1.5, %v1585_v54 }
 0x3df   : > { %v4744_v35 = vpop.f32.mrf.mxu2 }
 0x3e0   : > { %v1587_v60 = vmul.f32 %v3325_v38, %v1586_v0 }
 0x3e2   : > { %v1591_v20 = vsel %vm1590_vm1, %v3325_v38, %v1587_v60 }
 0x3e3   : > { %v1662_v24 = vmul.f32 %v1591_v20, %v4589_v9 }
 0x3e5   : > { %v1671_v16 = vmul.f32 %v4747_v40, %v1662_v24 }
 0x3e7   : > { %v1680_v23 = vadd.f32 %v4751_v2, %v1671_v16  ;;  %v2244_v34 = vpop.f32.mrf.mxu2 }
 0x3e8   : > { %v2245_v57 = vadd.f32 %v2244_v34, %v4756_v28 }
 0x3e9   : > { %v1688_v47 = vmax.f32 %v1680_v23, 0.0 }
 0x3eb   : > { %3137 = vmatmul.msk.f32.vlgmr.msrb.gmra.mxu1 %vm5505_vm0, %v1688_v47 }
 0x3ef   : > { %v2247_v45 = vpop.f32.mrf.mxu2 }
 0x3f0   : > { %v2248_v1 = vadd.f32 %v2247_v45, %v4756_v28 }
 0x3f2   : > { %2386 = vperm.xlu1 %3266, %v2248_v1  }
 0x3f7   : > { %v2250_v43 = vpop.f32.mrf.mxu2 }
 0x3f8   : > { %v2251_v9 = vadd.f32 %v2250_v43, %v4756_v28 }
 0x3fa   : > { %2391 = vperm.xlu0 %3265, %v2251_v9  }
 0x3ff   : > { %v2253_v48 = vpop.f32.mrf.mxu2 }
 0x400   : > { %v2254_v15 = vadd.f32 %v2253_v48, %v4756_v28 }
 0x402   : > { %2396 = vperm.xlu2 %3267, %v2254_v15  }
 0x40a   : > { %2381 = vperm.xlu2 %3267, %v2245_v57  }
 0x412   : > { %2371 = vperm.xlu2 %3267, %v2239_v18  }
 0x424   : > { %1980 = vadd.xlane.f32.xlu0 %v1979_v41 }
 0x425   : > { %v1547_v32 = vpop.xlane.xlu2 %1546 }
 0x426   : > { %v1567_v6 = vmul.f32 %v1547_v32, %v3880_v44 }
 0x428   : > { %v1575_v12 = vadd.f32 1e-05, %v1567_v6 }
 0x42a   : > { %3326 = vrsqrt.f32 %v1575_v12  ;;  %vm1598_vm3 = vweird.f32 %v1575_v12 }
 0x42d   : > { %v1553_v10 = vpop.xlane.xlu2 %1552  ;;  %v1556_v59 = vpop.xlane.xlu0 %1555 }
 0x42e   : > { %v1569_v29 = vmul.f32 %v1553_v10, %v3880_v44  ;;  %v1570_v5 = vmul.f32 %v1556_v59, %v3880_v44  ;;  %v1550_v8 = vpop.xlane.xlu1 %1549 }
 0x42f   : > { %v1568_v52 = vmul.f32 %v1550_v8, %v3880_v44 }
 0x430   : > { %v3327_v39 = vpop.eup %3326  ;;  %v1577_v13 = vadd.f32 1e-05, %v1569_v29  ;;  %v4778_v19 = vadd.f32 1e-05, %v1570_v5 }
 0x431   : > { %v1593_v56 = vmul.f32 %v3327_v39, %v1575_v12  ;;  %v1576_v27 = vadd.f32 1e-05, %v1568_v52  ;;  %vm1599_vm2 = vweird.f32 %v3327_v39 }
 0x432   : > { %3328 = vrsqrt.f32 %v1577_v13  ;;  %vm1600_vm4 = vmor %vm1598_vm3, %vm1599_vm2  ;;  %vm1618_vm7 = vweird.f32 %v1577_v13  ;;  %vm1628_vm12 = vweird.f32 %v4778_v19 }
 0x433   : > { %v1594_v31 = vmul.f32 %v3327_v39, %v1593_v56  ;;  %3330 = vrsqrt.f32 %v4778_v19  ;;  %vm1608_vm9 = vweird.f32 %v1576_v27 }
 0x434   : > { %3332 = vrsqrt.f32 %v1576_v27 }
 0x435   : > { %v1595_v51 = vmul.f32 0.5, %v1594_v31  ;;  %v1562_v46 = vpop.xlane.xlu2 %1561 }
 0x436   : > { %v1559_v38 = vpop.xlane.xlu1 %1558  ;;  %v1572_v53 = vmul.f32 %v1562_v46, %v3880_v44 }
 0x437   : > { %v1596_v11 = vsub.f32 1.5, %v1595_v51  ;;  %v1571_v36 = vmul.f32 %v1559_v38, %v3880_v44 }
 0x438   : > { %v3329_v37 = vpop.eup %3328  ;;  %v4785_v23 = vadd.f32 1e-05, %v1572_v53 }
 0x439   : > { %v3331_v4 = vpop.eup %3330  ;;  %v1597_v26 = vmul.f32 %v3327_v39, %v1596_v11  ;;  %v1613_v54 = vmul.f32 %v3329_v37, %v1577_v13  ;;  %v1579_v34 = vadd.f32 1e-05, %v1571_v36  ;;  %vm1619_vm5 = vweird.f32 %v3329_v37 }
 0x43a   : > { %v3333_v0 = vpop.eup %3332  ;;  %v1623_v60 = vmul.f32 %v3331_v4, %v4778_v19  ;;  %vm1620_vm8 = vmor %vm1618_vm7, %vm1619_vm5  ;;  %vm1629_vm11 = vweird.f32 %v3331_v4  ;;  %vm1648_vm3 = vweird.f32 %v4785_v23 }
 0x43b   : > { %v1601_v20 = vsel %vm1600_vm4, %v3327_v39, %v1597_v26  ;;  %v1614_v24 = vmul.f32 %v3329_v37, %v1613_v54  ;;  %v1603_v16 = vmul.f32 %v3333_v0, %v1576_v27  ;;  %3334 = vrsqrt.f32 %v1579_v34  ;;  %vm1630_vm13 = vmor %vm1628_vm12, %vm1629_vm11 }
 0x43c   : > { %v1663_v47 = vmul.f32 %v1601_v20, %v4670_v63  ;;  %v1624_v1 = vmul.f32 %v3331_v4, %v1623_v60  ;;  %3336 = vrsqrt.f32 %v4785_v23  ;;  %vm1609_vm6 = vweird.f32 %v3333_v0 }
 0x43d   : > { %v1615_v45 = vmul.f32 0.5, %v1614_v24  ;;  %v1604_v43 = vmul.f32 %v3333_v0, %v1603_v16  ;;  %vm1610_vm10 = vmor %vm1608_vm9, %vm1609_vm6  ;;  %vm1638_vm15 = vweird.f32 %v1579_v34 }
 0x43e   : > { %v1672_v9 = vmul.f32 %v4747_v40, %v1663_v47  ;;  %v1625_v55 = vmul.f32 0.5, %v1624_v1 }
 0x43f   : > { %v1616_v48 = vsub.f32 1.5, %v1615_v45  ;;  %v1605_v15 = vmul.f32 0.5, %v1604_v43  ;;  %v2242_v45 = vadd.f32 %v4744_v35, %v4756_v28 }
 0x440   : > { %v1681_v57 = vadd.f32 %v4751_v2, %v1672_v9  ;;  %v1626_v12 = vsub.f32 1.5, %v1625_v55 }
 0x441   : > { %v1617_v18 = vmul.f32 %v3329_v37, %v1616_v48  ;;  %v1606_v30 = vsub.f32 1.5, %v1605_v15  ;;  %v3335_v41 = vpop.eup %3334 }
 0x442   : > { %v1689_v32 = vmax.f32 %v1681_v57, 0.0  ;;  %v1633_v59 = vmul.f32 %v3335_v41, %v1579_v34  ;;  %v3337_v29 = vpop.eup %3336  ;;  %v1627_v52 = vmul.f32 %v3331_v4, %v1626_v12  ;;  %vm1639_vm14 = vweird.f32 %v3335_v41 }
 0x443   : > { %v1607_v63 = vmul.f32 %v3333_v0, %v1606_v30  ;;  %v1621_v6 = vsel %vm1620_vm8, %v3329_v37, %v1617_v18  ;;  %v1643_v56 = vmul.f32 %v3337_v29, %v4785_v23  ;;  %vm1640_vm1 = vmor %vm1638_vm15, %vm1639_vm14  ;;  %vm1649_vm2 = vweird.f32 %v3337_v29 }
 0x444   : > { %3138 = vmatmul.msk.f32.gmra.mxu1 %vm5505_vm0, %v1689_v32  ;;  %v1634_v8 = vmul.f32 %v3335_v41, %v1633_v59  ;;  %v1665_v13 = vmul.f32 %v1621_v6, %v4675_v50  ;;  %v1631_v11 = vsel %vm1630_vm13, %v3331_v4, %v1627_v52  ;;  %vm1650_vm4 = vmor %vm1648_vm3, %vm1649_vm2  ;;  %v4813_v18 = vpop.f32.mrf.mxu1  ;;  %v2236_v23 = vadd.f32 %v4733_v42, %v4756_v28 }
 0x445   : > { %v1611_v10 = vsel %vm1610_vm10, %v3333_v0, %v1607_v63  ;;  %v1666_v53 = vmul.f32 %v1631_v11, %v4681_v25  ;;  %v5540_v11 = vld [vmem:[#allocation12_spill] sm:$0xff] }
 0x446   : > { %v1664_v5 = vmul.f32 %v1611_v10, %v4686_v21  ;;  %v1635_v27 = vmul.f32 0.5, %v1634_v8  ;;  %v1674_v46 = vmul.f32 %v4747_v40, %v1665_v13  ;;  %v1644_v21 = vmul.f32 %v3337_v29, %v1643_v56 }
 0x447   : > { %v1675_v20 = vmul.f32 %v4747_v40, %v1666_v53  ;;  %v1963_v13 = vadd.f32 %v4763_v49, %v3849_v62 }
 0x448   : > { %v1673_v39 = vmul.f32 %v4747_v40, %v1664_v5  ;;  %v1636_v38 = vsub.f32 1.5, %v1635_v27  ;;  %v1683_v50 = vadd.f32 %v4751_v2, %v1674_v46  ;;  %v1645_v36 = vmul.f32 0.5, %v1644_v21  ;;  %v5539_v46 = vld [vmem:[#allocation8_spill] sm:$0xff]  ;;  %v5541_v21 = vld [vmem:[#allocation9_spill] sm:$0xff] }
 0x449   : > { %v1684_v25 = vadd.f32 %v4751_v2, %v1675_v20  ;;  %v4843_v52 = vadd.f32 %v4768_v3, %v1963_v13 }
 0x44a   : > { %v1682_v31 = vadd.f32 %v4751_v2, %v1673_v39  ;;  %v1637_v26 = vmul.f32 %v3335_v41, %v1636_v38  ;;  %v1691_v60 = vmax.f32 %v1683_v50, 0.0  ;;  %v1646_v24 = vsub.f32 1.5, %v1645_v36  ;;  %v5542_v38 = vld [vmem:[#allocation13_spill] sm:$0xff] }
 0x44b   : > { %v1692_v43 = vmax.f32 %v1684_v25, 0.0  ;;  %v1982_v27 = vsel %vm5505_vm0, %v4843_v52, 0.0 }
 0x44c   : > { %v1690_v51 = vmax.f32 %v1682_v31, 0.0  ;;  %v1641_v16 = vsel %vm1640_vm1, %v3335_v41, %v1637_v26  ;;  %v1647_v1 = vmul.f32 %v3337_v29, %v1646_v24  ;;  %vm2412_vm1 = vcmask 523264  }
 0x44d   : > { %v1667_v47 = vmul.f32 %v1641_v16, %v4704_v22 }
 0x44e   : > { %3139 = vmatmul.msk.f32.gmra.mxu1 %vm5505_vm0, %v1690_v51  ;;  %v2256_v37 = vpop.f32.mrf.mxu2  ;;  %v1651_v48 = vsel %vm1650_vm4, %v3337_v29, %v1647_v1  ;;  %v5538_v29 = vmov 1  }
 0x44f   : > { %v1565_v54 = vpop.xlane.xlu0 %1564  ;;  %v2257_v19 = vadd.f32 %v2256_v37, %v4756_v28  ;;  %v1676_v9 = vmul.f32 %v4747_v40, %v1667_v47  ;;  %v1668_v35 = vmul.f32 %v1651_v48, %v4700_v7  ;;  %v4824_v7 = vld [vmem:[%s5487_s7 + $0x10] sm:$0xff]  ;;  %v699_v37 = vmul.f32 %v5542_v38, %v5541_v21  ;;  %v5543_v47 = vld [vmem:[#allocation15_spill] sm:$0xff] }
 0x450   : > { %v1573_v0 = vmul.f32 %v1565_v54, %v3880_v44  ;;  %v4827_v42 = vperm.slane %v4824_v7, 3 }
 0x451   : > { %2401 = vperm.xlu1 %3266, %v2257_v19   ;;  %v1685_v22 = vadd.f32 %v4751_v2, %v1676_v9  ;;  %v1677_v63 = vmul.f32 %v4747_v40, %v1668_v35  ;;  %v5544_v9 = vld [vmem:[#allocation10_spill] sm:$0xff] }
 0x452   : > { %v1581_v4 = vadd.f32 1e-05, %v1573_v0  ;;  %v703_v48 = vmul.f32 %v5542_v38, %v5544_v9 }
 0x453   : > { %v1693_v32 = vmax.f32 %v1685_v22, 0.0  ;;  %v1686_v28 = vadd.f32 %v4751_v2, %v1677_v63 }
 0x454   : > { %3338 = vrsqrt.f32 %v1581_v4  ;;  %vm1658_vm6 = vweird.f32 %v1581_v4 }
 0x455   : > { %v1694_v5 = vmax.f32 %v1686_v28, 0.0 }
 0x456   : > { %3140 = vmatmul.msk.f32.gmra.mxu1 %vm5505_vm0, %v1691_v60  ;;  %v5504_v60 = vmov 0.0  }
 0x459   : > { %2376 = vperm.xlu1 %3266, %v2242_v45   ;;  %v627_v45 = vmul.f32 %v5540_v11, %v5543_v47  ;;  %v5546_v47 = vld [vmem:[#allocation18_spill] sm:$0xff] }
 0x45a   : > { %v3339_v34 = vpop.eup %3338 }
 0x45b   : > { %v1653_v15 = vmul.f32 %v3339_v34, %v1581_v4  ;;  %vm1659_vm5 = vweird.f32 %v3339_v34  ;;  %v735_v63 = vadd.f32 %v703_v48, %v627_v45  ;;  %v1966_v45 = vadd.f32 %v4763_v49, %v5546_v47 }
 0x45c   : > { %vm1660_vm7 = vmor %vm1658_vm6, %vm1659_vm5  ;;  %v2397_v51 = vpop.permute.xlu2 %2396 }
 0x45d   : > { %v1654_v57 = vmul.f32 %v3339_v34, %v1653_v15  ;;  %v1965_v13 = vadd.f32 %v4763_v49, %v735_v63 }
 0x45e   : > { %3141 = vmatmul.msk.f32.gmra.mxu1 %vm5505_vm0, %v1692_v43 }
 0x45f   : > { %v1655_v55 = vmul.f32 0.5, %v1654_v57 }
 0x461   : > { %v1656_v30 = vsub.f32 1.5, %v1655_v55  ;;  %2366 = vperm.xlu1 %3266, %v2236_v23  }
 0x463   : > { %v1657_v41 = vmul.f32 %v3339_v34, %v1656_v30 }
 0x464   : > { %v2387_v50 = vpop.permute.xlu1 %2386 }
 0x465   : > { %v1661_v6 = vsel %vm1660_vm7, %v3339_v34, %v1657_v41  ;;  %v2382_v34 = vpop.permute.xlu2 %2381 }
 0x466   : > { %3142 = vmatmul.msk.f32.gmra.mxu1 %vm5505_vm0, %v1693_v32  ;;  %v1669_v12 = vmul.f32 %v1661_v6, %v4739_v33 }
 0x468   : > { %v1743_v10 = vpop.f32.mrf.mxu1  ;;  %v1678_v8 = vmul.f32 %v4747_v40, %v1669_v12  ;;  %v2329_v40 = vlaneseq }
 0x469   : > { %v4832_v59 = vadd.f32 %v1743_v10, %v4827_v42  ;;  %3268 = vset.pattern.permute.xlu1 %v5538_v29 }
 0x46a   : > { %v1687_v33 = vadd.f32 %v4751_v2, %v1678_v8  ;;  %v4848_v31 = vshrl.u32 %v2329_v40, 7  ;;  %v623_v2 = vmul.f32 %v5540_v11, %v5539_v46  ;;  %v4860_v36 = vand.u32 127, %v2329_v40 }
 0x46b   : > { %v1767_v39 = vsel %vm5505_vm0, %v4832_v59, 0.0  ;;  %v4942_v46 = vadd.f32 %v4768_v3, %v1965_v13  ;;  %v5548_v13 = vld [vmem:[#allocation14_spill] sm:$0xff] }
 0x46c   : > { %1768 = vadd.xlane.f32.xlu2 %v1767_v39  ;;  %v1695_v56 = vmax.f32 %v1687_v33, 0.0  ;;  %v4851_v62 = vadd.s32 56, %v4848_v31  ;;  %v4858_v53 = vadd.s32 48, %v4848_v31  ;;  %v4863_v26 = vadd.s32 40, %v4848_v31  ;;  %v2392_v35 = vpop.permute.xlu0 %2391 }
 0x46d   : > { %v731_v54 = vadd.f32 %v699_v37, %v623_v2  ;;  %v4870_v0 = vadd.s32 32, %v4848_v31  ;;  %v4879_v24 = vadd.s32 24, %v4848_v31  ;;  %v4897_v57 = vadd.s32 16, %v4848_v31  ;;  %v2372_v40 = vpop.permute.xlu2 %2371 }
 0x46e   : > { %3143 = vmatmul.msk.f32.gmra.mxu1 %vm5505_vm0, %v1694_v5  ;;  %vm2347_vm8 = vcmp.eq.s32.totalorder %v4851_v62, %v4860_v36  ;;  %vm2346_vm9 = vcmp.eq.s32.totalorder %v4858_v53, %v4860_v36  ;;  %vm2345_vm10 = vcmp.eq.s32.totalorder %v4863_v26, %v4860_v36  ;;  %v4906_v55 = vadd.s32 8, %v4848_v31 }
 0x46f   : > { %v4876_v20 = vsel %vm2347_vm8, 1.0, %v5504_v60  ;;  %v1964_v25 = vadd.f32 %v4763_v49, %v731_v54  ;;  %v4889_v1 = vsel %vm2346_vm9, 1.0, %v5504_v60  ;;  %vm2344_vm11 = vcmp.eq.s32.totalorder %v4870_v0, %v4860_v36  ;;  %v5545_v54 = vld [vmem:[#allocation19_spill] sm:$0xff] }
 0x470   : > { %v4900_v22 = vsel %vm2345_vm10, 1.0, %v5504_v60  ;;  %v2410_v23 = vmul.f32 %v4889_v1, %v2397_v51  ;;  %vm2343_vm12 = vcmp.eq.s32.totalorder %v4879_v24, %v4860_v36  ;;  %v4912_v32 = vsel %vm2344_vm11, 1.0, %v5504_v60 }
 0x471   : > { %v4909_v30 = vadd.f32 %v4768_v3, %v1964_v25  ;;  %v2409_v41 = vmul.f32 %v4900_v22, %v2392_v35  ;;  %vm2342_vm13 = vcmp.eq.s32.totalorder %v4897_v57, %v4860_v36  ;;  %v4918_v6 = vsel %vm2343_vm12, 1.0, %v5504_v60 }
 0x472   : > { %v2408_v12 = vmul.f32 %v4912_v32, %v2387_v50  ;;  %vm2341_vm14 = vcmp.eq.s32.totalorder %v4906_v55, %v4860_v36  ;;  %v4929_v8 = vsel %vm2342_vm13, 1.0, %v5504_v60  ;;  %v2407_v33 = vmul.f32 %v4918_v6, %v2382_v34  ;;  %v5547_v34 = vld [vmem:[#allocation11_spill] sm:$0xff] }
 0x473   : > { %v1985_v5 = vsel %vm5505_vm0, %v4909_v30, 0.0  ;;  %vm2340_vm15 = vcmp.eq.s32.totalorder %v4848_v31, %v4860_v36  ;;  %v1988_v25 = vsel %vm5505_vm0, %v4942_v46, 0.0  ;;  %v4965_v35 = vadd.f32 %v4768_v3, %v1966_v45 }
 0x474   : > { %1983 = vadd.xlane.f32.xlu2 %v1982_v27  ;;  %v4936_v27 = vsel %vm2341_vm14, 1.0, %v5504_v60  ;;  %v4946_v37 = vsel %vm2340_vm15, 1.0, %v5504_v60 }
 0x475   : > { %v2405_v2 = vmul.f32 %v4936_v27, %v2372_v40 }
 0x476   : > { %3144 = vmatmul.msk.f32.gmra.mxu1 %vm5505_vm0, %v1695_v56 }
 0x4c1   : > { %v1746_v19 = vpop.f32.mrf.mxu1 }
 0x4c2   : > { %v4873_v4 = vadd.f32 %v1746_v19, %v4827_v42  ;;  %v711_v19 = vmul.f32 %v5542_v38, %v5545_v54 }
 0x4c3   : > { %v2402_v43 = vpop.permute.xlu1 %2401 }
 0x4c4   : > { %v1770_v16 = vsel %vm5505_vm0, %v4873_v4, 0.0  ;;  %v2411_v15 = vmul.f32 %v4876_v20, %v2402_v43  ;;  %v635_v43 = vmul.f32 %v5540_v11, %v5547_v34 }
 0x4c5   : > { %1771 = vadd.xlane.f32.xlu1 %v1770_v16 }
 0x4c6   : > { %2424 = vmatpush.msrb.mxu0 %v2411_v15  ;;  %v3485_v15 = vmov 1.0  }
 0x4c8   : > { %2425 = vmatpush.msrb.mxu0 %v2410_v23  ;;  %v743_v23 = vadd.f32 %v711_v19, %v635_v43 }
 0x4ca   : > { %2426 = vmatpush.msrb.mxu0 %v2409_v41 }
 0x4cb   : > { %v1749_v28 = vpop.f32.mrf.mxu1  ;;  %v2377_v39 = vpop.permute.xlu1 %2376 }
 0x4cc   : > { %v4924_v10 = vadd.f32 %v1749_v28, %v4827_v42  ;;  %2427 = vmatpush.msrb.mxu0 %v2408_v12  ;;  %v2406_v51 = vmul.f32 %v4929_v8, %v2377_v39  ;;  %v1991_v12 = vsel %vm5505_vm0, %v4965_v35, 0.0  ;;  %v1981_v39 = vpop.xlane.xlu0 %1980 }
 0x4cd   : > { %1986 = vadd.xlane.f32.xlu1 %v1985_v5  ;;  %v1967_v5 = vadd.f32 %v4763_v49, %v743_v23 }
 0x4ce   : > { %v1773_v56 = vsel %vm5505_vm0, %v4924_v10, 0.0  ;;  %2428 = vmatpush.msrb.mxu0 %v2407_v33  ;;  %v639_v33 = vmul.f32 %v5540_v11, %v5548_v13 }
 0x4cf   : > { %1774 = vadd.xlane.f32.xlu0 %v1773_v56  ;;  %v5549_v56 = vld [vmem:[#allocation17_spill] sm:$0xff]  ;;  %v4984_v54 = vadd.f32 %v4768_v3, %v1967_v5 }
 0x4d0   : > { %2429 = vmatpush.msrb.mxu0 %v2406_v51  ;;  %v715_v40 = vmul.f32 %v5542_v38, %v5549_v56 }
 0x4d1   : > { %v1994_v34 = vsel %vm5505_vm0, %v4984_v54, 0.0 }
 0x4d2   : > { %2430 = vmatpush.msrb.mxu0 %v2405_v2  ;;  %v2003_v2 = vmul.f32 %v1981_v39, %v3880_v44  ;;  %v747_v47 = vadd.f32 %v715_v40, %v639_v33 }
 0x4d3   : > { %v1752_v21 = vpop.f32.mrf.mxu1  ;;  %v2367_v16 = vpop.permute.xlu1 %2366 }
 0x4d4   : > { %v4949_v50 = vadd.f32 %v1752_v21, %v4827_v42  ;;  %v2404_v9 = vmul.f32 %v4946_v37, %v2367_v16  ;;  %v4993_v45 = vsub.f32 %v4771_v17, %v2003_v2 }
 0x4d6   : > { %v1776_v48 = vsel %vm5505_vm0, %v4949_v50, 0.0  ;;  %2431 = vmatpush.msrb.mxu0 %v2404_v9 }
 0x4d7   : > { %1777 = vadd.xlane.f32.xlu2 %v1776_v48  ;;  %1989 = vadd.xlane.f32.xlu0 %v1988_v25  ;;  %v1968_v48 = vadd.f32 %v4763_v49, %v747_v47  ;;  %v719_v47 = vmul.f32 %v5542_v38, %v3798_v14 }
 0x4d8   : > { %3169 = vmatmul.msk.f32.vlgmr.msrb.gmra.mxu0 %vm2412_vm1, %v3485_v15 }
 0x4d9   : > { %v5012_v5 = vadd.f32 %v4768_v3, %v1968_v48 }
 0x4db   : > { %v1755_v63 = vpop.f32.mrf.mxu1  ;;  %v1997_v56 = vsel %vm5505_vm0, %v5012_v5, 0.0 }
 0x4dc   : > { %v4968_v41 = vadd.f32 %v1755_v63, %v4827_v42  ;;  %v2019_v63 = vmul.f32 %v4993_v45, %v4993_v45 }
 0x4de   : > { %v1779_v28 = vsel %vm5505_vm0, %v4968_v41, 0.0  ;;  %v2027_v33 = vsel %vm5505_vm0, %v2019_v63, 0.0 }
 0x4df   : > { %1780 = vadd.xlane.f32.xlu1 %v1779_v28  ;;  %1992 = vadd.xlane.f32.xlu2 %v1991_v12  ;;  %v1769_v51 = vpop.xlane.xlu2 %1768 }
 0x4e0   : > { %3170 = vmatmul.msk.f32.gmra.mxu0 %vm2412_vm1, %v3485_v15  ;;  %v1791_v21 = vmul.f32 %v1769_v51, %v3880_v44 }
 0x4e2   : > { %v4987_v16 = vsub.f32 %v4832_v59, %v1791_v21 }
 0x4e3   : > { %v1758_v19 = vpop.f32.mrf.mxu1 }
 0x4e4   : > { %v4990_v25 = vadd.f32 %v1758_v19, %v4827_v42  ;;  %v1807_v43 = vmul.f32 %v4987_v16, %v4987_v16 }
 0x4e6   : > { %v1782_v9 = vsel %vm5505_vm0, %v4990_v25, 0.0  ;;  %v1815_v59 = vsel %vm5505_vm0, %v1807_v43, 0.0 }
 0x4e7   : > { %1995 = vadd.xlane.f32.xlu1 %v1994_v34  ;;  %1783 = vadd.xlane.f32.xlu0 %v1782_v9  ;;  %v1984_v23 = vpop.xlane.xlu2 %1983 }
 0x4e8   : > { %1816 = vadd.xlane.f32.xlu2 %v1815_v59  ;;  %3171 = vmatmul.msk.f32.gmra.mxu0 %vm2412_vm1, %v3485_v15  ;;  %v2004_v17 = vmul.f32 %v1984_v23, %v3880_v44 }
 0x4ea   : > { %v5015_v39 = vsub.f32 %v4843_v52, %v2004_v17 }
 0x4eb   : > { %v1761_v28 = vpop.f32.mrf.mxu1 }
 0x4ec   : > { %v5009_v12 = vadd.f32 %v1761_v28, %v4827_v42  ;;  %v2020_v40 = vmul.f32 %v5015_v39, %v5015_v39 }
 0x4ee   : > { %v1785_v13 = vsel %vm5505_vm0, %v5009_v12, 0.0  ;;  %v2030_v21 = vsel %vm5505_vm0, %v2020_v40, 0.0 }
 0x4ef   : > { %1786 = vadd.xlane.f32.xlu1 %v1785_v13  ;;  %2028 = vadd.xlane.f32.xlu0 %v2027_v33 }
 0x4f0   : > { %1998 = vadd.xlane.f32.xlu2 %v1997_v56  ;;  %3172 = vmatmul.msk.f32.gmra.mxu0 %vm2412_vm1, %v3485_v15 }
 0x4f3   : > { %v1764_v51 = vpop.f32.mrf.mxu1 }
 0x4f4   : > { %v5027_v52 = vadd.f32 %v1764_v51, %v4827_v42  ;;  %v5550_v42 = vld [vmem:[#allocation16_spill] sm:$0xff] }
 0x4f5   : > { %v643_v19 = vmul.f32 %v5540_v11, %v5550_v42 }
 0x4f6   : > { %v1788_v2 = vsel %vm5505_vm0, %v5027_v52, 0.0 }
 0x4f7   : > { %2031 = vadd.xlane.f32.xlu1 %v2030_v21  ;;  %v751_v59 = vadd.f32 %v719_v47, %v643_v19 }
 0x4f8   : > { %1789 = vadd.xlane.f32.xlu2 %v1788_v2  ;;  %3173 = vmatmul.msk.f32.gmra.mxu0 %vm2412_vm1, %v3485_v15 }
 0x4f9   : > { %v1969_v17 = vadd.f32 %v4763_v49, %v751_v59 }
 0x500   : > { %3174 = vmatmul.msk.f32.gmra.mxu0 %vm2412_vm1, %v3485_v15 }
 0x508   : > { %3175 = vmatmul.msk.f32.gmra.mxu0 %vm2412_vm1, %v3485_v15 }
 0x510   : > { %3176 = vmatmul.msk.f32.gmra.mxu0 %vm2412_vm1, %v3485_v15 }
 0x538   : > { %v1772_v34 = vpop.xlane.xlu1 %1771 }
 0x539   : > { %v1792_v43 = vmul.f32 %v1772_v34, %v3880_v44 }
 0x53b   : > { %v5046_v9 = vsub.f32 %v4873_v4, %v1792_v43  ;;  %v5058_v4 = vadd.f32 %v4768_v3, %v1969_v17 }
 0x53d   : > { %v1808_v48 = vmul.f32 %v5046_v9, %v5046_v9  ;;  %v2000_v56 = vsel %vm5505_vm0, %v5058_v4, 0.0 }
 0x53f   : > { %v1818_v23 = vsel %vm5505_vm0, %v1808_v48, 0.0 }
 0x540   : > { %1819 = vadd.xlane.f32.xlu0 %v1818_v23  ;;  %v1987_v63 = vpop.xlane.xlu1 %1986 }
 0x541   : > { %v2005_v11 = vmul.f32 %v1987_v63, %v3880_v44 }
 0x542   : > { %v1775_v28 = vpop.xlane.xlu0 %1774 }
 0x543   : > { %v1793_v14 = vmul.f32 %v1775_v28, %v3880_v44  ;;  %v5055_v38 = vsub.f32 %v4909_v30, %v2005_v11 }
 0x545   : > { %v5061_v13 = vsub.f32 %v4924_v10, %v1793_v14  ;;  %v2021_v33 = vmul.f32 %v5055_v38, %v5055_v38 }
 0x547   : > { %v1809_v49 = vmul.f32 %v5061_v13, %v5061_v13  ;;  %v2033_v40 = vsel %vm5505_vm0, %v2021_v33, 0.0 }
 0x548   : > { %2001 = vadd.xlane.f32.xlu0 %v2000_v56  ;;  %2034 = vadd.xlane.f32.xlu2 %v2033_v40 }
 0x549   : > { %v1821_v30 = vsel %vm5505_vm0, %v1809_v49, 0.0 }
 0x54a   : > { %v1778_v3 = vpop.xlane.xlu2 %1777  ;;  %v1990_v51 = vpop.xlane.xlu0 %1989  ;;  %1822 = vadd.xlane.f32.xlu1 %v1821_v30 }
 0x54b   : > { %v1794_v10 = vmul.f32 %v1778_v3, %v3880_v44  ;;  %v2006_v2 = vmul.f32 %v1990_v51, %v3880_v44 }
 0x54d   : > { %v5074_v21 = vsub.f32 %v4949_v50, %v1794_v10  ;;  %v5077_v42 = vsub.f32 %v4942_v46, %v2006_v2 }
 0x54f   : > { %v2022_v19 = vmul.f32 %v5077_v42, %v5077_v42  ;;  %v1810_v47 = vmul.f32 %v5074_v21, %v5074_v21 }
 0x551   : > { %v2036_v34 = vsel %vm5505_vm0, %v2022_v19, 0.0  ;;  %v1824_v43 = vsel %vm5505_vm0, %v1810_v47, 0.0 }
 0x552   : > { %v1993_v59 = vpop.xlane.xlu2 %1992  ;;  %2037 = vadd.xlane.f32.xlu1 %v2036_v34  ;;  %1825 = vadd.xlane.f32.xlu0 %v1824_v43  ;;  %v1781_v48 = vpop.xlane.xlu1 %1780 }
 0x553   : > { %v2007_v50 = vmul.f32 %v1993_v59, %v3880_v44  ;;  %v1795_v23 = vmul.f32 %v1781_v48, %v3880_v44  ;;  %v2262_v59 = vld [vmem:[#allocation4 + $0x68] sm:$0xff] }
 0x554   : > { %v2261_v48 = vld [vmem:[#allocation4 + $0x48] sm:$0xff]  ;;  %2300 = vmatpush.msrb.mxu3 %v2262_v59 }
 0x555   : > { %v5088_v46 = vsub.f32 %v4965_v35, %v2007_v50  ;;  %v5091_v17 = vsub.f32 %v4968_v41, %v1795_v23  ;;  %v5093_v63 = vpop.f32.mrf.mxu0 }
 0x556   : > { %2301 = vmatpush.msrb.mxu3 %v2261_v48 }
 0x557   : > { %v2023_v11 = vmul.f32 %v5088_v46, %v5088_v46  ;;  %v1811_v28 = vmul.f32 %v5091_v17, %v5091_v17 }
 0x559   : > { %v2039_v14 = vsel %vm5505_vm0, %v2023_v11, 0.0  ;;  %v1827_v33 = vsel %vm5505_vm0, %v1811_v28, 0.0  ;;  %v2260_v28 = vld [vmem:[#allocation4 + $0x28] sm:$0xff] }
 0x55a   : > { %v1784_v49 = vpop.xlane.xlu0 %1783  ;;  %2040 = vadd.xlane.f32.xlu0 %v2039_v14  ;;  %1828 = vadd.xlane.f32.xlu2 %v1827_v33  ;;  %v1996_v35 = vpop.xlane.xlu1 %1995 }
 0x55b   : > { %v1796_v56 = vmul.f32 %v1784_v49, %v3880_v44  ;;  %v2008_v41 = vmul.f32 %v1996_v35, %v3880_v44  ;;  %v1817_v40 = vpop.xlane.xlu2 %1816  ;;  %2302 = vmatpush.msrb.mxu3 %v2260_v28 }
 0x55c   : > { %v1839_v30 = vmul.f32 %v1817_v40, %v3880_v44 }
 0x55d   : > { %v5105_v3 = vsub.f32 %v4990_v25, %v1796_v56  ;;  %v5108_v51 = vsub.f32 %v4984_v54, %v2008_v41  ;;  %v5110_v10 = vpop.f32.mrf.mxu0  ;;  %v2259_v56 = vld [vmem:[#allocation4 + $0x8] sm:$0xff] }
 0x55e   : > { %v1847_v2 = vadd.f32 1e-05, %v1839_v30  ;;  %2303 = vmatpush.msrb.mxu3 %v2259_v56 }
 0x55f   : > { %v1812_v19 = vmul.f32 %v5105_v3, %v5105_v3  ;;  %v2024_v47 = vmul.f32 %v5108_v51, %v5108_v51 }
 0x560   : > { %3340 = vrsqrt.f32 %v1847_v2  ;;  %vm1861_vm3 = vweird.f32 %v1847_v2 }
 0x561   : > { %v1830_v34 = vsel %vm5505_vm0, %v1812_v19, 0.0  ;;  %v2042_v43 = vsel %vm5505_vm0, %v2024_v47, 0.0 }
 0x562   : > { %1831 = vadd.xlane.f32.xlu1 %v1830_v34  ;;  %v2029_v25 = vpop.xlane.xlu0 %2028  ;;  %2043 = vadd.xlane.f32.xlu2 %v2042_v43  ;;  %v1787_v54 = vpop.xlane.xlu1 %1786 }
 0x563   : > { %v2051_v50 = vmul.f32 %v2029_v25, %v3880_v44  ;;  %v1797_v23 = vmul.f32 %v1787_v54, %v3880_v44  ;;  %v1999_v11 = vpop.xlane.xlu2 %1998 }
 0x564   : > { %v2009_v14 = vmul.f32 %v1999_v11, %v3880_v44 }
 0x565   : > { %v2059_v33 = vadd.f32 1e-05, %v2051_v50  ;;  %v5122_v49 = vsub.f32 %v5009_v12, %v1797_v23  ;;  %v5124_v35 = vpop.f32.mrf.mxu0 }
 0x566   : > { %v3341_v41 = vpop.eup %3340  ;;  %v5127_v40 = vsub.f32 %v5012_v5, %v2009_v14 }
 0x567   : > { %3342 = vrsqrt.f32 %v2059_v33  ;;  %v1813_v30 = vmul.f32 %v5122_v49, %v5122_v49  ;;  %v1856_v19 = vmul.f32 %v3341_v41, %v1847_v2  ;;  %vm1862_vm2 = vweird.f32 %v3341_v41 }
 0x568   : > { %v2025_v47 = vmul.f32 %v5127_v40, %v5127_v40  ;;  %vm1863_vm4 = vmor %vm1861_vm3, %vm1862_vm2  ;;  %vm2073_vm6 = vweird.f32 %v2059_v33 }
 0x569   : > { %v1833_v12 = vsel %vm5505_vm0, %v1813_v30, 0.0  ;;  %v1857_v34 = vmul.f32 %v3341_v41, %v1856_v19 }
 0x56a   : > { %1834 = vadd.xlane.f32.xlu0 %v1833_v12  ;;  %v2045_v43 = vsel %vm5505_vm0, %v2025_v47, 0.0 }
 0x56b   : > { %v1858_v59 = vmul.f32 0.5, %v1857_v34  ;;  %v1790_v25 = vpop.xlane.xlu2 %1789  ;;  %2046 = vadd.xlane.f32.xlu1 %v2045_v43  ;;  %v5145_v34 = vperm.slane %v4824_v7, 4 }
 0x56c   : > { %v1798_v54 = vmul.f32 %v1790_v25, %v3880_v44 }
 0x56d   : > { %v3343_v5 = vpop.eup %3342  ;;  %v1859_v48 = vsub.f32 1.5, %v1858_v59  ;;  %v5136_v23 = vpop.f32.mrf.mxu0  ;;  %v5151_v59 = vperm.slane %v4824_v7, 7 }
 0x56e   : > { %v2068_v50 = vmul.f32 %v3343_v5, %v2059_v33  ;;  %v5139_v11 = vsub.f32 %v5027_v52, %v1798_v54  ;;  %vm2074_vm5 = vweird.f32 %v3343_v5 }
 0x56f   : > { %v1860_v28 = vmul.f32 %v3341_v41, %v1859_v48  ;;  %vm2075_vm7 = vmor %vm2073_vm6, %vm2074_vm5  ;;  %v5156_v48 = vperm.slane %v4824_v7, 5 }
 0x570   : > { %v2069_v14 = vmul.f32 %v3343_v5, %v2068_v50  ;;  %v1814_v56 = vmul.f32 %v5139_v11, %v5139_v11 }
 0x571   : > { %v1864_v30 = vsel %vm1863_vm4, %v3341_v41, %v1860_v28 }
 0x572   : > { %v2070_v19 = vmul.f32 0.5, %v2069_v14  ;;  %v1836_v47 = vsel %vm5505_vm0, %v1814_v56, 0.0  ;;  %v1935_v52 = vmul.f32 %v1864_v30, %v4987_v16  ;;  %v5161_v16 = vld [vmem:[%s5487_s7 + $0x18] ss:$0 sm:$0xff] }
 0x573   : > { %1837 = vadd.xlane.f32.xlu2 %v1836_v47 }
 0x574   : > { %v2071_v12 = vsub.f32 1.5, %v2070_v19  ;;  %v1944_v25 = vmul.f32 %v5145_v34, %v1935_v52  ;;  %v2460_v19 = vmul.f32 %v4918_v6, %v5136_v23 }
 0x575   : > { %v5148_v2 = vpop.f32.mrf.mxu0 }
 0x576   : > { %v2072_v43 = vmul.f32 %v3343_v5, %v2071_v12  ;;  %v1953_v50 = vadd.f32 %v5156_v48, %v1944_v25  ;;  %v2474_v52 = vsel %vm2412_vm1, %v2460_v19, 0.0 }
 0x578   : > { %v2076_v41 = vsel %vm2075_vm7, %v3343_v5, %v2072_v43 }
 0x579   : > { %v2147_v54 = vmul.f32 %v2076_v41, %v4993_v45  ;;  %v2457_v41 = vmul.f32 %v4946_v37, %v5093_v63 }
 0x57b   : > { %v2156_v33 = vmul.f32 %v5151_v59, %v2147_v54  ;;  %v2465_v6 = vsel %vm2412_vm1, %v2457_v41, 0.0  ;;  %v2032_v54 = vpop.xlane.xlu1 %2031 }
 0x57d   : > { %v2165_v28 = vadd.f32 %v5161_v16, %v2156_v33  ;;  %v5166_v14 = vpop.f32.mrf.mxu0  ;;  %v2052_v33 = vmul.f32 %v2032_v54, %v3880_v44 }
 0x57f   : > { %v2173_v5 = vadd.f32 %v2165_v28, %v1953_v50  ;;  %v2060_v28 = vadd.f32 1e-05, %v2052_v33 }
 0x581   : > { %v2181_v56 = vmax.f32 %v2173_v5, 0.0  ;;  %3344 = vrsqrt.f32 %v2060_v28  ;;  %vm2083_vm9 = vweird.f32 %v2060_v28 }
 0x583   : > { %3153 = vmatmul.msk.f32.vlgmr.msrb.gmra.mxu3 %vm5505_vm0, %v2181_v56 }
 0x585   : > { %v5169_v45 = vpop.f32.mrf.mxu0 }
 0x586   : > { %v2463_v7 = vmul.f32 %v4889_v1, %v5169_v45  ;;  %v2461_v1 = vmul.f32 %v4912_v32, %v5148_v2 }
 0x587   : > { %v3345_v32 = vpop.eup %3344 }
 0x588   : > { %v2483_v30 = vsel %vm2412_vm1, %v2463_v7, 0.0  ;;  %v2477_v25 = vsel %vm2412_vm1, %v2461_v1, 0.0  ;;  %v2078_v5 = vmul.f32 %v3345_v32, %v2060_v28  ;;  %vm2084_vm8 = vweird.f32 %v3345_v32 }
 0x589   : > { %2484 = vadd.xlane.f32.xlu2 %v2483_v30  ;;  %vm2085_vm10 = vmor %vm2083_vm9, %vm2084_vm8 }
 0x58a   : > { %v2079_v37 = vmul.f32 %v3345_v32, %v2078_v5 }
 0x58c   : > { %v2080_v30 = vmul.f32 0.5, %v2079_v37 }
 0x58d   : > { %v5176_v47 = vpop.f32.mrf.mxu0 }
 0x58e   : > { %v2464_v12 = vmul.f32 %v4876_v20, %v5176_v47  ;;  %v2458_v20 = vmul.f32 %v4936_v27, %v5110_v10 }
 0x590   : > { %v2486_v43 = vsel %vm2412_vm1, %v2464_v12, 0.0  ;;  %v2468_v50 = vsel %vm2412_vm1, %v2458_v20, 0.0  ;;  %v2081_v12 = vsub.f32 1.5, %v2080_v30 }
 0x591   : > { %2487 = vadd.xlane.f32.xlu1 %v2486_v43  ;;  %2475 = vadd.xlane.f32.xlu2 %v2474_v52 }
 0x599   : > { %2478 = vadd.xlane.f32.xlu1 %v2477_v25  ;;  %2466 = vadd.xlane.f32.xlu2 %v2465_v6  ;;  %v2082_v6 = vmul.f32 %v3345_v32, %v2081_v12 }
 0x5a1   : > { %2469 = vadd.xlane.f32.xlu1 %v2468_v50 }
 0x5b3   : > { %v1820_v56 = vpop.xlane.xlu0 %1819 }
 0x5b4   : > { %v1840_v7 = vmul.f32 %v1820_v56, %v3880_v44 }
 0x5b6   : > { %v1848_v19 = vadd.f32 1e-05, %v1840_v7  ;;  %v2086_v7 = vsel %vm2085_vm10, %v3345_v32, %v2082_v6 }
 0x5b8   : > { %3346 = vrsqrt.f32 %v1848_v19  ;;  %vm1871_vm12 = vweird.f32 %v1848_v19 }
 0x5bb   : > { %v2002_v52 = vpop.xlane.xlu0 %2001  ;;  %v2035_v43 = vpop.xlane.xlu2 %2034 }
 0x5bc   : > { %v2010_v27 = vmul.f32 %v2002_v52, %v3880_v44  ;;  %v2053_v1 = vmul.f32 %v2035_v43, %v3880_v44  ;;  %v2148_v52 = vmul.f32 %v2086_v7, %v5015_v39 }
 0x5bd   : > { %v1823_v41 = vpop.xlane.xlu1 %1822 }
 0x5be   : > { %v3347_v25 = vpop.eup %3346  ;;  %v5196_v54 = vsub.f32 %v5058_v4, %v2010_v27  ;;  %v2061_v20 = vadd.f32 1e-05, %v2053_v1  ;;  %v1841_v33 = vmul.f32 %v1823_v41, %v3880_v44  ;;  %v2462_v4 = vmul.f32 %v4900_v22, %v5166_v14 }
 0x5bf   : > { %v1866_v50 = vmul.f32 %v3347_v25, %v1848_v19  ;;  %vm1872_vm11 = vweird.f32 %v3347_v25 }
 0x5c0   : > { %3348 = vrsqrt.f32 %v2061_v20  ;;  %v1849_v5 = vadd.f32 1e-05, %v1841_v33  ;;  %v2026_v37 = vmul.f32 %v5196_v54, %v5196_v54  ;;  %vm1873_vm13 = vmor %vm1871_vm12, %vm1872_vm11  ;;  %v2480_v22 = vsel %vm2412_vm1, %v2462_v4, 0.0 }
 0x5c1   : > { %v1867_v56 = vmul.f32 %v3347_v25, %v1866_v50  ;;  %vm2093_vm15 = vweird.f32 %v2061_v20 }
 0x5c2   : > { %3350 = vrsqrt.f32 %v1849_v5  ;;  %v2048_v30 = vsel %vm5505_vm0, %v2026_v37, 0.0  ;;  %vm1881_vm4 = vweird.f32 %v1849_v5 }
 0x5c3   : > { %v1868_v12 = vmul.f32 0.5, %v1867_v56  ;;  %2049 = vadd.xlane.f32.xlu0 %v2048_v30 }
 0x5c5   : > { %v1869_v43 = vsub.f32 1.5, %v1868_v12  ;;  %v1826_v28 = vpop.xlane.xlu0 %1825  ;;  %v2038_v27 = vpop.xlane.xlu1 %2037  ;;  %v2157_v12 = vmul.f32 %v5151_v59, %v2148_v52 }
 0x5c6   : > { %v3349_v1 = vpop.eup %3348  ;;  %v1842_v41 = vmul.f32 %v1826_v28, %v3880_v44  ;;  %v2054_v33 = vmul.f32 %v2038_v27, %v3880_v44 }
 0x5c7   : > { %v1870_v32 = vmul.f32 %v3347_v25, %v1869_v43  ;;  %v2088_v6 = vmul.f32 %v3349_v1, %v2061_v20  ;;  %vm2094_vm14 = vweird.f32 %v3349_v1 }
 0x5c8   : > { %v3351_v50 = vpop.eup %3350  ;;  %v5207_v37 = vadd.f32 1e-05, %v1842_v41  ;;  %v5209_v56 = vadd.f32 1e-05, %v2054_v33  ;;  %vm2095_vm3 = vmor %vm2093_vm15, %vm2094_vm14 }
 0x5c9   : > { %v1874_v39 = vsel %vm1873_vm13, %v3347_v25, %v1870_v32  ;;  %v2089_v7 = vmul.f32 %v3349_v1, %v2088_v6  ;;  %v1876_v30 = vmul.f32 %v3351_v50, %v1849_v5  ;;  %v2166_v32 = vadd.f32 %v5161_v16, %v2157_v12 }
 0x5ca   : > { %v1936_v28 = vmul.f32 %v1874_v39, %v5046_v9  ;;  %3352 = vrsqrt.f32 %v5207_v37  ;;  %v2459_v6 = vmul.f32 %v4929_v8, %v5124_v35  ;;  %vm1882_vm2 = vweird.f32 %v3351_v50 }
 0x5cb   : > { %v2090_v43 = vmul.f32 0.5, %v2089_v7  ;;  %v1877_v19 = vmul.f32 %v3351_v50, %v1876_v30  ;;  %3354 = vrsqrt.f32 %v5209_v56  ;;  %2481 = vadd.xlane.f32.xlu0 %v2480_v22  ;;  %vm1883_vm5 = vmor %vm1881_vm4, %vm1882_vm2  ;;  %vm1891_vm6 = vweird.f32 %v5207_v37 }
 0x5cc   : > { %v1945_v27 = vmul.f32 %v5145_v34, %v1936_v28  ;;  %vm2103_vm10 = vweird.f32 %v5209_v56 }
 0x5cd   : > { %v2091_v41 = vsub.f32 1.5, %v2090_v43  ;;  %v1878_v33 = vmul.f32 0.5, %v1877_v19  ;;  %v2041_v4 = vpop.xlane.xlu0 %2040  ;;  %v1829_v25 = vpop.xlane.xlu2 %1828 }
 0x5ce   : > { %v2055_v52 = vmul.f32 %v2041_v4, %v3880_v44  ;;  %v1843_v9 = vmul.f32 %v1829_v25, %v3880_v44  ;;  %v1954_v39 = vadd.f32 %v5156_v48, %v1945_v27  ;;  %v2471_v27 = vsel %vm2412_vm1, %v2459_v6, 0.0 }
 0x5cf   : > { %v2092_v7 = vmul.f32 %v3349_v1, %v2091_v41  ;;  %v1879_v22 = vsub.f32 1.5, %v1878_v33 }
 0x5d0   : > { %v3353_v30 = vpop.eup %3352  ;;  %v5223_v28 = vadd.f32 1e-05, %v2055_v52  ;;  %v5225_v43 = vadd.f32 1e-05, %v1843_v9  ;;  %v2174_v12 = vadd.f32 %v2166_v32, %v1954_v39 }
 0x5d1   : > { %v3355_v19 = vpop.eup %3354  ;;  %v2096_v4 = vsel %vm2095_vm3, %v3349_v1, %v2092_v7  ;;  %v1880_v60 = vmul.f32 %v3351_v50, %v1879_v22  ;;  %v1886_v25 = vmul.f32 %v3353_v30, %v5207_v37  ;;  %vm1892_vm7 = vweird.f32 %v3353_v30 }
 0x5d2   : > { %v2149_v8 = vmul.f32 %v2096_v4, %v5055_v38  ;;  %v2098_v20 = vmul.f32 %v3355_v19, %v5209_v56  ;;  %3356 = vrsqrt.f32 %v5223_v28  ;;  %v2182_v5 = vmax.f32 %v2174_v12, 0.0  ;;  %vm1893_vm9 = vmor %vm1891_vm6, %vm1892_vm7 }
 0x5d3   : > { %v1884_v41 = vsel %vm1883_vm5, %v3351_v50, %v1880_v60  ;;  %v1887_v33 = vmul.f32 %v3353_v30, %v1886_v25  ;;  %3358 = vrsqrt.f32 %v5225_v43  ;;  %2472 = vadd.xlane.f32.xlu0 %v2471_v27  ;;  %vm2104_vm8 = vweird.f32 %v3355_v19 }
 0x5d4   : > { %v1937_v1 = vmul.f32 %v1884_v41, %v5061_v13  ;;  %v2099_v32 = vmul.f32 %v3355_v19, %v2098_v20  ;;  %v2158_v38 = vmul.f32 %v5151_v59, %v2149_v8  ;;  %3154 = vmatmul.msk.f32.gmra.mxu3 %vm5505_vm0, %v2182_v5  ;;  %vm2105_vm11 = vmor %vm2103_vm10, %vm2104_vm8  ;;  %vm2113_vm14 = vweird.f32 %v5223_v28 }
 0x5d5   : > { %v1888_v52 = vmul.f32 0.5, %v1887_v33  ;;  %v2044_v9 = vpop.xlane.xlu2 %2043  ;;  %v1832_v39 = vpop.xlane.xlu1 %1831  ;;  %vm1901_vm2 = vweird.f32 %v5225_v43 }
 0x5d6   : > { %v2100_v7 = vmul.f32 0.5, %v2099_v32  ;;  %v2056_v22 = vmul.f32 %v2044_v9, %v3880_v44  ;;  %v1844_v4 = vmul.f32 %v1832_v39, %v3880_v44  ;;  %v1946_v60 = vmul.f32 %v5145_v34, %v1937_v1 }
 0x5d7   : > { %v1889_v50 = vsub.f32 1.5, %v1888_v52  ;;  %v2167_v33 = vadd.f32 %v5161_v16, %v2158_v38 }
 0x5d8   : > { %v3357_v13 = vpop.eup %3356  ;;  %v2101_v6 = vsub.f32 1.5, %v2100_v7  ;;  %v5240_v12 = vadd.f32 1e-05, %v2056_v22  ;;  %v5242_v25 = vadd.f32 1e-05, %v1844_v4  ;;  %v1955_v41 = vadd.f32 %v5156_v48, %v1946_v60 }
 0x5d9   : > { %v3359_v8 = vpop.eup %3358  ;;  %v1890_v20 = vmul.f32 %v3353_v30, %v1889_v50  ;;  %v2108_v27 = vmul.f32 %v3357_v13, %v5223_v28  ;;  %vm2114_vm12 = vweird.f32 %v3357_v13 }
 0x5da   : > { %v2102_v1 = vmul.f32 %v3355_v19, %v2101_v6  ;;  %v1896_v37 = vmul.f32 %v3359_v8, %v5225_v43  ;;  %3360 = vrsqrt.f32 %v5240_v12  ;;  %v2175_v4 = vadd.f32 %v2167_v33, %v1955_v41  ;;  %vm2115_vm15 = vmor %vm2113_vm14, %vm2114_vm12 }
 0x5db   : > { %v1894_v32 = vsel %vm1893_vm9, %v3353_v30, %v1890_v20  ;;  %v2109_v5 = vmul.f32 %v3357_v13, %v2108_v27  ;;  %3362 = vrsqrt.f32 %v5242_v25  ;;  %vm1902_vm13 = vweird.f32 %v3359_v8 }
 0x5dc   : > { %v1938_v52 = vmul.f32 %v1894_v32, %v5074_v21  ;;  %v2106_v9 = vsel %vm2105_vm11, %v3355_v19, %v2102_v1  ;;  %v1897_v39 = vmul.f32 %v3359_v8, %v1896_v37  ;;  %v2183_v20 = vmax.f32 %v2175_v4, 0.0  ;;  %vm1903_vm3 = vmor %vm1901_vm2, %vm1902_vm13 }
 0x5dd   : > { %v2150_v7 = vmul.f32 %v2106_v9, %v5077_v42  ;;  %v2110_v38 = vmul.f32 0.5, %v2109_v5  ;;  %v1835_v22 = vpop.xlane.xlu0 %1834  ;;  %vm2123_vm6 = vweird.f32 %v5240_v12  ;;  %vm1911_vm8 = vweird.f32 %v5242_v25 }
 0x5de   : > { %v1898_v56 = vmul.f32 0.5, %v1897_v39  ;;  %v1845_v60 = vmul.f32 %v1835_v22, %v3880_v44  ;;  %v1947_v50 = vmul.f32 %v5145_v34, %v1938_v52  ;;  %v2047_v6 = vpop.xlane.xlu1 %2046  ;;  %3155 = vmatmul.msk.f32.gmra.mxu3 %vm5505_vm0, %v2183_v20  ;;  %vm2511_vm2 = vcmp.lt.s32.totalorder %v4858_v53, %v4860_v36 }
 0x5df   : > { %v2111_v30 = vsub.f32 1.5, %v2110_v38  ;;  %v2159_v27 = vmul.f32 %v5151_v59, %v2150_v7  ;;  %v2057_v42 = vmul.f32 %v2047_v6, %v3880_v44 }
 0x5e0   : > { %v3361_v21 = vpop.eup %3360  ;;  %v1899_v19 = vsub.f32 1.5, %v1898_v56  ;;  %v5256_v1 = vadd.f32 1e-05, %v1845_v60  ;;  %v1956_v41 = vadd.f32 %v5156_v48, %v1947_v50 }
 0x5e1   : > { %v3363_v33 = vpop.eup %3362  ;;  %v2112_v37 = vmul.f32 %v3357_v13, %v2111_v30  ;;  %v2118_v32 = vmul.f32 %v3361_v21, %v5240_v12  ;;  %v2168_v5 = vadd.f32 %v5161_v16, %v2159_v27  ;;  %v2065_v28 = vadd.f32 1e-05, %v2057_v42 }
 0x5e2   : > { %v1900_v52 = vmul.f32 %v3359_v8, %v1899_v19  ;;  %v1906_v9 = vmul.f32 %v3363_v33, %v5242_v25  ;;  %3364 = vrsqrt.f32 %v5256_v1  ;;  %vm2124_vm4 = vweird.f32 %v3361_v21 }
 0x5e3   : > { %v2116_v39 = vsel %vm2115_vm15, %v3357_v13, %v2112_v37  ;;  %v2119_v7 = vmul.f32 %v3361_v21, %v2118_v32  ;;  %v2176_v56 = vadd.f32 %v2168_v5, %v1956_v41  ;;  %3366 = vrsqrt.f32 %v2065_v28  ;;  %vm2125_vm7 = vmor %vm2123_vm6, %vm2124_vm4 }
 0x5e4   : > { %v2151_v38 = vmul.f32 %v2116_v39, %v5088_v46  ;;  %v1904_v22 = vsel %vm1903_vm3, %v3359_v8, %v1900_v52  ;;  %v1907_v4 = vmul.f32 %v3363_v33, %v1906_v9  ;;  %vm1912_vm5 = vweird.f32 %v3363_v33 }
 0x5e5   : > { %v1939_v60 = vmul.f32 %v1904_v22, %v5091_v17  ;;  %v2120_v50 = vmul.f32 0.5, %v2119_v7  ;;  %v2184_v43 = vmax.f32 %v2176_v56, 0.0  ;;  %vm1913_vm9 = vmor %vm1911_vm8, %vm1912_vm5  ;;  %vm1921_vm11 = vweird.f32 %v5256_v1 }
 0x5e6   : > { %v1908_v30 = vmul.f32 0.5, %v1907_v4  ;;  %v2160_v6 = vmul.f32 %v5151_v59, %v2151_v38  ;;  %vm2133_vm14 = vweird.f32 %v2065_v28  ;;  %vm2512_vm4 = vcmp.lt.s32.totalorder %v4851_v62, %v4860_v36 }
 0x5e7   : > { %v2121_v20 = vsub.f32 1.5, %v2120_v50  ;;  %v1948_v13 = vmul.f32 %v5145_v34, %v1939_v60  ;;  %3156 = vmatmul.msk.f32.gmra.mxu3 %vm5505_vm0, %v2184_v43 }
 0x5e8   : > { %v3365_v27 = vpop.eup %3364  ;;  %v1909_v19 = vsub.f32 1.5, %v1908_v30  ;;  %v2169_v46 = vadd.f32 %v5161_v16, %v2160_v6 }
 0x5e9   : > { %v2122_v8 = vmul.f32 %v3361_v21, %v2121_v20  ;;  %v1916_v17 = vmul.f32 %v3365_v27, %v5256_v1  ;;  %v1957_v42 = vadd.f32 %v5156_v48, %v1948_v13  ;;  %v3367_v37 = vpop.eup %3366  ;;  %vm1922_vm10 = vweird.f32 %v3365_v27 }
 0x5ea   : > { %v1910_v41 = vmul.f32 %v3363_v33, %v1909_v19  ;;  %v2128_v7 = vmul.f32 %v3367_v37, %v2065_v28  ;;  %vm1923_vm12 = vmor %vm1921_vm11, %vm1922_vm10  ;;  %vm2134_vm13 = vweird.f32 %v3367_v37 }
 0x5eb   : > { %v2126_v32 = vsel %vm2125_vm7, %v3361_v21, %v2122_v8  ;;  %v1917_v5 = vmul.f32 %v3365_v27, %v1916_v17  ;;  %v2177_v52 = vadd.f32 %v2169_v46, %v1957_v42  ;;  %vm2135_vm15 = vmor %vm2133_vm14, %vm2134_vm13  ;;  %v1838_v42 = vpop.xlane.xlu2 %1837  ;;  %vm2510_vm14 = vcmp.lt.s32.totalorder %v4863_v26, %v4860_v36 }
 0x5ec   : > { %v2152_v9 = vmul.f32 %v2126_v32, %v5108_v51  ;;  %v1914_v39 = vsel %vm1913_vm9, %v3363_v33, %v1910_v41  ;;  %v2129_v22 = vmul.f32 %v3367_v37, %v2128_v7  ;;  %v1846_v53 = vmul.f32 %v1838_v42, %v3880_v44 }
 0x5ed   : > { %v1940_v12 = vmul.f32 %v1914_v39, %v5105_v3  ;;  %v1918_v38 = vmul.f32 0.5, %v1917_v5  ;;  %v2185_v4 = vmax.f32 %v2177_v52, 0.0 }
 0x5ee   : > { %v2161_v56 = vmul.f32 %v5151_v59, %v2152_v9  ;;  %v2130_v50 = vmul.f32 0.5, %v2129_v22 }
 0x5ef   : > { %v1919_v60 = vsub.f32 1.5, %v1918_v38  ;;  %v1949_v25 = vmul.f32 %v5145_v34, %v1940_v12  ;;  %3157 = vmatmul.msk.f32.gmra.mxu3 %vm5505_vm0, %v2185_v4 }
 0x5f0   : > { %v2170_v21 = vadd.f32 %v5161_v16, %v2161_v56  ;;  %v2131_v3 = vsub.f32 1.5, %v2130_v50 }
 0x5f1   : > { %v1920_v30 = vmul.f32 %v3365_v27, %v1919_v60  ;;  %v1958_v51 = vadd.f32 %v5156_v48, %v1949_v25 }
 0x5f2   : > { %v2132_v20 = vmul.f32 %v3367_v37, %v2131_v3 }
 0x5f3   : > { %v1924_v33 = vsel %vm1923_vm12, %v3365_v27, %v1920_v30  ;;  %v2178_v43 = vadd.f32 %v2170_v21, %v1958_v51  ;;  %vm2509_vm12 = vcmp.lt.s32.totalorder %v4870_v0, %v4860_v36 }
 0x5f4   : > { %v1941_v6 = vmul.f32 %v1924_v33, %v5122_v49  ;;  %v2136_v19 = vsel %vm2135_vm15, %v3367_v37, %v2132_v20  ;;  %v1854_v37 = vadd.f32 1e-05, %v1846_v53  ;;  %vm2508_vm15 = vcmp.lt.s32.totalorder %v4879_v24, %v4860_v36  ;;  %v3394_v53 = vld [vmem:[%s3578_s25 + $0x20] sm:$0xff] }
 0x5f5   : > { %v2186_v13 = vmax.f32 %v2178_v43, 0.0  ;;  %v2153_v1 = vmul.f32 %v2136_v19, %v5127_v40 }
 0x5f6   : > { %v1950_v46 = vmul.f32 %v5145_v34, %v1941_v6  ;;  %3368 = vrsqrt.f32 %v1854_v37 }
 0x5f7   : > { %3158 = vmatmul.msk.f32.gmra.mxu3 %vm5505_vm0, %v2186_v13  ;;  %v2162_v17 = vmul.f32 %v5151_v59, %v2153_v1  ;;  %v2263_v13 = vld [vmem:[#allocation4 + $0x88] ss:$0 sm:$0xff] }
 0x5f8   : > { %v1959_v8 = vadd.f32 %v5156_v48, %v1950_v46  ;;  %v3391_v46 = vld [vmem:[%s3578_s25 + $0x38] sm:$0xff] }
 0x5f9   : > { %v2171_v27 = vadd.f32 %v5161_v16, %v2162_v17  ;;  %v3392_v17 = vld [vmem:[%s3578_s25 + $0x30] sm:$0xff] }
 0x5fb   : > { %v2179_v41 = vadd.f32 %v2171_v27, %v1959_v8 }
 0x5fc   : > { %v2485_v28 = vpop.xlane.xlu2 %2484  ;;  %v3369_v32 = vpop.eup %3368 }
 0x5fd   : > { %v2187_v49 = vmax.f32 %v2179_v41, 0.0  ;;  %vm2503_vm3 = vcmp.eq.f32.partialorder %v2485_v28, %v5169_v45  ;;  %vm2495_vm8 = vcmp.gt.f32.partialorder %v2485_v28, %v5169_v45  ;;  %v1926_v62 = vmul.f32 %v3369_v32, %v1854_v37  ;;  %v3393_v41 = vld [vmem:[%s3578_s25 + $0x28] sm:$0xff] }
 0x5fe   : > { %vm2519_vm7 = vmand %vm2503_vm3, %vm2511_vm2 }
 0x5ff   : > { %3159 = vmatmul.msk.f32.gmra.mxu3 %vm5505_vm0, %v2187_v49  ;;  %vm2527_vm11 = vmor %vm2495_vm8, %vm2519_vm7  ;;  %v1927_v5 = vmul.f32 %v3369_v32, %v1926_v62  ;;  %vm1932_vm8 = vweird.f32 %v3369_v32 }
 0x601   : > { %v1928_v7 = vmul.f32 0.5, %v1927_v5 }
 0x603   : > { %v1929_v12 = vsub.f32 1.5, %v1928_v7  ;;  %v3397_v7 = vld [vmem:[%s3578_s25 + $0x8] sm:$0xff] }
 0x604   : > { %v2488_v40 = vpop.xlane.xlu1 %2487  ;;  %v2476_v52 = vpop.xlane.xlu2 %2475 }
 0x605   : > { %vm2504_vm5 = vcmp.eq.f32.partialorder %v2488_v40, %v5176_v47  ;;  %vm2496_vm6 = vcmp.gt.f32.partialorder %v2488_v40, %v5176_v47  ;;  %vm2500_vm2 = vcmp.eq.f32.partialorder %v2476_v52, %v5136_v23  ;;  %v1930_v56 = vmul.f32 %v3369_v32, %v1929_v12 }
 0x606   : > { %vm2520_vm9 = vmand %vm2504_vm5, %vm2512_vm4 }
 0x607   : > { %vm2528_vm10 = vmor %vm2496_vm6, %vm2520_vm9 }
 0x608   : > { %3185 = vmatpush.msk.msra.mxu1 %vm2528_vm10, %v3485_v15  ;;  %vm2492_vm10 = vcmp.gt.f32.partialorder %v2476_v52, %v5136_v23  ;;  %v3395_v52 = vld [vmem:[%s3578_s25 + $0x18] sm:$0xff] }
 0x60a   : > { %3186 = vmatpush.msk.msra.mxu1 %vm2527_vm11, %v3485_v15  ;;  %vm2516_vm11 = vmand %vm2500_vm2, %vm2508_vm15 }
 0x60b   : > { %vm2524_vm2 = vmor %vm2492_vm10, %vm2516_vm11 }
 0x60c   : > { %v2479_v47 = vpop.xlane.xlu1 %2478  ;;  %v2467_v0 = vpop.xlane.xlu2 %2466 }
 0x60d   : > { %vm2501_vm13 = vcmp.eq.f32.partialorder %v2479_v47, %v5148_v2  ;;  %vm2493_vm6 = vcmp.gt.f32.partialorder %v2479_v47, %v5148_v2  ;;  %vm2497_vm0 = vcmp.eq.f32.partialorder %v2467_v0, %v5093_v63 }
 0x60e   : > { %vm5315_vm3 = vmand %vm2501_vm13, %vm2509_vm12  ;;  %vm1931_vm12 = vweird.f32 %v1854_v37  ;;  %vm2505_vm13 = vcmp.lt.s32.totalorder %v4848_v31, %v4860_v36 }
 0x614   : > { %v2470_v4 = vpop.xlane.xlu1 %2469 }
 0x615   : > { %vm2498_vm15 = vcmp.eq.f32.partialorder %v2470_v4, %v5110_v10 }
 0x636   : > { %v2050_v9 = vpop.xlane.xlu0 %2049 }
 0x637   : > { %v2058_v39 = vmul.f32 %v2050_v9, %v3880_v44 }
 0x639   : > { %v2066_v45 = vadd.f32 1e-05, %v2058_v39  ;;  %v3396_v39 = vld [vmem:[%s3578_s25 + $0x10] sm:$0xff] }
 0x63b   : > { %3370 = vrsqrt.f32 %v2066_v45 }
 0x63e   : > { %v2482_v38 = vpop.xlane.xlu0 %2481 }
 0x63f   : > { %vm2494_vm4 = vcmp.gt.f32.partialorder %v2482_v38, %v5166_v14  ;;  %vm2502_vm5 = vcmp.eq.f32.partialorder %v2482_v38, %v5166_v14  ;;  %v3398_v38 = vld [vmem:[%s3578_s25] sm:$0xff]  ;;  %s351_s25 = scalar_lea.vmem %s5488_s8, %s3118_s12 }
 0x640   : > { %vm2518_vm7 = vmand %vm2502_vm5, %vm2510_vm14 }
 0x641   : > { %v3371_v26 = vpop.eup %3370  ;;  %vm2526_vm9 = vmor %vm2494_vm4, %vm2518_vm7  ;;  %vm2506_vm4 = vcmp.lt.s32.totalorder %v4906_v55, %v4860_v36  ;;  %vm2507_vm7 = vcmp.lt.s32.totalorder %v4897_v57, %v4860_v36 }
 0x642   : > { %v2138_v24 = vmul.f32 %v3371_v26, %v2066_v45  ;;  %3187 = vmatpush.msk.msra.mxu1 %vm2526_vm9, %v3485_v15  ;;  %vm2525_vm14 = vmor %vm2493_vm6, %vm5315_vm3  ;;  %vm2490_vm6 = vcmp.gt.f32.partialorder %v2470_v4, %v5110_v10  ;;  %vm2144_vm11 = vweird.f32 %v3371_v26  ;;  %v558_v4 = vld [vmem:[%s5483_s3 + $0x8] sm:$0xf] }
 0x643   : > { %vm5329_vm5 = vmor %vm1931_vm12, %vm1932_vm8 }
 0x644   : > { %v2139_v23 = vmul.f32 %v3371_v26, %v2138_v24  ;;  %3188 = vmatpush.msk.msra.mxu1 %vm2525_vm14, %v3485_v15  ;;  %v1934_v14 = vsel %vm5329_vm5, %v3369_v32, %v1930_v56  ;;  %vm5341_vm3 = vmand %vm2497_vm0, %vm2505_vm13  ;;  %vm2489_vm13 = vcmp.gt.f32.partialorder %v2467_v0, %v5093_v63  ;;  %vm2143_vm5 = vweird.f32 %v2066_v45 }
 0x645   : > { %vm2514_vm8 = vmand %vm2498_vm15, %vm2506_vm4  ;;  %v1942_v36 = vmul.f32 %v1934_v14, %v5139_v11  ;;  %vm5557_vm15 = vcmask 261120   ;;  %v2565_v32 = vcvt.s32.f32 %v4848_v31  ;;  %v5558_v0 = vmov 0.0  }
 0x646   : > { %v2140_v25 = vmul.f32 0.5, %v2139_v23  ;;  %v2473_v50 = vpop.xlane.xlu0 %2472  ;;  %3189 = vmatpush.msk.msra.mxu1 %vm2524_vm2, %v3485_v15  ;;  %vm2522_vm14 = vmor %vm2490_vm6, %vm2514_vm8  ;;  %v2619_v56 = vperm.slane %v558_v4, 1  ;;  %v2607_v24 = vperm.slane %v558_v4, 0 }
 0x647   : > { %vm2491_vm9 = vcmp.gt.f32.partialorder %v2473_v50, %v5124_v35  ;;  %vm2499_vm10 = vcmp.eq.f32.partialorder %v2473_v50, %v5124_v35  ;;  %vm2145_vm2 = vmor %vm2143_vm5, %vm2144_vm11  ;;  %v1951_v21 = vmul.f32 %v5145_v34, %v1942_v36  ;;  %v5559_v36 = vld [vmem:[#allocation20_spill] sm:$0xff] }
 0x648   : > { %v2141_v55 = vsub.f32 1.5, %v2140_v25  ;;  %vm2515_vm12 = vmand %vm2499_vm10, %vm2507_vm7  ;;  %v2623_v2 = vperm.slane %v2619_v56, 1  ;;  %v2611_v23 = vperm.slane %v2607_v24, 0  ;;  %v5382_v25 = vld [vmem:[%s5487_s7 + $0x20] sm:$0xff] }
 0x649   : > { %vm2523_vm0 = vmor %vm2491_vm9, %vm2515_vm12  ;;  %v1960_v11 = vadd.f32 %v5156_v48, %v1951_v21 }
 0x64a   : > { %v2142_v57 = vmul.f32 %v3371_v26, %v2141_v55  ;;  %3190 = vmatpush.msk.msra.mxu1 %vm2523_vm0, %v3485_v15  ;;  %vm2521_vm4 = vmor %vm2489_vm13, %vm5341_vm3 }
 0x64c   : > { %v2146_v10 = vsel %vm2145_vm2, %v3371_v26, %v2142_v57  ;;  %3191 = vmatpush.msk.msra.mxu1 %vm2522_vm14, %v3485_v15  ;;  %v2632_v57 = vperm.slane %v5559_v36, 0 }
 0x64d   : > { %v2154_v35 = vmul.f32 %v2146_v10, %v5196_v54  ;;  %v2305_v54 = vpop.f32.mrf.mxu3  ;;  %v2634_v10 = vperm.slane %v5382_v25, 0 }
 0x64e   : > { %3192 = vmatpush.msk.msra.mxu1 %vm2521_vm4, %v3485_v15  ;;  %v2306_v47 = vadd.f32 %v2305_v54, %v2263_v13 }
 0x64f   : > { %v2163_v63 = vmul.f32 %v5151_v59, %v2154_v35  ;;  %3193 = vmatmul.msk.f32.vlgmr.msra.gmra.mxu1 %vm2412_vm1, %v3485_v15 }
 0x650   : > { %v2570_v22 = vadd.f32 %v3398_v38, %v2306_v47 }
 0x651   : > { %v2172_v30 = vadd.f32 %v5161_v16, %v2163_v63 }
 0x653   : > { %v2180_v51 = vadd.f32 %v2172_v30, %v1960_v11  ;;  %v2620_v11 = vperm.slane %v558_v4, 3  ;;  %v2608_v30 = vperm.slane %v558_v4, 2 }
 0x655   : > { %v2188_v3 = vmax.f32 %v2180_v51, 0.0  ;;  %v2624_v51 = vperm.slane %v2620_v11, 1 }
 0x657   : > { %3160 = vmatmul.msk.f32.gmra.mxu3 %vm5557_vm15, %v2188_v3  ;;  %v2308_v33 = vpop.f32.mrf.mxu3  ;;  %v2612_v3 = vperm.slane %v2608_v30, 0 }
 0x658   : > { %v2309_v5 = vadd.f32 %v2308_v33, %v2263_v13 }
 0x65a   : > { %v2571_v12 = vadd.f32 %v3397_v7, %v2309_v5 }
 0x661   : > { %v2311_v34 = vpop.f32.mrf.mxu3 }
 0x662   : > { %v2312_v40 = vadd.f32 %v2311_v34, %v2263_v13 }
 0x664   : > { %v2572_v45 = vadd.f32 %v3396_v39, %v2312_v40  ;;  %v2658_v39 = vperm.slane %v5382_v25, 1 }
 0x66a   : > { %v2314_v43 = vpop.f32.mrf.mxu3 }
 0x66b   : > { %v2315_v27 = vadd.f32 %v2314_v43, %v2263_v13 }
 0x66d   : > { %v2573_v9 = vadd.f32 %v3395_v52, %v2315_v27 }
 0x672   : > { %v2317_v6 = vpop.f32.mrf.mxu3 }
 0x673   : > { %v2318_v8 = vadd.f32 %v2317_v6, %v2263_v13 }
 0x675   : > { %v2574_v37 = vadd.f32 %v3394_v53, %v2318_v8  ;;  %v2666_v8 = vld [vmem:[#allocation2 + $0x50] sm:$0xff] }
 0x67a   : > { %v2320_v59 = vpop.f32.mrf.mxu3 }
 0x67b   : > { %v2321_v16 = vadd.f32 %v2320_v59, %v2263_v13 }
 0x67d   : > { %v2575_v49 = vadd.f32 %v3393_v41, %v2321_v16 }
 0x682   : > { %v2323_v20 = vpop.f32.mrf.mxu3 }
 0x683   : > { %v2324_v48 = vadd.f32 %v2323_v20, %v2263_v13  ;;  %v2718_v20 = vperm.slane %v4813_v18, 0 }
 0x685   : > { %v2576_v42 = vadd.f32 %v3392_v17, %v2324_v48  ;;  %v2665_v17 = vld [vmem:[#allocation2 + $0x48] sm:$0xff] }
 0x6cc   : > { %v2562_v28 = vpop.f32.mrf.mxu1 }
 0x6cd   : > { %v2566_v62 = vperm.slane %v2562_v28, 0 }
 0x6cf   : > { %vm2567_vm7 = vcmp.eq.f32.partialorder %v2566_v62, %v2565_v32 }
 0x6d0   : > { %v3194_v26 = vsel %vm2567_vm7, 1.0, %v5558_v0 }
 0x6da   : > { %v2326_v15 = vpop.f32.mrf.mxu3 }
 0x6db   : > { %v2327_v19 = vadd.f32 %v2326_v15, %v2263_v13 }
 0x6dd   : > { %v2577_v1 = vadd.f32 %v3391_v46, %v2327_v19  ;;  %v2720_v19 = vperm.slane %v5382_v25, 6 }
 0x6df   : > { %2589 = vmatpush.msra.mxu2 %v2577_v1  ;;  %v2667_v1 = vld [vmem:[#allocation2 + $0x58] sm:$0xff] }
 0x6e0   : > { %2684 = vmatpush.msra.mxu3 %v2667_v1 }
 0x6e1   : > { %2590 = vmatpush.msra.mxu2 %v2576_v42  ;;  %v2664_v42 = vld [vmem:[#allocation2 + $0x40] sm:$0xff] }
 0x6e2   : > { %2685 = vmatpush.msra.mxu3 %v2666_v8  ;;  %v3272_v8 = vld [vmem:[%s5487_s7 + $0x28] ss:$0 sm:$0xff] }
 0x6e3   : > { %2591 = vmatpush.msra.mxu2 %v2575_v49 }
 0x6e4   : > { %2686 = vmatpush.msra.mxu3 %v2665_v17 }
 0x6e5   : > { %2592 = vmatpush.msra.mxu2 %v2574_v37 }
 0x6e6   : > { %2687 = vmatpush.msra.mxu3 %v2664_v42  ;;  %v2716_v42 = vperm.slane %v5382_v25, 5 }
 0x6e7   : > { %2593 = vmatpush.msra.mxu2 %v2573_v9 }
 0x6e9   : > { %2594 = vmatpush.msra.mxu2 %v2572_v45 }
 0x6eb   : > { %2595 = vmatpush.msra.mxu2 %v2571_v12  ;;  %v2660_v12 = vperm.slane %v5382_v25, 2 }
 0x6ed   : > { %2596 = vmatpush.msra.mxu2 %v2570_v22 }
 0x6ee   : > { %3195 = vmatmul.msk.f32.vlgmr.msra.gmra.mxu2 %vm2412_vm1, %v3194_v26  ;;  %vm5560_vm1 = vmmov %vm5557_vm15  ;;  %v2668_v26 = vperm.slane %v5382_v25, 3 }
 0x6ef   : > { %vm5561_vm3 = vmmov %vm5560_vm1 }
 0x6f0   : > { %vm5562_vm6 = vmmov %vm5560_vm1 }
 0x6f1   : > { %vm5563_vm8 = vmmov %vm5560_vm1 }
 0x6f2   : > { %vm5564_vm12 = vmmov %vm5560_vm1 }
 0x6f3   : > { %vm5565_vm0 = vmmov %vm5560_vm1 }
 0x6f4   : > { %vm5566_vm13 = vmmov %vm5565_vm0 }
 0x771   : > { %v2598_v31 = vpop.f32.mrf.mxu2 }
 0x772   : > { %2616 = vperm.xlu1 %3268, %v2598_v31   ;;  %2603 = vperm.xlu0 %3265, %v2598_v31  }
 0x77a   : > { %3269 = vset.pattern.permute.xlu0 %v5538_v29 }
 0x7e4   : > { %v2617_v14 = vpop.permute.xlu1 %2616  ;;  %v2604_v60 = vpop.permute.xlu0 %2603 }
 0x7e5   : > { %v2625_v50 = vmul.f32 %v2623_v2, %v2617_v14  ;;  %v2613_v55 = vmul.f32 %v2611_v23, %v2604_v60  ;;  %v2626_v54 = vmul.f32 %v2624_v51, %v2617_v14  ;;  %v2614_v33 = vmul.f32 %v2612_v3, %v2604_v60 }
 0x7e7   : > { %v2627_v29 = vadd.f32 %v2625_v50, %v2613_v55  ;;  %v2628_v6 = vadd.f32 %v2626_v54, %v2614_v33 }
 0x7e9   : > { %v2633_v35 = vadd.f32 %v2632_v57, %v2627_v29  ;;  %v2719_v48 = vadd.f32 %v2718_v20, %v2628_v6  ;;  %v2753_v29 = vld [vmem:[#allocation4 + $0x70] sm:$0xff] }
 0x7ea   : > { %2770 = vmatpush.msrb.mxu1 %v2753_v29  ;;  %v2870_v29 = vld [vmem:[#allocation2 + $0x70] sm:$0xff] }
 0x7eb   : > { %v2635_v21 = vadd.f32 %v2634_v10, %v2633_v35  ;;  %v2721_v16 = vadd.f32 %v2720_v19, %v2719_v48  ;;  %v2752_v10 = vld [vmem:[#allocation4 + $0x50] sm:$0xff]  ;;  %v2744_v48 = vperm.slane %v5382_v25, 7 }
 0x7ec   : > { %2771 = vmatpush.msrb.mxu1 %v2752_v10  ;;  %v2869_v10 = vld [vmem:[#allocation2 + $0x68] sm:$0xff] }
 0x7ed   : > { %v2636_v63 = vsel %vm5560_vm1, %v2635_v21, 0.0  ;;  %v2722_v46 = vsel %vm5562_vm6, %v2721_v16, 0.0  ;;  %vm5567_vm1 = vmmov %vm5565_vm0  ;;  %vm2782_vm6 = vcmask 97280  }
 0x7ee   : > { %2637 = vadd.xlane.f32.xlu2 %v2636_v63  ;;  %v2750_v63 = vld [vmem:[#allocation4 + $0x10] sm:$0xff] }
 0x861   : > { %v2638_v34 = vpop.xlane.xlu2 %2637 }
 0x862   : > { %v2639_v43 = vmul.f32 %v2638_v34, %v3880_v44 }
 0x864   : > { %v2640_v59 = vsub.f32 %v2635_v21, %v2639_v43  ;;  %v2751_v21 = vld [vmem:[#allocation4 + $0x30] sm:$0xff] }
 0x865   : > { %2772 = vmatpush.msrb.mxu1 %v2751_v21 }
 0x866   : > { %v2641_v13 = vmul.f32 %v2640_v59, %v2640_v59 }
 0x867   : > { %2773 = vmatpush.msrb.mxu1 %v2750_v63 }
 0x868   : > { %v2642_v15 = vsel %vm5561_vm3, %v2641_v13, 0.0  ;;  %vm2786_vm3 = vcmask 1043456  }
 0x869   : > { %2643 = vadd.xlane.f32.xlu2 %v2642_v15 }
 0x871   : > { %2723 = vadd.xlane.f32.xlu2 %v2722_v46  ;;  %v2714_v46 = vperm.slane %v5382_v25, 4  ;;  %v2778_v25 = vld [vmem:[%s5484_s4] sm:$0xff] }
 0x8dc   : > { %v2644_v27 = vpop.xlane.xlu2 %2643 }
 0x8dd   : > { %v2645_v18 = vmul.f32 %v2644_v27, %v3880_v44 }
 0x8df   : > { %v2646_v41 = vadd.f32 1e-05, %v2645_v18 }
 0x8e1   : > { %3372 = vrsqrt.f32 %v2646_v41  ;;  %vm2653_vm10 = vweird.f32 %v2646_v41 }
 0x8e4   : > { %v2724_v49 = vpop.xlane.xlu2 %2723 }
 0x8e5   : > { %v2725_v28 = vmul.f32 %v2724_v49, %v3880_v44 }
 0x8e7   : > { %v3373_v40 = vpop.eup %3372  ;;  %v5394_v53 = vsub.f32 %v2721_v16, %v2725_v28 }
 0x8e8   : > { %v2648_v37 = vmul.f32 %v3373_v40, %v2646_v41  ;;  %vm2654_vm9 = vweird.f32 %v3373_v40 }
 0x8e9   : > { %v2727_v32 = vmul.f32 %v5394_v53, %v5394_v53  ;;  %vm2655_vm11 = vmor %vm2653_vm10, %vm2654_vm9 }
 0x8ea   : > { %v2649_v62 = vmul.f32 %v3373_v40, %v2648_v37  ;;  %v2781_v37 = vld [vmem:[%s5484_s4 + $0x18] sm:$0xf]  ;;  %vm5569_vm9 = vmmov %vm5565_vm0 }
 0x8eb   : > { %v2728_v5 = vsel %vm5563_vm8, %v2727_v32, 0.0  ;;  %3202 = vmatpush.msk.msrb.mxu3 %vm2786_vm3, %v2781_v37  ;;  %v2779_v32 = vld [vmem:[%s5484_s4 + $0x8] sm:$0xff]  ;;  %vm5568_vm8 = vmmov %vm5565_vm0  ;;  %v2956_v37 = vld [vmem:[#allocation4 + $0x58] sm:$0xff] }
 0x8ec   : > { %v2650_v52 = vmul.f32 0.5, %v2649_v62  ;;  %2729 = vadd.xlane.f32.xlu2 %v2728_v5  ;;  %v2754_v62 = vld [vmem:[#allocation4 + $0x90] ss:$0 sm:$0xff]  ;;  %vm5570_vm10 = vmmov %vm5565_vm0 }
 0x8ed   : > { %2828 = vmatpush.msrb.mxu3 %v2779_v32  ;;  %v2955_v32 = vld [vmem:[#allocation4 + $0x38] sm:$0xff] }
 0x8ee   : > { %v2651_v9 = vsub.f32 1.5, %v2650_v52 }
 0x8f0   : > { %v2652_v47 = vmul.f32 %v3373_v40, %v2651_v9  ;;  %v5437_v9 = vld [vmem:[%s5487_s7 + $0x30] sm:$0xff] }
 0x8f2   : > { %v2656_v45 = vsel %vm2655_vm11, %v3373_v40, %v2652_v47  ;;  %v2836_v47 = vperm.slane %v4696_v58, 0  ;;  %vm5571_vm11 = vmmov %vm5565_vm0 }
 0x8f3   : > { %v2657_v7 = vmul.f32 %v2656_v45, %v2640_v59  ;;  %v2838_v45 = vperm.slane %v5437_v9, 0 }
 0x8f5   : > { %v2659_v38 = vmul.f32 %v2658_v39, %v2657_v7  ;;  %v2922_v39 = vperm.slane %v4715_v61, 0  ;;  %v2924_v7 = vperm.slane %v5437_v9, 6 }
 0x8f7   : > { %v2661_v22 = vadd.f32 %v2660_v12, %v2659_v38 }
 0x8f9   : > { %v2662_v0 = vmax.f32 %v2661_v22, 0.0 }
 0x8fb   : > { %3198 = vmatmul.msk.f32.vlgmr.msra.gmra.mxu3 %vm5564_vm12, %v2662_v0 }
 0x95f   : > { %v2730_v50 = vpop.xlane.xlu2 %2729 }
 0x960   : > { %v2731_v55 = vmul.f32 %v2730_v50, %v3880_v44 }
 0x962   : > { %v2732_v36 = vadd.f32 1e-05, %v2731_v55 }
 0x964   : > { %3374 = vrsqrt.f32 %v2732_v36  ;;  %vm2739_vm5 = vweird.f32 %v2732_v36 }
 0x96a   : > { %v3375_v57 = vpop.eup %3374 }
 0x96b   : > { %v2734_v35 = vmul.f32 %v3375_v57, %v2732_v36  ;;  %vm2740_vm14 = vweird.f32 %v3375_v57 }
 0x96c   : > { %vm2741_vm2 = vmor %vm2739_vm5, %vm2740_vm14 }
 0x96d   : > { %v2735_v11 = vmul.f32 %v3375_v57, %v2734_v35  ;;  %v2868_v35 = vld [vmem:[#allocation2 + $0x60] sm:$0xff]  ;;  %vm5572_vm14 = vmmov %vm5567_vm1 }
 0x96e   : > { %vm5573_vm5 = vmmov %vm5567_vm1 }
 0x96f   : > { %v2736_v54 = vmul.f32 0.5, %v2735_v11 }
 0x971   : > { %v2737_v33 = vsub.f32 1.5, %v2736_v54 }
 0x973   : > { %v2738_v43 = vmul.f32 %v3375_v57, %v2737_v33 }
 0x975   : > { %v2742_v20 = vsel %vm2741_vm2, %v3375_v57, %v2738_v43  ;;  %v2871_v57 = vld [vmem:[#allocation2 + $0x78] sm:$0xff]  ;;  %v2862_v43 = vperm.slane %v5437_v9, 1  ;;  %vm5574_vm2 = vmmov %vm5567_vm1 }
 0x976   : > { %v2743_v19 = vmul.f32 %v2742_v20, %v5394_v53  ;;  %v2780_v53 = vld [vmem:[%s5484_s4 + $0x10] sm:$0xf]  ;;  %2888 = vmatpush.msra.mxu1 %v2871_v57  ;;  %v2864_v20 = vperm.slane %v5437_v9, 2 }
 0x977   : > { %3200 = vmatpush.msk.msrb.mxu2 %vm2786_vm3, %v2780_v53  ;;  %v2957_v53 = vld [vmem:[#allocation4 + $0x78] sm:$0xff] }
 0x978   : > { %v2745_v17 = vmul.f32 %v2744_v48, %v2743_v19  ;;  %2889 = vmatpush.msra.mxu1 %v2870_v29  ;;  %v2872_v19 = vperm.slane %v5437_v9, 3 }
 0x979   : > { %2808 = vmatpush.msrb.mxu2 %v2778_v25 }
 0x97a   : > { %v2747_v41 = vadd.f32 %v3272_v8, %v2745_v17  ;;  %2890 = vmatpush.msra.mxu1 %v2869_v10 }
 0x97b   : > { %2974 = vmatpush.msra.mxu2 %v2957_v53 }
 0x97c   : > { %2891 = vmatpush.msra.mxu1 %v2868_v35 }
 0x97d   : > { %2975 = vmatpush.msra.mxu2 %v2956_v37 }
 0x97e   : > { %v2689_v31 = vpop.f32.mrf.mxu3 }
 0x97f   : > { %v2690_v4 = vadd.f32 %v2689_v31, %v2668_v26  ;;  %2976 = vmatpush.msra.mxu2 %v2955_v32 }
 0x981   : > { %v2692_v56 = vsel %vm5565_vm0, %v2690_v4, 0.0 }
 0x982   : > { %2693 = vadd.xlane.f32.xlu0 %v2692_v56 }
 0x9f5   : > { %v2694_v24 = vpop.xlane.xlu0 %2693 }
 0x9f6   : > { %v2695_v2 = vmul.f32 %v2694_v24, %v3880_v44 }
 0x9f8   : > { %v2696_v23 = vsub.f32 %v2690_v4, %v2695_v2 }
 0x9fa   : > { %v2697_v14 = vmul.f32 %v2696_v23, %v2696_v23 }
 0x9fc   : > { %v2698_v60 = vsel %vm5566_vm13, %v2697_v14, 0.0 }
 0x9fd   : > { %2699 = vadd.xlane.f32.xlu1 %v2698_v60 }
 0xa70   : > { %v2700_v30 = vpop.xlane.xlu1 %2699 }
 0xa71   : > { %v2701_v51 = vmul.f32 %v2700_v30, %v3880_v44 }
 0xa73   : > { %v2702_v3 = vadd.f32 1e-05, %v2701_v51 }
 0xa75   : > { %3376 = vrsqrt.f32 %v2702_v3  ;;  %vm2709_vm15 = vweird.f32 %v2702_v3 }
 0xa7b   : > { %v3377_v34 = vpop.eup %3376 }
 0xa7c   : > { %v2704_v6 = vmul.f32 %v3377_v34, %v2702_v3  ;;  %vm2710_vm4 = vweird.f32 %v3377_v34 }
 0xa7d   : > { %vm2711_vm7 = vmor %vm2709_vm15, %vm2710_vm4 }
 0xa7e   : > { %v2705_v59 = vmul.f32 %v3377_v34, %v2704_v6 }
 0xa80   : > { %v2706_v13 = vmul.f32 0.5, %v2705_v59 }
 0xa82   : > { %v2707_v15 = vsub.f32 1.5, %v2706_v13 }
 0xa84   : > { %v2708_v16 = vmul.f32 %v3377_v34, %v2707_v15 }
 0xa86   : > { %v2712_v1 = vsel %vm2711_vm7, %v3377_v34, %v2708_v16 }
 0xa87   : > { %v2713_v27 = vmul.f32 %v2712_v1, %v2696_v23 }
 0xa89   : > { %v2715_v18 = vmul.f32 %v2714_v46, %v2713_v27 }
 0xa8b   : > { %v2717_v49 = vadd.f32 %v2716_v42, %v2715_v18 }
 0xa8d   : > { %v2748_v28 = vadd.f32 %v2747_v41, %v2717_v49 }
 0xa8f   : > { %v2749_v40 = vmax.f32 %v2748_v28, 0.0 }
 0xa91   : > { %3199 = vmatmul.msk.f32.vlgmr.msrb.gmra.mxu1 %vm5567_vm1, %v2749_v40 }
 0xb0e   : > { %v2775_v5 = vpop.f32.mrf.mxu1 }
 0xb0f   : > { %v5428_v52 = vadd.f32 %v2775_v5, %v2754_v62  ;;  %v2954_v62 = vld [vmem:[#allocation4 + $0x18] sm:$0xff] }
 0xb10   : > { %2977 = vmatpush.msra.mxu2 %v2954_v62 }
 0xb11   : > { %3201 = vmatmul.msk.f32.vlgmr.msrb.gmra.mxu2 %vm2782_vm6, %v5428_v52  ;;  %3203 = vmatmul.msk.f32.vlgmr.msrb.gmra.mxu3 %vm2782_vm6, %v5428_v52 }
 0xb94   : > { %v2810_v12 = vpop.f32.mrf.mxu2  ;;  %v2830_v38 = vpop.f32.mrf.mxu3 }
 0xb95   : > { %v2837_v22 = vadd.f32 %v2836_v47, %v2810_v12  ;;  %v2923_v0 = vadd.f32 %v2922_v39, %v2830_v38 }
 0xb97   : > { %v2839_v26 = vadd.f32 %v2838_v45, %v2837_v22  ;;  %v2925_v31 = vadd.f32 %v2924_v7, %v2923_v0 }
 0xb99   : > { %v2926_v4 = vsel %vm5568_vm8, %v2925_v31, 0.0  ;;  %v2840_v56 = vsel %vm5569_vm9, %v2839_v26, 0.0  ;;  %vm5575_vm9 = vmmov %vm5574_vm2 }
 0xb9a   : > { %2927 = vadd.xlane.f32.xlu0 %v2926_v4  ;;  %2841 = vadd.xlane.f32.xlu2 %v2840_v56 }
 0xc0d   : > { %v2928_v24 = vpop.xlane.xlu0 %2927  ;;  %v2842_v58 = vpop.xlane.xlu2 %2841 }
 0xc0e   : > { %v2929_v61 = vmul.f32 %v2928_v24, %v3880_v44  ;;  %v2843_v2 = vmul.f32 %v2842_v58, %v3880_v44  ;;  %v2948_v24 = vperm.slane %v5437_v9, 7 }
 0xc10   : > { %v5447_v23 = vsub.f32 %v2925_v31, %v2929_v61  ;;  %v2844_v14 = vsub.f32 %v2839_v26, %v2843_v2  ;;  %v2918_v61 = vperm.slane %v5437_v9, 4 }
 0xc12   : > { %v2931_v60 = vmul.f32 %v5447_v23, %v5447_v23  ;;  %v2845_v50 = vmul.f32 %v2844_v14, %v2844_v14 }
 0xc14   : > { %v2932_v55 = vsel %vm5570_vm10, %v2931_v60, 0.0  ;;  %v2846_v36 = vsel %vm5571_vm11, %v2845_v50, 0.0  ;;  %v2920_v50 = vperm.slane %v5437_v9, 5  ;;  %vm2982_vm10 = vcmask 7168  }
 0xc15   : > { %2933 = vadd.xlane.f32.xlu1 %v2932_v55  ;;  %2847 = vadd.xlane.f32.xlu2 %v2846_v36 }
 0xc88   : > { %v2848_v21 = vpop.xlane.xlu2 %2847  ;;  %v2934_v41 = vpop.xlane.xlu1 %2933 }
 0xc89   : > { %v2849_v63 = vmul.f32 %v2848_v21, %v3880_v44  ;;  %v2935_v49 = vmul.f32 %v2934_v41, %v3880_v44 }
 0xc8b   : > { %v2850_v11 = vadd.f32 1e-05, %v2849_v63  ;;  %v2936_v28 = vadd.f32 1e-05, %v2935_v49 }
 0xc8d   : > { %3378 = vrsqrt.f32 %v2850_v11  ;;  %vm2857_vm0 = vweird.f32 %v2850_v11  ;;  %vm2943_vm15 = vweird.f32 %v2936_v28 }
 0xc8e   : > { %3380 = vrsqrt.f32 %v2936_v28 }
 0xc93   : > { %v3379_v30 = vpop.eup %3378 }
 0xc94   : > { %v2852_v51 = vmul.f32 %v3379_v30, %v2850_v11  ;;  %vm2858_vm12 = vweird.f32 %v3379_v30  ;;  %v3381_v40 = vpop.eup %3380 }
 0xc95   : > { %vm2859_vm13 = vmor %vm2857_vm0, %vm2858_vm12  ;;  %v2938_v25 = vmul.f32 %v3381_v40, %v2936_v28  ;;  %vm2944_vm4 = vweird.f32 %v3381_v40 }
 0xc96   : > { %v2853_v3 = vmul.f32 %v3379_v30, %v2852_v51  ;;  %vm2945_vm7 = vmor %vm2943_vm15, %vm2944_vm4 }
 0xc97   : > { %v2939_v5 = vmul.f32 %v3381_v40, %v2938_v25 }
 0xc98   : > { %v2854_v54 = vmul.f32 0.5, %v2853_v3 }
 0xc99   : > { %v2940_v7 = vmul.f32 0.5, %v2939_v5 }
 0xc9a   : > { %v2855_v33 = vsub.f32 1.5, %v2854_v54 }
 0xc9b   : > { %v2941_v12 = vsub.f32 1.5, %v2940_v7 }
 0xc9c   : > { %v2856_v34 = vmul.f32 %v3379_v30, %v2855_v33 }
 0xc9d   : > { %v2942_v22 = vmul.f32 %v3381_v40, %v2941_v12 }
 0xc9e   : > { %v2860_v6 = vsel %vm2859_vm13, %v3379_v30, %v2856_v34 }
 0xc9f   : > { %v2861_v59 = vmul.f32 %v2860_v6, %v2844_v14  ;;  %v2946_v31 = vsel %vm2945_vm7, %v3381_v40, %v2942_v22  ;;  %v3273_v14 = vld [vmem:[%s5487_s7 + $0x38] ss:$0 sm:$0xff] }
 0xca1   : > { %v2863_v13 = vmul.f32 %v2862_v43, %v2861_v59 }
 0xca3   : > { %v2865_v15 = vadd.f32 %v2864_v20, %v2863_v13 }
 0xca5   : > { %v2866_v48 = vmax.f32 %v2865_v15, 0.0 }
 0xca7   : > { %3206 = vmatmul.msk.f32.vlgmr.msra.gmra.mxu1 %vm5572_vm14, %v2866_v48  ;;  %vm3020_vm14 = vcmask 105472  }
 0xd24   : > { %v2893_v16 = vpop.f32.mrf.mxu1 }
 0xd25   : > { %v2894_v46 = vadd.f32 %v2893_v16, %v2872_v19 }
 0xd27   : > { %v2896_v1 = vsel %vm5573_vm5, %v2894_v46, 0.0 }
 0xd28   : > { %2897 = vadd.xlane.f32.xlu2 %v2896_v1 }
 0xd9b   : > { %v2898_v8 = vpop.xlane.xlu2 %2897 }
 0xd9c   : > { %v2899_v17 = vmul.f32 %v2898_v8, %v3880_v44 }
 0xd9e   : > { %v2900_v42 = vsub.f32 %v2894_v46, %v2899_v17 }
 0xda0   : > { %v2901_v27 = vmul.f32 %v2900_v42, %v2900_v42 }
 0xda2   : > { %v2902_v18 = vsel %vm5574_vm2, %v2901_v27, 0.0 }
 0xda3   : > { %2903 = vadd.xlane.f32.xlu2 %v2902_v18 }
 0xe16   : > { %v2904_v47 = vpop.xlane.xlu2 %2903 }
 0xe17   : > { %v2905_v39 = vmul.f32 %v2904_v47, %v3880_v44  ;;  %v2947_v44 = vmul.f32 %v2946_v31, %v5447_v23  ;;  %v2958_v23 = vld [vmem:[#allocation4 + $0x98] ss:$0 sm:$0xff] }
 0xe19   : > { %v2906_v45 = vadd.f32 1e-05, %v2905_v39  ;;  %v2949_v60 = vmul.f32 %v2948_v24, %v2947_v44 }
 0xe1b   : > { %3382 = vrsqrt.f32 %v2906_v45  ;;  %vm2913_vm3 = vweird.f32 %v2906_v45  ;;  %v2951_v57 = vadd.f32 %v3273_v14, %v2949_v60 }
 0xe21   : > { %v3383_v38 = vpop.eup %3382 }
 0xe22   : > { %v2908_v0 = vmul.f32 %v3383_v38, %v2906_v45  ;;  %vm2914_vm1 = vweird.f32 %v3383_v38 }
 0xe23   : > { %vm2915_vm8 = vmor %vm2913_vm3, %vm2914_vm1 }
 0xe24   : > { %v2909_v26 = vmul.f32 %v3383_v38, %v2908_v0 }
 0xe26   : > { %v2910_v4 = vmul.f32 0.5, %v2909_v26 }
 0xe28   : > { %v2911_v56 = vsub.f32 1.5, %v2910_v4 }
 0xe2a   : > { %v2912_v58 = vmul.f32 %v3383_v38, %v2911_v56 }
 0xe2c   : > { %v2916_v2 = vsel %vm2915_vm8, %v3383_v38, %v2912_v58 }
 0xe2d   : > { %v2917_v55 = vmul.f32 %v2916_v2, %v2900_v42 }
 0xe2f   : > { %v2919_v36 = vmul.f32 %v2918_v61, %v2917_v55 }
 0xe31   : > { %v2921_v29 = vadd.f32 %v2920_v50, %v2919_v36 }
 0xe33   : > { %v2952_v10 = vadd.f32 %v2951_v57, %v2921_v29 }
 0xe35   : > { %v2953_v35 = vmax.f32 %v2952_v10, 0.0 }
 0xe37   : > { %3207 = vmatmul.msk.f32.vlgmr.msra.gmra.mxu2 %vm5575_vm9, %v2953_v35 }
 0xeba   : > { %v2979_v21 = vpop.f32.mrf.mxu2 }
 0xebb   : > { %v2980_v63 = vadd.f32 %v2979_v21, %v2958_v23 }
 0xebd   : > { %v2983_v11 = vsel %vm2982_vm10, %v2980_v63, -inf }
 0xebe   : > { %v2984_v30 = vrot.slane %v2983_v11, 4 }
 0xec0   : > { %v2985_v51 = vmax.f32 %v2983_v11, %v2984_v30 }
 0xec2   : > { %v2986_v3 = vrot.slane %v2985_v51, 2 }
 0xec4   : > { %v2987_v54 = vmax.f32 %v2985_v51, %v2986_v3 }
 0xec6   : > { %v2988_v33 = vrot.slane %v2987_v54, 1 }
 0xec8   : > { %v2989_v34 = vmax.f32 %v2987_v54, %v2988_v33 }
 0xeca   : > { %v2990_v9 = vsub.f32 %v2980_v63, %v2989_v34 }
 0xecc   : > { %v2991_v43 = vmul.f32 1.442695, %v2990_v9 }
 0xece   : > { %3384 = vpow2.f32 %v2991_v43 }
 0xed4   : > { %v3385_v6 = vpop.eup %3384 }
 0xed5   : > { %v2993_v59 = vsel %vm2982_vm10, %v3385_v6, 0.0 }
 0xed6   : > { %v2994_v20 = vrot.slane %v2993_v59, 4 }
 0xed8   : > { %v2995_v13 = vadd.f32 %v2994_v20, %v2993_v59 }
 0xeda   : > { %v2996_v15 = vrot.slane %v2995_v13, 2 }
 0xedc   : > { %v2997_v48 = vadd.f32 %v2996_v15, %v2995_v13 }
 0xede   : > { %v2998_v19 = vrot.slane %v2997_v48, 1 }
 0xee0   : > { %v2999_v16 = vadd.f32 %v2998_v19, %v2997_v48 }
 0xee2   : > { %3386 = vrcp.f32 %v2999_v16  ;;  %v3011_v17 = vand.u32 2147483648, %v2999_v16  ;;  %v3009_v27 = vand.u32 2147483647, %v2999_v16  ;;  %vm3005_vm12 = vweird.f32 %v2999_v16 }
 0xee4   : > { %v3012_v41 = vor.u32 1.1754944e-38, %v3011_v17  ;;  %vm3010_vm13 = vcmp.eq.f32.partialorder %v3009_v27, 8.507059e+37 }
 0xee8   : > { %v3387_v46 = vpop.eup %3386 }
 0xee9   : > { %v3001_v1 = vmul.f32 %v3387_v46, %v2999_v16  ;;  %vm3006_vm11 = vweird.f32 %v3387_v46 }
 0xeea   : > { %vm3007_vm0 = vmor %vm3005_vm12, %vm3006_vm11 }
 0xeeb   : > { %v3002_v8 = vsub.f32 1.0, %v3001_v1 }
 0xeed   : > { %v3003_v42 = vmul.f32 %v3387_v46, %v3002_v8 }
 0xeef   : > { %v3004_v18 = vadd.f32 %v3387_v46, %v3003_v42 }
 0xef1   : > { %v3008_v49 = vsel %vm3007_vm0, %v3387_v46, %v3004_v18 }
 0xef2   : > { %v3013_v28 = vsel %vm3010_vm13, %v3012_v41, %v3008_v49 }
 0xef3   : > { %v3014_v40 = vmul.f32 %v3385_v6, %v3013_v28 }
 0xef5   : > { %3016 = vrot.lane.b32.xlu0 %v3014_v40, %s3486_s11 }
 0xf67   : > { %v3017_v53 = vpop.permute.xlu0 %3016 }
 0xf68   : > { %v3019_v37 = vsel %vm2782_vm6, %v5428_v52, %v3017_v53 }
 0xf69   : > { %v3021_v25 = vsel %vm3020_vm14, %v3019_v37, 0.0 }
 0xf6a   : > { %3022 = vst [vmem:[%s351_s25] sm:$0xff] %v3021_v25 }
 0xf6b PF: > { %s20_s27 = sadd.s32 1, %s3473_s27  }
 0xf6c   : > { %p17_p7 = scmp.ge.s32.totalorder %s20_s27, 6  }
 0xf6e   :  { %19 = sbr.rel (!%p17_p7) target bundleno = 2 (0x2), region = 100 }
 0xf73   :  { %3042 = vsyncpa [#allocation3], 1 }
 0xf74   :  { %3044 = vsyncpa [#allocation3 + $0x1], 1 }
 0xf75   :  { %3045 = vsyncpa [#allocation5], 1 }

</bundles_post_ra>
